<compile_context>
chip_gen: v6e
topology: v6e:2x2x1
jax: 0.10.0
libtpu: 0.0.40
codegen_flags: <defaults>
</compile_context>

<pallas_src>
import functools

import jax
import jax.numpy as jnp
from jax.experimental import pallas as pl
from jax.experimental.pallas import tpu as pltpu


def _round_up(v, m):
    return ((v + m - 1) // m) * m


# ----------------------------------------------------------------------------
# Fused encoder kernel: FPN + 2D head + 3D head + soft-argmax, one grid step
# per row block (row block = nb whole batch elements x h*w spatial rows).
# ----------------------------------------------------------------------------

def _fused_encoder_kernel(
    patches_ref,
    w_fpn1_ref, b_fpn1_ref, w_fpn2_ref, b_fpn2_ref,
    w_res2_ref, b_res2_ref, w_head2_ref, b_head2_ref,
    w3in_ref, w3enc_ref, b3in_ref,
    w_res3_ref, b_res3_ref, w_head3_ref, b_head3_ref,
    sa_row_ref, sa_col_ref,
    o_misc_ref, o_2d_ref, o_3d_ref, o_sa_ref,
    *, stacks, num_joints, in_chs, hid, depth, spatial, nb,
    c2_pad, c3_pad, hm3_off, misc_pad,
):
    def mm(x, w):
        # bf16 MXU matmul, f32 accumulation.
        return jnp.dot(x.astype(jnp.bfloat16), w,
                       preferred_element_type=jnp.float32)

    J, D, S = num_joints, depth, spatial
    bf16 = jnp.bfloat16

    # --- FPN (patch embed + two pointwise convs) --------------------------
    # TODO(synk): real FPN (ResNet + lateral/top-down) source not provided.
    x = patches_ref[...]
    f = jnp.maximum(mm(x, w_fpn1_ref[...]) + b_fpn1_ref[...], 0.0)
    feat = mm(f, w_fpn2_ref[...]) + b_fpn2_ref[...]             # (BM, in_chs)

    # --- hand_2dhead: residual stacks, fused [enc | hm | seg] head ---------
    # TODO(synk): hourglass internals approximated by pointwise stacks.
    enc = feat
    res2 = None
    for s in range(stacks):
        hmid = jnp.maximum(mm(enc, w_res2_ref[s]) + b_res2_ref[s], 0.0)
        res2 = mm(hmid, w_head2_ref[s]) + b_head2_ref[s]        # (BM, c2_pad)
        enc = enc + res2[:, :in_chs]                            # lane-0 slice
        o_2d_ref[:, s * c2_pad:(s + 1) * c2_pad] = res2.astype(bf16)

    # --- hand_3dhead input projection ------------------------------------
    # [hm|seg] contribution folded into a full-width matmul (zero rows
    # outside the hm/seg columns) so no unaligned lane slice is needed.
    enc3 = jnp.maximum(mm(res2, w3in_ref[...]) + mm(enc, w3enc_ref[...])
                       + b3in_ref[...], 0.0)                    # (BM, hid)

    # --- hand_3dhead stacks + fused HM3D2UVD soft-argmax -------------------
    for s in range(stacks):
        hmid3 = jnp.maximum(mm(enc3, w_res3_ref[s]) + b_res3_ref[s], 0.0)
        res3 = mm(hmid3, w_head3_ref[s]) + b_head3_ref[s]       # (BM, c3_pad)
        enc3 = enc3 + res3[:, :hid]                             # lane-0 slice
        o_3d_ref[:, s * c3_pad:(s + 1) * c3_pad] = res3.astype(bf16)

        # soft-argmax on the f32 hm3d columns while they are still in VMEM.
        # A block-global shift is mathematically exact for softmax (constant
        # within every (n, j) group); only extreme dynamic range could
        # underflow.  TODO(synk): original HM3D2UVD source not provided.
        hm = res3[:, hm3_off:hm3_off + J * D]                   # 128-aligned
        m = jnp.max(jnp.max(hm, axis=1, keepdims=True), axis=0, keepdims=True)
        p = jnp.exp(hm - m)                                     # (BM, J*D) f32
        for n in range(nb):
            pn = p[n * S:(n + 1) * S, :]                        # (S, J*D)
            # rows of sa_row: [u(x), v(y), 1, 0...]; columns of sa_col:
            # [per-joint sum | per-joint d-weighted sum]
            t = jnp.dot(sa_row_ref[...], pn,
                        preferred_element_type=jnp.float32)     # (8, J*D)
            r = jnp.dot(t, sa_col_ref[...],
                        preferred_element_type=jnp.float32)     # (8, 2*Jp)
            o_sa_ref[n, s * 8:(s + 1) * 8, :] = r

    # --- packed narrow outputs: [feat | encoding | temp] -> one 128-lane ---
    packed = jnp.concatenate([feat, enc, enc3], axis=-1)
    if misc_pad > packed.shape[-1]:
        packed = jnp.concatenate(
            [packed, jnp.zeros((packed.shape[0], misc_pad - packed.shape[-1]),
                               jnp.float32)], axis=-1)
    o_misc_ref[...] = packed


# ----------------------------------------------------------------------------
# Small elementwise glue (not a hot path): perspective uvd -> xyz
# ----------------------------------------------------------------------------

_DEPTH_RANGE = 3.0  # relative depth span in bone-length units


def uvd2xyz_persp(uvd, joint_root, joint_bone, intr, inp_res):
    """uvd in [0,1]^3 -> camera-space xyz via perspective back-projection."""
    # TODO(synk): original uvd2xyz source not provided; standard formulation.
    uv = uvd[..., :2] * inp_res
    d_rel = (uvd[..., 2] - 0.5) * _DEPTH_RANGE
    root_z = joint_root[:, 2:3]
    z = d_rel * joint_bone + root_z
    fx = intr[:, 0, 0][:, None]
    fy = intr[:, 1, 1][:, None]
    cx = intr[:, 0, 2][:, None]
    cy = intr[:, 1, 2][:, None]
    x = (uv[..., 0] - cx) / fx * z
    y = (uv[..., 1] - cy) / fy * z
    return jnp.stack([x, y, z], axis=-1)


# ----------------------------------------------------------------------------
# hand_encoder (synthetic parameters, Pallas compute)
# ----------------------------------------------------------------------------


class HandEncoderPallas:
    def __init__(self, net_parts, stacks=2, blocks=1, num_joints=21,
                 in_chs=32, h=8, w=8, depth_bins=8, img_res=32, key=None):
        self.in_chs = in_chs
        self.stacks = stacks
        self.blocks = blocks
        self.num_joints = num_joints
        self.h = h
        self.w = w
        self.D = depth_bins
        self.img_res = img_res
        self.net_parts = ['FPN', 'hand_2dhead'] + \
            (['hand_3dhead'] if 'hand_3dhead' in net_parts else [' '])

        hid = 2 * in_chs
        self.hid = hid
        J, D = num_joints, depth_bins
        stride = img_res // h
        c_patch = 3 * stride * stride

        # fused head layouts (lane-dense, residual slice at lane 0):
        #   2D: [enc(in_chs) | hm(J) | seg(1)]                     -> c2_pad
        #   3D: [enc(hid) | 0-pad | hm3d(J*D) | dep(J)]            -> c3_pad
        self.c2_head = in_chs + J + 1
        self.c2_pad = _round_up(self.c2_head, 128)
        self.hm3_off = _round_up(hid, 128)            # hm3d starts lane-aligned
        self.c3_head = self.hm3_off + J * D + J
        self.c3_pad = _round_up(self.c3_head, 128)
        self.misc_pad = _round_up(2 * in_chs + hid, 128)
        self.sa_jpad = _round_up(J, 128)

        key = jax.random.PRNGKey(42) if key is None else key
        self._kctr = [key]

        def p(shape):
            self._kctr[0], sub = jax.random.split(self._kctr[0])
            return 0.02 * jax.random.normal(sub, shape, jnp.float32)

        def pad_cols(m, width):
            return jnp.pad(m, ((0, 0), (0, width - m.shape[1])))

        bf16 = jnp.bfloat16

        # TODO(synk): FPN internals not provided; patch-embed + 2 convs.
        self.w_fpn1 = p((c_patch, hid)).astype(bf16)
        self.b_fpn1 = p((hid,)).reshape(1, hid)
        self.w_fpn2 = p((hid, in_chs)).astype(bf16)
        self.b_fpn2 = p((in_chs,)).reshape(1, in_chs)

        # TODO(synk): hand_2dhead internals approximated (res + fused head).
        w_res2, b_res2, w_head2, b_head2 = [], [], [], []
        for _ in range(stacks):
            w_res2.append(p((in_chs, hid)))
            b_res2.append(p((hid,)))
            w_cat = jnp.concatenate([p((hid, in_chs)), p((hid, J)), p((hid, 1))], 1)
            b_cat = jnp.concatenate([p((in_chs,)), p((J,)), p((1,))])
            w_head2.append(pad_cols(w_cat, self.c2_pad))
            b_head2.append(jnp.pad(b_cat, (0, self.c2_pad - self.c2_head)))
        self.w_res2 = jnp.stack(w_res2).astype(bf16)             # (S, in_chs, hid)
        self.b_res2 = jnp.stack(b_res2)[:, None, :]              # (S, 1, hid)
        self.w_head2 = jnp.stack(w_head2).astype(bf16)           # (S, hid, c2_pad)
        self.b_head2 = jnp.stack(b_head2)[:, None, :]            # (S, 1, c2_pad)

        # TODO(synk): hand_3dhead internals approximated likewise.
        # [hm|seg] -> hid projection, folded to full c2_pad width (zero rows
        # outside the hm/seg columns) so the kernel never lane-slices hm_seg.
        w3hm = p((J + 1, hid))
        self.w3in = jnp.concatenate(
            [jnp.zeros((in_chs, hid), jnp.float32), w3hm,
             jnp.zeros((self.c2_pad - in_chs - (J + 1), hid), jnp.float32)],
            axis=0).astype(bf16)                                 # (c2_pad, hid)
        self.w3enc = p((in_chs, hid)).astype(bf16)
        self.b3in = p((hid,)).reshape(1, hid)

        w_res3, b_res3, w_head3, b_head3 = [], [], [], []
        pad34 = self.hm3_off - hid
        for _ in range(stacks):
            w_res3.append(p((hid, hid)))
            b_res3.append(p((hid,)))
            w_cat = jnp.concatenate(
                [p((hid, hid)), jnp.zeros((hid, pad34), jnp.float32),
                 p((hid, J * D)), p((hid, J))], 1)
            b_cat = jnp.concatenate(
                [p((hid,)), jnp.zeros((pad34,), jnp.float32), p((J * D,)), p((J,))])
            w_head3.append(pad_cols(w_cat, self.c3_pad))
            b_head3.append(jnp.pad(b_cat, (0, self.c3_pad - self.c3_head)))
        self.w_res3 = jnp.stack(w_res3).astype(bf16)             # (S, hid, hid)
        self.b_res3 = jnp.stack(b_res3)[:, None, :]              # (S, 1, hid)
        self.w_head3 = jnp.stack(w_head3).astype(bf16)           # (S, hid, c3_pad)
        self.b_head3 = jnp.stack(b_head3)[:, None, :]            # (S, 1, c3_pad)

        # soft-argmax bases (hoisted out of forward), kept f32 for accuracy:
        #   sa_row (8, S): rows [u(x), v(y), 1, 0...] over spatial positions.
        #   sa_col (J*D, 2*Jp): per-joint indicator | per-joint d-weighted.
        S = h * w
        yy, xx = jnp.meshgrid(jnp.arange(h, dtype=jnp.float32),
                              jnp.arange(w, dtype=jnp.float32), indexing="ij")
        u = ((xx + 0.5) / w).ravel()
        v = ((yy + 0.5) / h).ravel()
        sa_row = jnp.zeros((8, S), jnp.float32)
        sa_row = sa_row.at[0].set(u).at[1].set(v).at[2].set(1.0)
        self.sa_row = sa_row

        Jp = self.sa_jpad
        jidx = jnp.repeat(jnp.arange(J), D)
        dcoord = jnp.tile((jnp.arange(D, dtype=jnp.float32) + 0.5) / D, J)
        sa_col = jnp.zeros((J * D, 2 * Jp), jnp.float32)
        sa_col = sa_col.at[jnp.arange(J * D), jidx].set(1.0)
        sa_col = sa_col.at[jnp.arange(J * D), Jp + jidx].set(dcoord)
        self.sa_col = sa_col

    # ---- forward --------------------------------------------------------
    def __call__(self, x, info):
        joint_root = info['joint_root']     # (N, 3)
        joint_bone = info['joint_bone']     # (N, 1)
        intr = info['intr']                 # (N, 3, 3)

        N, C, Himg, _ = x.shape
        h, w, J, D = self.h, self.w, self.num_joints, self.D
        stacks, in_chs, hid = self.stacks, self.in_chs, self.hid
        c2p, c3p = self.c2_pad, self.c3_pad
        hm3_off, misc_pad, Jp = self.hm3_off, self.misc_pad, self.sa_jpad
        stride = Himg // h
        S = h * w
        M = N * S

        # Row-block size: whole batch elements per block (needed by the fused
        # soft-argmax), >=128 rows when possible to fill the MXU.
        nb = max(1, min(N, max(1, 128 // S)))
        while N % nb:
            nb -= 1
        BM = nb * S
        grid = (M // BM,)

        # TODO(synk): NCHW -> patch-rows relayout stays in XLA; negligible at
        # 32x32 but should fold into conv BlockSpecs at real resolutions.
        x_nhwc = jnp.transpose(x, (0, 2, 3, 1))
        patches = x_nhwc.reshape(N, h, stride, w, stride, C)
        patches = jnp.transpose(patches, (0, 1, 3, 2, 4, 5)).reshape(
            M, stride * stride * C)

        kernel = functools.partial(
            _fused_encoder_kernel, stacks=stacks, num_joints=J, in_chs=in_chs,
            hid=hid, depth=D, spatial=S, nb=nb, c2_pad=c2p, c3_pad=c3p,
            hm3_off=hm3_off, misc_pad=misc_pad)

        weights = (self.w_fpn1, self.b_fpn1, self.w_fpn2, self.b_fpn2,
                   self.w_res2, self.b_res2, self.w_head2, self.b_head2,
                   self.w3in, self.w3enc, self.b3in,
                   self.w_res3, self.b_res3, self.w_head3, self.b_head3,
                   self.sa_row, self.sa_col)

        def _row_spec(last_dim):
            return pl.BlockSpec((BM, last_dim), lambda i: (i, 0))

        def _full_spec(shape):
            nd = len(shape)
            return pl.BlockSpec(tuple(shape), lambda i, _nd=nd: (0,) * _nd)

        in_specs = [_row_spec(patches.shape[1])] + \
                   [_full_spec(wt.shape) for wt in weights]

        out_shapes = (
            jax.ShapeDtypeStruct((M, misc_pad), jnp.float32),           # [feat|enc|temp]
            jax.ShapeDtypeStruct((M, stacks * c2p), jnp.bfloat16),      # 2D head raw
            jax.ShapeDtypeStruct((M, stacks * c3p), jnp.bfloat16),      # 3D head raw
            jax.ShapeDtypeStruct((N, stacks * 8, 2 * Jp), jnp.float32), # softargmax sums
        )
        out_specs = (
            _row_spec(misc_pad),
            _row_spec(stacks * c2p),
            _row_spec(stacks * c3p),
            pl.BlockSpec((nb, stacks * 8, 2 * Jp), lambda i: (i, 0, 0)),
        )

        o_misc, o_2d, o_3d, o_sa = pl.pallas_call(
            kernel,
            out_shape=out_shapes,
            grid=grid,
            in_specs=in_specs,
            out_specs=out_specs,
            compiler_params=pltpu.CompilerParams(
                dimension_semantics=("parallel",)),   # v7x: row blocks per TC
        )(patches, *weights)

        def to_nchw(flat, c):
            return jnp.transpose(flat.reshape(N, h, w, c), (0, 3, 1, 2))

        feat = to_nchw(o_misc[:, :in_chs], in_chs)
        encoding_last = to_nchw(o_misc[:, in_chs:2 * in_chs], in_chs)

        # --- hand_2dhead outputs (bf16 heatmaps/seg) ---
        pred_hm, pred_seg = [], []
        for s in range(stacks):
            blk = o_2d[:, s * c2p:(s + 1) * c2p]
            pred_hm.append(to_nchw(blk[:, in_chs:in_chs + J], J))
            pred_seg.append(to_nchw(blk[:, in_chs + J:in_chs + J + 1], 1))

        pred_uvd, pred_dep, pred_joint, temp = [], [], [], 0
        if 'hand_3dhead' in self.net_parts:
            temp = to_nchw(o_misc[:, 2 * in_chs:2 * in_chs + hid], hid)
            pred_hm3d = []
            for s in range(stacks):
                blk3 = o_3d[:, s * c3p:(s + 1) * c3p]
                hm3d = jnp.transpose(
                    blk3[:, hm3_off:hm3_off + J * D].reshape(N, h, w, J, D),
                    (0, 3, 4, 1, 2))                       # (N, J, D, h, w)
                pred_hm3d.append(hm3d)
                pred_dep.append(to_nchw(blk3[:, hm3_off + J * D:
                                             hm3_off + J * D + J], J))

                # finalize fused soft-argmax (exact divide, tiny)
                r = o_sa[:, s * 8:s * 8 + 3, :]            # (N, 3, 2*Jp)
                num_u = r[:, 0, :J]
                num_v = r[:, 1, :J]
                zsum = r[:, 2, :J]
                num_d = r[:, 2, Jp:Jp + J]
                uvd = jnp.stack([num_u, num_v, num_d], axis=-1) / zsum[..., None]
                pred_uvd.append(uvd)
                pred_joint.append(uvd2xyz_persp(uvd, joint_root, joint_bone,
                                                intr, self.img_res))

            pred_results = {'pred_hm2d': pred_hm, 'pred_hm3d': pred_hm3d,
                            'pred_seg': pred_seg, 'pred_dep': pred_dep,
                            'pred_uvd': pred_uvd, 'pred_joint': pred_joint}
        else:
            pred_results = {'pred_hm2d': pred_hm, 'pred_seg': pred_seg}

        temp_results = {'encoding': encoding_last, 'temp': temp, 'feat': feat}
        return pred_results, temp_results


# ----------------------------------------------------------------------------
# main
# ----------------------------------------------------------------------------

if __name__ == "__main__":
    key = jax.random.PRNGKey(0)
    k_x, k_root, k_bone = jax.random.split(key, 3)

    N, img_res = 2, 32
    x = jax.random.normal(k_x, (N, 3, img_res, img_res), jnp.float32)
    joint_root = jax.random.normal(k_root, (N, 3), jnp.float32) * 0.1 + \
        jnp.array([0.0, 0.0, 0.6])
    joint_bone = jnp.abs(jax.random.normal(k_bone, (N, 1), jnp.float32)) * 0.02 + 0.08
    intr = jnp.tile(jnp.array([[100.0, 0.0, 16.0],
                               [0.0, 100.0, 16.0],
                               [0.0, 0.0, 1.0]], jnp.float32)[None], (N, 1, 1))
    info = {'joint_root': joint_root, 'joint_bone': joint_bone, 'intr': intr}

    model = HandEncoderPallas(net_parts=['FPN', 'hand_2dhead', 'hand_3dhead'],
                              stacks=2, blocks=1, num_joints=21,
                              in_chs=32, h=8, w=8, depth_bins=8, img_res=img_res)

    fwd = jax.jit(model.__call__)
    pred_results, temp_results = fwd(x, info)

    leaves = jax.tree_util.tree_leaves((pred_results, temp_results))
    for leaf in leaves:
        if isinstance(leaf, jnp.ndarray):
            jax.block_until_ready(leaf)

    # light sanity checks
    assert pred_results['pred_hm2d'][-1].shape == (N, 21, 8, 8)
    assert pred_results['pred_hm3d'][-1].shape == (N, 21, 8, 8, 8)
    assert pred_results['pred_uvd'][-1].shape == (N, 21, 3)
    assert pred_results['pred_joint'][-1].shape == (N, 21, 3)
    assert bool(jnp.all(jnp.isfinite(pred_results['pred_uvd'][-1])))
    assert bool(jnp.all(jnp.isfinite(pred_results['pred_joint'][-1])))

    print("KERNEL_OK")
</pallas_src>

<mosaic_0001>
module attributes {stable_mosaic.version = 11 : i64} {
  func.func @_fused_encoder_kernel(%arg0: i32, %arg1: memref<128x48xf32, #tpu.memory_space<vmem>>, %arg2: memref<48x64xbf16, #tpu.memory_space<vmem>>, %arg3: memref<1x64xf32, #tpu.memory_space<vmem>>, %arg4: memref<64x32xbf16, #tpu.memory_space<vmem>>, %arg5: memref<1x32xf32, #tpu.memory_space<vmem>>, %arg6: memref<2x32x64xbf16, #tpu.memory_space<vmem>>, %arg7: memref<2x1x64xf32, #tpu.memory_space<vmem>>, %arg8: memref<2x64x128xbf16, #tpu.memory_space<vmem>>, %arg9: memref<2x1x128xf32, #tpu.memory_space<vmem>>, %arg10: memref<128x64xbf16, #tpu.memory_space<vmem>>, %arg11: memref<32x64xbf16, #tpu.memory_space<vmem>>, %arg12: memref<1x64xf32, #tpu.memory_space<vmem>>, %arg13: memref<2x64x64xbf16, #tpu.memory_space<vmem>>, %arg14: memref<2x1x64xf32, #tpu.memory_space<vmem>>, %arg15: memref<2x64x384xbf16, #tpu.memory_space<vmem>>, %arg16: memref<2x1x384xf32, #tpu.memory_space<vmem>>, %arg17: memref<8x64xf32, #tpu.memory_space<vmem>>, %arg18: memref<168x256xf32, #tpu.memory_space<vmem>>, %arg19: memref<128x128xf32, #tpu.memory_space<vmem>>, %arg20: memref<128x256xbf16, #tpu.memory_space<vmem>>, %arg21: memref<128x768xbf16, #tpu.memory_space<vmem>>, %arg22: memref<2x16x256xf32, #tpu.memory_space<vmem>>) attributes {dimension_semantics = [#tpu.dimension_semantics<parallel>], iteration_bounds = array<i64: 1>, scalar_prefetch = 0 : i64, scratch_operands = 0 : i64, tpu.core_type = #tpu.core_type<tc>, window_params = [{transform_indices = @transform_0, window_bounds = array<i64: 128, 48>}, {pipeline_mode = #tpu.pipeline_mode<synchronous>, transform_indices = @transform_1, window_bounds = array<i64: 48, 64>}, {pipeline_mode = #tpu.pipeline_mode<synchronous>, transform_indices = @transform_2, window_bounds = array<i64: 1, 64>}, {pipeline_mode = #tpu.pipeline_mode<synchronous>, transform_indices = @transform_3, window_bounds = array<i64: 64, 32>}, {pipeline_mode = #tpu.pipeline_mode<synchronous>, transform_indices = @transform_4, window_bounds = array<i64: 1, 32>}, {pipeline_mode = #tpu.pipeline_mode<synchronous>, transform_indices = @transform_5, window_bounds = array<i64: 2, 32, 64>}, {pipeline_mode = #tpu.pipeline_mode<synchronous>, transform_indices = @transform_6, window_bounds = array<i64: 2, 1, 64>}, {pipeline_mode = #tpu.pipeline_mode<synchronous>, transform_indices = @transform_7, window_bounds = array<i64: 2, 64, 128>}, {pipeline_mode = #tpu.pipeline_mode<synchronous>, transform_indices = @transform_8, window_bounds = array<i64: 2, 1, 128>}, {pipeline_mode = #tpu.pipeline_mode<synchronous>, transform_indices = @transform_9, window_bounds = array<i64: 128, 64>}, {pipeline_mode = #tpu.pipeline_mode<synchronous>, transform_indices = @transform_10, window_bounds = array<i64: 32, 64>}, {pipeline_mode = #tpu.pipeline_mode<synchronous>, transform_indices = @transform_11, window_bounds = array<i64: 1, 64>}, {pipeline_mode = #tpu.pipeline_mode<synchronous>, transform_indices = @transform_12, window_bounds = array<i64: 2, 64, 64>}, {pipeline_mode = #tpu.pipeline_mode<synchronous>, transform_indices = @transform_13, window_bounds = array<i64: 2, 1, 64>}, {pipeline_mode = #tpu.pipeline_mode<synchronous>, transform_indices = @transform_14, window_bounds = array<i64: 2, 64, 384>}, {pipeline_mode = #tpu.pipeline_mode<synchronous>, transform_indices = @transform_15, window_bounds = array<i64: 2, 1, 384>}, {pipeline_mode = #tpu.pipeline_mode<synchronous>, transform_indices = @transform_16, window_bounds = array<i64: 8, 64>}, {pipeline_mode = #tpu.pipeline_mode<synchronous>, transform_indices = @transform_17, window_bounds = array<i64: 168, 256>}, {transform_indices = @transform_18, window_bounds = array<i64: 128, 128>}, {transform_indices = @transform_19, window_bounds = array<i64: 128, 256>}, {transform_indices = @transform_20, window_bounds = array<i64: 128, 768>}, {transform_indices = @transform_21, window_bounds = array<i64: 2, 16, 256>}]} {
    %c0 = arith.constant 0 : index
    %c0_0 = arith.constant 0 : index
    %0 = vector.load %arg1[%c0, %c0_0] : memref<128x48xf32, #tpu.memory_space<vmem>>, vector<128x48xf32>
    %c0_1 = arith.constant 0 : index
    %c0_2 = arith.constant 0 : index
    %1 = vector.load %arg2[%c0_1, %c0_2] : memref<48x64xbf16, #tpu.memory_space<vmem>>, vector<48x64xbf16>
    %2 = arith.truncf %0 : vector<128x48xf32> to vector<128x48xbf16>
    %cst = arith.constant dense<0.000000e+00> : vector<128x64xf32>
    %3 = tpu.matmul %2, %1, %cst {dimension_numbers = #tpu.dot_dimension_numbers<[1], [0], [0], [1], [0, 0, 1, 1], [], []>} : vector<128x48xbf16>, vector<48x64xbf16>, vector<128x64xf32> -> vector<128x64xf32>
    %c0_3 = arith.constant 0 : index
    %c0_4 = arith.constant 0 : index
    %4 = vector.load %arg3[%c0_3, %c0_4] : memref<1x64xf32, #tpu.memory_space<vmem>>, vector<1x64xf32>
    %5 = vector.broadcast %4 : vector<1x64xf32> to vector<128x64xf32>
    %6 = arith.addf %3, %5 : vector<128x64xf32>
    %cst_5 = arith.constant 0.000000e+00 : f32
    %7 = vector.broadcast %cst_5 : f32 to vector<128x64xf32>
    %8 = arith.maximumf %6, %7 : vector<128x64xf32>
    %c0_6 = arith.constant 0 : index
    %c0_7 = arith.constant 0 : index
    %9 = vector.load %arg4[%c0_6, %c0_7] : memref<64x32xbf16, #tpu.memory_space<vmem>>, vector<64x32xbf16>
    %10 = arith.truncf %8 : vector<128x64xf32> to vector<128x64xbf16>
    %cst_8 = arith.constant dense<0.000000e+00> : vector<128x32xf32>
    %11 = tpu.matmul %10, %9, %cst_8 {dimension_numbers = #tpu.dot_dimension_numbers<[1], [0], [0], [1], [0, 0, 1, 1], [], []>} : vector<128x64xbf16>, vector<64x32xbf16>, vector<128x32xf32> -> vector<128x32xf32>
    %c0_9 = arith.constant 0 : index
    %c0_10 = arith.constant 0 : index
    %12 = vector.load %arg5[%c0_9, %c0_10] : memref<1x32xf32, #tpu.memory_space<vmem>>, vector<1x32xf32>
    %13 = vector.broadcast %12 : vector<1x32xf32> to vector<128x32xf32>
    %14 = arith.addf %11, %13 : vector<128x32xf32>
    %c0_11 = arith.constant 0 : index
    %c0_12 = arith.constant 0 : index
    %c0_13 = arith.constant 0 : index
    %15 = vector.load %arg6[%c0_11, %c0_12, %c0_13] : memref<2x32x64xbf16, #tpu.memory_space<vmem>>, vector<1x32x64xbf16>
    %16 = vector.shape_cast %15 : vector<1x32x64xbf16> to vector<32x64xbf16>
    %17 = arith.truncf %14 : vector<128x32xf32> to vector<128x32xbf16>
    %cst_14 = arith.constant dense<0.000000e+00> : vector<128x64xf32>
    %18 = tpu.matmul %17, %16, %cst_14 {dimension_numbers = #tpu.dot_dimension_numbers<[1], [0], [0], [1], [0, 0, 1, 1], [], []>} : vector<128x32xbf16>, vector<32x64xbf16>, vector<128x64xf32> -> vector<128x64xf32>
    %c0_15 = arith.constant 0 : index
    %c0_16 = arith.constant 0 : index
    %c0_17 = arith.constant 0 : index
    %19 = vector.load %arg7[%c0_15, %c0_16, %c0_17] : memref<2x1x64xf32, #tpu.memory_space<vmem>>, vector<1x1x64xf32>
    %20 = vector.shape_cast %19 : vector<1x1x64xf32> to vector<1x64xf32>
    %21 = vector.broadcast %20 : vector<1x64xf32> to vector<128x64xf32>
    %22 = arith.addf %18, %21 : vector<128x64xf32>
    %cst_18 = arith.constant 0.000000e+00 : f32
    %23 = vector.broadcast %cst_18 : f32 to vector<128x64xf32>
    %24 = arith.maximumf %22, %23 : vector<128x64xf32>
    %c0_19 = arith.constant 0 : index
    %c0_20 = arith.constant 0 : index
    %c0_21 = arith.constant 0 : index
    %25 = vector.load %arg8[%c0_19, %c0_20, %c0_21] : memref<2x64x128xbf16, #tpu.memory_space<vmem>>, vector<1x64x128xbf16>
    %26 = vector.shape_cast %25 : vector<1x64x128xbf16> to vector<64x128xbf16>
    %27 = arith.truncf %24 : vector<128x64xf32> to vector<128x64xbf16>
    %cst_22 = arith.constant dense<0.000000e+00> : vector<128x128xf32>
    %28 = tpu.matmul %27, %26, %cst_22 {dimension_numbers = #tpu.dot_dimension_numbers<[1], [0], [0], [1], [0, 0, 1, 1], [], []>} : vector<128x64xbf16>, vector<64x128xbf16>, vector<128x128xf32> -> vector<128x128xf32>
    %c0_23 = arith.constant 0 : index
    %c0_24 = arith.constant 0 : index
    %c0_25 = arith.constant 0 : index
    %29 = vector.load %arg9[%c0_23, %c0_24, %c0_25] : memref<2x1x128xf32, #tpu.memory_space<vmem>>, vector<1x1x128xf32>
    %30 = vector.shape_cast %29 : vector<1x1x128xf32> to vector<1x128xf32>
    %31 = vector.broadcast %30 : vector<1x128xf32> to vector<128x128xf32>
    %32 = arith.addf %28, %31 : vector<128x128xf32>
    %33 = vector.extract_strided_slice %32 {offsets = [0, 0], sizes = [128, 32], strides = [1, 1]} : vector<128x128xf32> to vector<128x32xf32>
    %34 = arith.addf %14, %33 : vector<128x32xf32>
    %35 = arith.truncf %32 : vector<128x128xf32> to vector<128x128xbf16>
    %c0_26 = arith.constant 0 : index
    %c0_27 = arith.constant 0 : index
    %36 = vector.load %arg20[%c0_26, %c0_27] : memref<128x256xbf16, #tpu.memory_space<vmem>>, vector<128x128xbf16>
    tpu.vector_store %arg20[%c0_26, %c0_27], %35 {strides = array<i32>} : memref<128x256xbf16, #tpu.memory_space<vmem>>, vector<128x128xbf16>,
    %c1 = arith.constant 1 : index
    %c0_28 = arith.constant 0 : index
    %c0_29 = arith.constant 0 : index
    %37 = vector.load %arg6[%c1, %c0_28, %c0_29] : memref<2x32x64xbf16, #tpu.memory_space<vmem>>, vector<1x32x64xbf16>
    %38 = vector.shape_cast %37 : vector<1x32x64xbf16> to vector<32x64xbf16>
    %39 = arith.truncf %34 : vector<128x32xf32> to vector<128x32xbf16>
    %cst_30 = arith.constant dense<0.000000e+00> : vector<128x64xf32>
    %40 = tpu.matmul %39, %38, %cst_30 {dimension_numbers = #tpu.dot_dimension_numbers<[1], [0], [0], [1], [0, 0, 1, 1], [], []>} : vector<128x32xbf16>, vector<32x64xbf16>, vector<128x64xf32> -> vector<128x64xf32>
    %c1_31 = arith.constant 1 : index
    %c0_32 = arith.constant 0 : index
    %c0_33 = arith.constant 0 : index
    %41 = vector.load %arg7[%c1_31, %c0_32, %c0_33] : memref<2x1x64xf32, #tpu.memory_space<vmem>>, vector<1x1x64xf32>
    %42 = vector.shape_cast %41 : vector<1x1x64xf32> to vector<1x64xf32>
    %43 = vector.broadcast %42 : vector<1x64xf32> to vector<128x64xf32>
    %44 = arith.addf %40, %43 : vector<128x64xf32>
    %cst_34 = arith.constant 0.000000e+00 : f32
    %45 = vector.broadcast %cst_34 : f32 to vector<128x64xf32>
    %46 = arith.maximumf %44, %45 : vector<128x64xf32>
    %c1_35 = arith.constant 1 : index
    %c0_36 = arith.constant 0 : index
    %c0_37 = arith.constant 0 : index
    %47 = vector.load %arg8[%c1_35, %c0_36, %c0_37] : memref<2x64x128xbf16, #tpu.memory_space<vmem>>, vector<1x64x128xbf16>
    %48 = vector.shape_cast %47 : vector<1x64x128xbf16> to vector<64x128xbf16>
    %49 = arith.truncf %46 : vector<128x64xf32> to vector<128x64xbf16>
    %cst_38 = arith.constant dense<0.000000e+00> : vector<128x128xf32>
    %50 = tpu.matmul %49, %48, %cst_38 {dimension_numbers = #tpu.dot_dimension_numbers<[1], [0], [0], [1], [0, 0, 1, 1], [], []>} : vector<128x64xbf16>, vector<64x128xbf16>, vector<128x128xf32> -> vector<128x128xf32>
    %c1_39 = arith.constant 1 : index
    %c0_40 = arith.constant 0 : index
    %c0_41 = arith.constant 0 : index
    %51 = vector.load %arg9[%c1_39, %c0_40, %c0_41] : memref<2x1x128xf32, #tpu.memory_space<vmem>>, vector<1x1x128xf32>
    %52 = vector.shape_cast %51 : vector<1x1x128xf32> to vector<1x128xf32>
    %53 = vector.broadcast %52 : vector<1x128xf32> to vector<128x128xf32>
    %54 = arith.addf %50, %53 : vector<128x128xf32>
    %55 = vector.extract_strided_slice %54 {offsets = [0, 0], sizes = [128, 32], strides = [1, 1]} : vector<128x128xf32> to vector<128x32xf32>
    %56 = arith.addf %34, %55 : vector<128x32xf32>
    %57 = arith.truncf %54 : vector<128x128xf32> to vector<128x128xbf16>
    %c0_42 = arith.constant 0 : index
    %c128 = arith.constant 128 : index
    %58 = vector.load %arg20[%c0_42, %c128] : memref<128x256xbf16, #tpu.memory_space<vmem>>, vector<128x128xbf16>
    tpu.vector_store %arg20[%c0_42, %c128], %57 {strides = array<i32>} : memref<128x256xbf16, #tpu.memory_space<vmem>>, vector<128x128xbf16>,
    %c0_43 = arith.constant 0 : index
    %c0_44 = arith.constant 0 : index
    %59 = vector.load %arg10[%c0_43, %c0_44] : memref<128x64xbf16, #tpu.memory_space<vmem>>, vector<128x64xbf16>
    %60 = arith.truncf %54 : vector<128x128xf32> to vector<128x128xbf16>
    %cst_45 = arith.constant dense<0.000000e+00> : vector<128x64xf32>
    %61 = tpu.matmul %60, %59, %cst_45 {dimension_numbers = #tpu.dot_dimension_numbers<[1], [0], [0], [1], [0, 0, 1, 1], [], []>} : vector<128x128xbf16>, vector<128x64xbf16>, vector<128x64xf32> -> vector<128x64xf32>
    %c0_46 = arith.constant 0 : index
    %c0_47 = arith.constant 0 : index
    %62 = vector.load %arg11[%c0_46, %c0_47] : memref<32x64xbf16, #tpu.memory_space<vmem>>, vector<32x64xbf16>
    %63 = arith.truncf %56 : vector<128x32xf32> to vector<128x32xbf16>
    %cst_48 = arith.constant dense<0.000000e+00> : vector<128x64xf32>
    %64 = tpu.matmul %63, %62, %cst_48 {dimension_numbers = #tpu.dot_dimension_numbers<[1], [0], [0], [1], [0, 0, 1, 1], [], []>} : vector<128x32xbf16>, vector<32x64xbf16>, vector<128x64xf32> -> vector<128x64xf32>
    %65 = arith.addf %61, %64 : vector<128x64xf32>
    %c0_49 = arith.constant 0 : index
    %c0_50 = arith.constant 0 : index
    %66 = vector.load %arg12[%c0_49, %c0_50] : memref<1x64xf32, #tpu.memory_space<vmem>>, vector<1x64xf32>
    %67 = vector.broadcast %66 : vector<1x64xf32> to vector<128x64xf32>
    %68 = arith.addf %65, %67 : vector<128x64xf32>
    %cst_51 = arith.constant 0.000000e+00 : f32
    %69 = vector.broadcast %cst_51 : f32 to vector<128x64xf32>
    %70 = arith.maximumf %68, %69 : vector<128x64xf32>
    %c0_52 = arith.constant 0 : index
    %c0_53 = arith.constant 0 : index
    %c0_54 = arith.constant 0 : index
    %71 = vector.load %arg13[%c0_52, %c0_53, %c0_54] : memref<2x64x64xbf16, #tpu.memory_space<vmem>>, vector<1x64x64xbf16>
    %72 = vector.shape_cast %71 : vector<1x64x64xbf16> to vector<64x64xbf16>
    %73 = arith.truncf %70 : vector<128x64xf32> to vector<128x64xbf16>
    %cst_55 = arith.constant dense<0.000000e+00> : vector<128x64xf32>
    %74 = tpu.matmul %73, %72, %cst_55 {dimension_numbers = #tpu.dot_dimension_numbers<[1], [0], [0], [1], [0, 0, 1, 1], [], []>} : vector<128x64xbf16>, vector<64x64xbf16>, vector<128x64xf32> -> vector<128x64xf32>
    %c0_56 = arith.constant 0 : index
    %c0_57 = arith.constant 0 : index
    %c0_58 = arith.constant 0 : index
    %75 = vector.load %arg14[%c0_56, %c0_57, %c0_58] : memref<2x1x64xf32, #tpu.memory_space<vmem>>, vector<1x1x64xf32>
    %76 = vector.shape_cast %75 : vector<1x1x64xf32> to vector<1x64xf32>
    %77 = vector.broadcast %76 : vector<1x64xf32> to vector<128x64xf32>
    %78 = arith.addf %74, %77 : vector<128x64xf32>
    %cst_59 = arith.constant 0.000000e+00 : f32
    %79 = vector.broadcast %cst_59 : f32 to vector<128x64xf32>
    %80 = arith.maximumf %78, %79 : vector<128x64xf32>
    %c0_60 = arith.constant 0 : index
    %c0_61 = arith.constant 0 : index
    %c0_62 = arith.constant 0 : index
    %81 = vector.load %arg15[%c0_60, %c0_61, %c0_62] : memref<2x64x384xbf16, #tpu.memory_space<vmem>>, vector<1x64x384xbf16>
    %82 = vector.shape_cast %81 : vector<1x64x384xbf16> to vector<64x384xbf16>
    %83 = arith.truncf %80 : vector<128x64xf32> to vector<128x64xbf16>
    %cst_63 = arith.constant dense<0.000000e+00> : vector<128x384xf32>
    %84 = tpu.matmul %83, %82, %cst_63 {dimension_numbers = #tpu.dot_dimension_numbers<[1], [0], [0], [1], [0, 0, 1, 1], [], []>} : vector<128x64xbf16>, vector<64x384xbf16>, vector<128x384xf32> -> vector<128x384xf32>
    %c0_64 = arith.constant 0 : index
    %c0_65 = arith.constant 0 : index
    %c0_66 = arith.constant 0 : index
    %85 = vector.load %arg16[%c0_64, %c0_65, %c0_66] : memref<2x1x384xf32, #tpu.memory_space<vmem>>, vector<1x1x384xf32>
    %86 = vector.shape_cast %85 : vector<1x1x384xf32> to vector<1x384xf32>
    %87 = vector.broadcast %86 : vector<1x384xf32> to vector<128x384xf32>
    %88 = arith.addf %84, %87 : vector<128x384xf32>
    %89 = vector.extract_strided_slice %88 {offsets = [0, 0], sizes = [128, 64], strides = [1, 1]} : vector<128x384xf32> to vector<128x64xf32>
    %90 = arith.addf %70, %89 : vector<128x64xf32>
    %91 = arith.truncf %88 : vector<128x384xf32> to vector<128x384xbf16>
    %c0_67 = arith.constant 0 : index
    %c0_68 = arith.constant 0 : index
    %92 = vector.load %arg21[%c0_67, %c0_68] : memref<128x768xbf16, #tpu.memory_space<vmem>>, vector<128x384xbf16>
    tpu.vector_store %arg21[%c0_67, %c0_68], %91 {strides = array<i32>} : memref<128x768xbf16, #tpu.memory_space<vmem>>, vector<128x384xbf16>,
    %93 = vector.extract_strided_slice %88 {offsets = [0, 128], sizes = [128, 168], strides = [1, 1]} : vector<128x384xf32> to vector<128x168xf32>
    %cst_69 = arith.constant dense<0xFF800000> : vector<128xf32>
    %94 = vector.multi_reduction <maximumf>, %93, %cst_69 [1] : vector<128x168xf32> to vector<128xf32>
    %95 = vector.shape_cast %94 : vector<128xf32> to vector<128x1xf32>
    %cst_70 = arith.constant dense<0xFF800000> : vector<1xf32>
    %96 = vector.multi_reduction <maximumf>, %95, %cst_70 [0] : vector<128x1xf32> to vector<1xf32>
    %97 = vector.shape_cast %96 : vector<1xf32> to vector<1x1xf32>
    %98 = vector.broadcast %97 : vector<1x1xf32> to vector<128x168xf32>
    %99 = arith.subf %93, %98 : vector<128x168xf32>
    %100 = math.exp %99 : vector<128x168xf32>
    %101 = vector.extract_strided_slice %100 {offsets = [0, 0], sizes = [64, 168], strides = [1, 1]} : vector<128x168xf32> to vector<64x168xf32>
    %c0_71 = arith.constant 0 : index
    %c0_72 = arith.constant 0 : index
    %102 = vector.load %arg17[%c0_71, %c0_72] : memref<8x64xf32, #tpu.memory_space<vmem>>, vector<8x64xf32>
    %cst_73 = arith.constant dense<0.000000e+00> : vector<8x168xf32>
    %103 = tpu.matmul %102, %101, %cst_73 {dimension_numbers = #tpu.dot_dimension_numbers<[1], [0], [0], [1], [0, 0, 1, 1], [], []>} : vector<8x64xf32>, vector<64x168xf32>, vector<8x168xf32> -> vector<8x168xf32>
    %c0_74 = arith.constant 0 : index
    %c0_75 = arith.constant 0 : index
    %104 = vector.load %arg18[%c0_74, %c0_75] : memref<168x256xf32, #tpu.memory_space<vmem>>, vector<168x256xf32>
    %cst_76 = arith.constant dense<0.000000e+00> : vector<8x256xf32>
    %105 = tpu.matmul %103, %104, %cst_76 {dimension_numbers = #tpu.dot_dimension_numbers<[1], [0], [0], [1], [0, 0, 1, 1], [], []>} : vector<8x168xf32>, vector<168x256xf32>, vector<8x256xf32> -> vector<8x256xf32>
    %c0_77 = arith.constant 0 : index
    %c0_78 = arith.constant 0 : index
    %c0_79 = arith.constant 0 : index
    %106 = vector.load %arg22[%c0_77, %c0_78, %c0_79] : memref<2x16x256xf32, #tpu.memory_space<vmem>>, vector<1x8x256xf32>
    %107 = vector.shape_cast %106 : vector<1x8x256xf32> to vector<8x256xf32>
    %108 = vector.shape_cast %105 : vector<8x256xf32> to vector<1x8x256xf32>
    tpu.vector_store %arg22[%c0_77, %c0_78, %c0_79], %108 {strides = array<i32>} : memref<2x16x256xf32, #tpu.memory_space<vmem>>, vector<1x8x256xf32>,
    %109 = vector.extract_strided_slice %100 {offsets = [64, 0], sizes = [64, 168], strides = [1, 1]} : vector<128x168xf32> to vector<64x168xf32>
    %c0_80 = arith.constant 0 : index
    %c0_81 = arith.constant 0 : index
    %110 = vector.load %arg17[%c0_80, %c0_81] : memref<8x64xf32, #tpu.memory_space<vmem>>, vector<8x64xf32>
    %cst_82 = arith.constant dense<0.000000e+00> : vector<8x168xf32>
    %111 = tpu.matmul %110, %109, %cst_82 {dimension_numbers = #tpu.dot_dimension_numbers<[1], [0], [0], [1], [0, 0, 1, 1], [], []>} : vector<8x64xf32>, vector<64x168xf32>, vector<8x168xf32> -> vector<8x168xf32>
    %c0_83 = arith.constant 0 : index
    %c0_84 = arith.constant 0 : index
    %112 = vector.load %arg18[%c0_83, %c0_84] : memref<168x256xf32, #tpu.memory_space<vmem>>, vector<168x256xf32>
    %cst_85 = arith.constant dense<0.000000e+00> : vector<8x256xf32>
    %113 = tpu.matmul %111, %112, %cst_85 {dimension_numbers = #tpu.dot_dimension_numbers<[1], [0], [0], [1], [0, 0, 1, 1], [], []>} : vector<8x168xf32>, vector<168x256xf32>, vector<8x256xf32> -> vector<8x256xf32>
    %c1_86 = arith.constant 1 : index
    %c0_87 = arith.constant 0 : index
    %c0_88 = arith.constant 0 : index
    %114 = vector.load %arg22[%c1_86, %c0_87, %c0_88] : memref<2x16x256xf32, #tpu.memory_space<vmem>>, vector<1x8x256xf32>
    %115 = vector.shape_cast %114 : vector<1x8x256xf32> to vector<8x256xf32>
    %116 = vector.shape_cast %113 : vector<8x256xf32> to vector<1x8x256xf32>
    tpu.vector_store %arg22[%c1_86, %c0_87, %c0_88], %116 {strides = array<i32>} : memref<2x16x256xf32, #tpu.memory_space<vmem>>, vector<1x8x256xf32>,
    %c1_89 = arith.constant 1 : index
    %c0_90 = arith.constant 0 : index
    %c0_91 = arith.constant 0 : index
    %117 = vector.load %arg13[%c1_89, %c0_90, %c0_91] : memref<2x64x64xbf16, #tpu.memory_space<vmem>>, vector<1x64x64xbf16>
    %118 = vector.shape_cast %117 : vector<1x64x64xbf16> to vector<64x64xbf16>
    %119 = arith.truncf %90 : vector<128x64xf32> to vector<128x64xbf16>
    %cst_92 = arith.constant dense<0.000000e+00> : vector<128x64xf32>
    %120 = tpu.matmul %119, %118, %cst_92 {dimension_numbers = #tpu.dot_dimension_numbers<[1], [0], [0], [1], [0, 0, 1, 1], [], []>} : vector<128x64xbf16>, vector<64x64xbf16>, vector<128x64xf32> -> vector<128x64xf32>
    %c1_93 = arith.constant 1 : index
    %c0_94 = arith.constant 0 : index
    %c0_95 = arith.constant 0 : index
    %121 = vector.load %arg14[%c1_93, %c0_94, %c0_95] : memref<2x1x64xf32, #tpu.memory_space<vmem>>, vector<1x1x64xf32>
    %122 = vector.shape_cast %121 : vector<1x1x64xf32> to vector<1x64xf32>
    %123 = vector.broadcast %122 : vector<1x64xf32> to vector<128x64xf32>
    %124 = arith.addf %120, %123 : vector<128x64xf32>
    %cst_96 = arith.constant 0.000000e+00 : f32
    %125 = vector.broadcast %cst_96 : f32 to vector<128x64xf32>
    %126 = arith.maximumf %124, %125 : vector<128x64xf32>
    %c1_97 = arith.constant 1 : index
    %c0_98 = arith.constant 0 : index
    %c0_99 = arith.constant 0 : index
    %127 = vector.load %arg15[%c1_97, %c0_98, %c0_99] : memref<2x64x384xbf16, #tpu.memory_space<vmem>>, vector<1x64x384xbf16>
    %128 = vector.shape_cast %127 : vector<1x64x384xbf16> to vector<64x384xbf16>
    %129 = arith.truncf %126 : vector<128x64xf32> to vector<128x64xbf16>
    %cst_100 = arith.constant dense<0.000000e+00> : vector<128x384xf32>
    %130 = tpu.matmul %129, %128, %cst_100 {dimension_numbers = #tpu.dot_dimension_numbers<[1], [0], [0], [1], [0, 0, 1, 1], [], []>} : vector<128x64xbf16>, vector<64x384xbf16>, vector<128x384xf32> -> vector<128x384xf32>
    %c1_101 = arith.constant 1 : index
    %c0_102 = arith.constant 0 : index
    %c0_103 = arith.constant 0 : index
    %131 = vector.load %arg16[%c1_101, %c0_102, %c0_103] : memref<2x1x384xf32, #tpu.memory_space<vmem>>, vector<1x1x384xf32>
    %132 = vector.shape_cast %131 : vector<1x1x384xf32> to vector<1x384xf32>
    %133 = vector.broadcast %132 : vector<1x384xf32> to vector<128x384xf32>
    %134 = arith.addf %130, %133 : vector<128x384xf32>
    %135 = vector.extract_strided_slice %134 {offsets = [0, 0], sizes = [128, 64], strides = [1, 1]} : vector<128x384xf32> to vector<128x64xf32>
    %136 = arith.addf %90, %135 : vector<128x64xf32>
    %137 = arith.truncf %134 : vector<128x384xf32> to vector<128x384xbf16>
    %c0_104 = arith.constant 0 : index
    %c384 = arith.constant 384 : index
    %138 = vector.load %arg21[%c0_104, %c384] : memref<128x768xbf16, #tpu.memory_space<vmem>>, vector<128x384xbf16>
    tpu.vector_store %arg21[%c0_104, %c384], %137 {strides = array<i32>} : memref<128x768xbf16, #tpu.memory_space<vmem>>, vector<128x384xbf16>,
    %139 = vector.extract_strided_slice %134 {offsets = [0, 128], sizes = [128, 168], strides = [1, 1]} : vector<128x384xf32> to vector<128x168xf32>
    %cst_105 = arith.constant dense<0xFF800000> : vector<128xf32>
    %140 = vector.multi_reduction <maximumf>, %139, %cst_105 [1] : vector<128x168xf32> to vector<128xf32>
    %141 = vector.shape_cast %140 : vector<128xf32> to vector<128x1xf32>
    %cst_106 = arith.constant dense<0xFF800000> : vector<1xf32>
    %142 = vector.multi_reduction <maximumf>, %141, %cst_106 [0] : vector<128x1xf32> to vector<1xf32>
    %143 = vector.shape_cast %142 : vector<1xf32> to vector<1x1xf32>
    %144 = vector.broadcast %143 : vector<1x1xf32> to vector<128x168xf32>
    %145 = arith.subf %139, %144 : vector<128x168xf32>
    %146 = math.exp %145 : vector<128x168xf32>
    %147 = vector.extract_strided_slice %146 {offsets = [0, 0], sizes = [64, 168], strides = [1, 1]} : vector<128x168xf32> to vector<64x168xf32>
    %c0_107 = arith.constant 0 : index
    %c0_108 = arith.constant 0 : index
    %148 = vector.load %arg17[%c0_107, %c0_108] : memref<8x64xf32, #tpu.memory_space<vmem>>, vector<8x64xf32>
    %cst_109 = arith.constant dense<0.000000e+00> : vector<8x168xf32>
    %149 = tpu.matmul %148, %147, %cst_109 {dimension_numbers = #tpu.dot_dimension_numbers<[1], [0], [0], [1], [0, 0, 1, 1], [], []>} : vector<8x64xf32>, vector<64x168xf32>, vector<8x168xf32> -> vector<8x168xf32>
    %c0_110 = arith.constant 0 : index
    %c0_111 = arith.constant 0 : index
    %150 = vector.load %arg18[%c0_110, %c0_111] : memref<168x256xf32, #tpu.memory_space<vmem>>, vector<168x256xf32>
    %cst_112 = arith.constant dense<0.000000e+00> : vector<8x256xf32>
    %151 = tpu.matmul %149, %150, %cst_112 {dimension_numbers = #tpu.dot_dimension_numbers<[1], [0], [0], [1], [0, 0, 1, 1], [], []>} : vector<8x168xf32>, vector<168x256xf32>, vector<8x256xf32> -> vector<8x256xf32>
    %c0_113 = arith.constant 0 : index
    %c8 = arith.constant 8 : index
    %c0_114 = arith.constant 0 : index
    %152 = vector.load %arg22[%c0_113, %c8, %c0_114] : memref<2x16x256xf32, #tpu.memory_space<vmem>>, vector<1x8x256xf32>
    %153 = vector.shape_cast %152 : vector<1x8x256xf32> to vector<8x256xf32>
    %154 = vector.shape_cast %151 : vector<8x256xf32> to vector<1x8x256xf32>
    tpu.vector_store %arg22[%c0_113, %c8, %c0_114], %154 {strides = array<i32>} : memref<2x16x256xf32, #tpu.memory_space<vmem>>, vector<1x8x256xf32>,
    %155 = vector.extract_strided_slice %146 {offsets = [64, 0], sizes = [64, 168], strides = [1, 1]} : vector<128x168xf32> to vector<64x168xf32>
    %c0_115 = arith.constant 0 : index
    %c0_116 = arith.constant 0 : index
    %156 = vector.load %arg17[%c0_115, %c0_116] : memref<8x64xf32, #tpu.memory_space<vmem>>, vector<8x64xf32>
    %cst_117 = arith.constant dense<0.000000e+00> : vector<8x168xf32>
    %157 = tpu.matmul %156, %155, %cst_117 {dimension_numbers = #tpu.dot_dimension_numbers<[1], [0], [0], [1], [0, 0, 1, 1], [], []>} : vector<8x64xf32>, vector<64x168xf32>, vector<8x168xf32> -> vector<8x168xf32>
    %c0_118 = arith.constant 0 : index
    %c0_119 = arith.constant 0 : index
    %158 = vector.load %arg18[%c0_118, %c0_119] : memref<168x256xf32, #tpu.memory_space<vmem>>, vector<168x256xf32>
    %cst_120 = arith.constant dense<0.000000e+00> : vector<8x256xf32>
    %159 = tpu.matmul %157, %158, %cst_120 {dimension_numbers = #tpu.dot_dimension_numbers<[1], [0], [0], [1], [0, 0, 1, 1], [], []>} : vector<8x168xf32>, vector<168x256xf32>, vector<8x256xf32> -> vector<8x256xf32>
    %c1_121 = arith.constant 1 : index
    %c8_122 = arith.constant 8 : index
    %c0_123 = arith.constant 0 : index
    %160 = vector.load %arg22[%c1_121, %c8_122, %c0_123] : memref<2x16x256xf32, #tpu.memory_space<vmem>>, vector<1x8x256xf32>
    %161 = vector.shape_cast %160 : vector<1x8x256xf32> to vector<8x256xf32>
    %162 = vector.shape_cast %159 : vector<8x256xf32> to vector<1x8x256xf32>
    tpu.vector_store %arg22[%c1_121, %c8_122, %c0_123], %162 {strides = array<i32>} : memref<2x16x256xf32, #tpu.memory_space<vmem>>, vector<1x8x256xf32>,
    %163 = tpu.concatenate %14, %56, %136 in 1 : vector<128x32xf32>, vector<128x32xf32>, vector<128x64xf32> -> vector<128x128xf32>
    %c0_124 = arith.constant 0 : index
    %c0_125 = arith.constant 0 : index
    %164 = vector.load %arg19[%c0_124, %c0_125] : memref<128x128xf32, #tpu.memory_space<vmem>>, vector<128x128xf32>
    tpu.vector_store %arg19[%c0_124, %c0_125], %163 {strides = array<i32>} : memref<128x128xf32, #tpu.memory_space<vmem>>, vector<128x128xf32>,
    return
  }
  func.func @transform_0(%arg0: i32) -> (i32, i32) {
    %c0_i32 = arith.constant 0 : i32
    %c0_i32_0 = arith.constant 0 : i32
    return %arg0, %c0_i32 : i32, i32
  }
  func.func @transform_1(%arg0: i32) -> (i32, i32) {
    %c0_i32 = arith.constant 0 : i32
    %c0_i32_0 = arith.constant 0 : i32
    %c0_i32_1 = arith.constant 0 : i32
    return %c0_i32, %c0_i32_0 : i32, i32
  }
  func.func @transform_2(%arg0: i32) -> (i32, i32) {
    %c0_i32 = arith.constant 0 : i32
    %c0_i32_0 = arith.constant 0 : i32
    %c0_i32_1 = arith.constant 0 : i32
    return %c0_i32, %c0_i32_0 : i32, i32
  }
  func.func @transform_3(%arg0: i32) -> (i32, i32) {
    %c0_i32 = arith.constant 0 : i32
    %c0_i32_0 = arith.constant 0 : i32
    %c0_i32_1 = arith.constant 0 : i32
    return %c0_i32, %c0_i32_0 : i32, i32
  }
  func.func @transform_4(%arg0: i32) -> (i32, i32) {
    %c0_i32 = arith.constant 0 : i32
    %c0_i32_0 = arith.constant 0 : i32
    %c0_i32_1 = arith.constant 0 : i32
    return %c0_i32, %c0_i32_0 : i32, i32
  }
  func.func @transform_5(%arg0: i32) -> (i32, i32, i32) {
    %c0_i32 = arith.constant 0 : i32
    %c0_i32_0 = arith.constant 0 : i32
    %c0_i32_1 = arith.constant 0 : i32
    %c0_i32_2 = arith.constant 0 : i32
    return %c0_i32, %c0_i32_0, %c0_i32_1 : i32, i32, i32
  }
  func.func @transform_6(%arg0: i32) -> (i32, i32, i32) {
    %c0_i32 = arith.constant 0 : i32
    %c0_i32_0 = arith.constant 0 : i32
    %c0_i32_1 = arith.constant 0 : i32
    %c0_i32_2 = arith.constant 0 : i32
    return %c0_i32, %c0_i32_0, %c0_i32_1 : i32, i32, i32
  }
  func.func @transform_7(%arg0: i32) -> (i32, i32, i32) {
    %c0_i32 = arith.constant 0 : i32
    %c0_i32_0 = arith.constant 0 : i32
    %c0_i32_1 = arith.constant 0 : i32
    %c0_i32_2 = arith.constant 0 : i32
    return %c0_i32, %c0_i32_0, %c0_i32_1 : i32, i32, i32
  }
  func.func @transform_8(%arg0: i32) -> (i32, i32, i32) {
    %c0_i32 = arith.constant 0 : i32
    %c0_i32_0 = arith.constant 0 : i32
    %c0_i32_1 = arith.constant 0 : i32
    %c0_i32_2 = arith.constant 0 : i32
    return %c0_i32, %c0_i32_0, %c0_i32_1 : i32, i32, i32
  }
  func.func @transform_9(%arg0: i32) -> (i32, i32) {
    %c0_i32 = arith.constant 0 : i32
    %c0_i32_0 = arith.constant 0 : i32
    %c0_i32_1 = arith.constant 0 : i32
    return %c0_i32, %c0_i32_0 : i32, i32
  }
  func.func @transform_10(%arg0: i32) -> (i32, i32) {
    %c0_i32 = arith.constant 0 : i32
    %c0_i32_0 = arith.constant 0 : i32
    %c0_i32_1 = arith.constant 0 : i32
    return %c0_i32, %c0_i32_0 : i32, i32
  }
  func.func @transform_11(%arg0: i32) -> (i32, i32) {
    %c0_i32 = arith.constant 0 : i32
    %c0_i32_0 = arith.constant 0 : i32
    %c0_i32_1 = arith.constant 0 : i32
    return %c0_i32, %c0_i32_0 : i32, i32
  }
  func.func @transform_12(%arg0: i32) -> (i32, i32, i32) {
    %c0_i32 = arith.constant 0 : i32
    %c0_i32_0 = arith.constant 0 : i32
    %c0_i32_1 = arith.constant 0 : i32
    %c0_i32_2 = arith.constant 0 : i32
    return %c0_i32, %c0_i32_0, %c0_i32_1 : i32, i32, i32
  }
  func.func @transform_13(%arg0: i32) -> (i32, i32, i32) {
    %c0_i32 = arith.constant 0 : i32
    %c0_i32_0 = arith.constant 0 : i32
    %c0_i32_1 = arith.constant 0 : i32
    %c0_i32_2 = arith.constant 0 : i32
    return %c0_i32, %c0_i32_0, %c0_i32_1 : i32, i32, i32
  }
  func.func @transform_14(%arg0: i32) -> (i32, i32, i32) {
    %c0_i32 = arith.constant 0 : i32
    %c0_i32_0 = arith.constant 0 : i32
    %c0_i32_1 = arith.constant 0 : i32
    %c0_i32_2 = arith.constant 0 : i32
    return %c0_i32, %c0_i32_0, %c0_i32_1 : i32, i32, i32
  }
  func.func @transform_15(%arg0: i32) -> (i32, i32, i32) {
    %c0_i32 = arith.constant 0 : i32
    %c0_i32_0 = arith.constant 0 : i32
    %c0_i32_1 = arith.constant 0 : i32
    %c0_i32_2 = arith.constant 0 : i32
    return %c0_i32, %c0_i32_0, %c0_i32_1 : i32, i32, i32
  }
  func.func @transform_16(%arg0: i32) -> (i32, i32) {
    %c0_i32 = arith.constant 0 : i32
    %c0_i32_0 = arith.constant 0 : i32
    %c0_i32_1 = arith.constant 0 : i32
    return %c0_i32, %c0_i32_0 : i32, i32
  }
  func.func @transform_17(%arg0: i32) -> (i32, i32) {
    %c0_i32 = arith.constant 0 : i32
    %c0_i32_0 = arith.constant 0 : i32
    %c0_i32_1 = arith.constant 0 : i32
    return %c0_i32, %c0_i32_0 : i32, i32
  }
  func.func @transform_18(%arg0: i32) -> (i32, i32) {
    %c0_i32 = arith.constant 0 : i32
    %c0_i32_0 = arith.constant 0 : i32
    return %arg0, %c0_i32 : i32, i32
  }
  func.func @transform_19(%arg0: i32) -> (i32, i32) {
    %c0_i32 = arith.constant 0 : i32
    %c0_i32_0 = arith.constant 0 : i32
    return %arg0, %c0_i32 : i32, i32
  }
  func.func @transform_20(%arg0: i32) -> (i32, i32) {
    %c0_i32 = arith.constant 0 : i32
    %c0_i32_0 = arith.constant 0 : i32
    return %arg0, %c0_i32 : i32, i32
  }
  func.func @transform_21(%arg0: i32) -> (i32, i32, i32) {
    %c0_i32 = arith.constant 0 : i32
    %c0_i32_0 = arith.constant 0 : i32
    %c0_i32_1 = arith.constant 0 : i32
    return %arg0, %c0_i32, %c0_i32_0 : i32, i32, i32
  }
}

</mosaic_0001>

<bundles_post_ra>
// kernel: a_call__.1
= control target key start
LH: loop header
LB: loop body
LE: loop exit
PB: predicated region body
PF: predicated region fallthrough
CT: control target
= control target key end

     0   :  { %vm119_vm0 = vcmask 392192   ;;  %vm304_vm1 = vcmask 523264   ;;  %vm457_vm2 = vcmask 261120   ;;  %vm2371_vm3 = vcmask 326656   ;;  %s5484_s29 = smov 32   ;;  %s8192_s1 = inlined_call_operand.vmem [shape: bf16[48,64], index: 1, kind: input, shape index: {}]   ;;  %s8193_s0 = inlined_call_operand.vmem [shape: f32[128,48], index: 0, kind: input, shape index: {}]   ;;  %s8194_s3 = inlined_call_operand.vmem [shape: bf16[64,32], index: 3, kind: input, shape index: {}]   ;;  %s8195_s2 = inlined_call_operand.vmem [shape: f32[1,64], index: 2, kind: input, shape index: {}]   ;;  %s8196_s5 = inlined_call_operand.vmem [shape: bf16[2,32,64], index: 5, kind: input, shape index: {}]   ;;  %s8197_s7 = inlined_call_operand.vmem [shape: bf16[2,64,128], index: 7, kind: input, shape index: {}]   ;;  %s8198_s4 = inlined_call_operand.vmem [shape: f32[1,32], index: 4, kind: input, shape index: {}]   ;;  %s8199_s6 = inlined_call_operand.vmem [shape: f32[2,1,64], index: 6, kind: input, shape index: {}]   ;;  %s8200_s8 = inlined_call_operand.vmem [shape: f32[2,1,128], index: 8, kind: input, shape index: {}]   ;;  %s8201_s19 = inlined_call_operand.vmem [shape: bf16[128,256], index: 19, kind: output, shape index: {1}]   ;;  %s8202_s9 = inlined_call_operand.vmem [shape: bf16[128,64], index: 9, kind: input, shape index: {}]   ;;  %s8203_s10 = inlined_call_operand.vmem [shape: bf16[32,64], index: 10, kind: input, shape index: {}]   ;;  %s8204_s12 = inlined_call_operand.vmem [shape: bf16[2,64,64], index: 12, kind: input, shape index: {}]   ;;  %s8205_s14 = inlined_call_operand.vmem [shape: bf16[2,64,384], index: 14, kind: input, shape index: {}]   ;;  %s8206_s11 = inlined_call_operand.vmem [shape: f32[1,64], index: 11, kind: input, shape index: {}]   ;;  %s8207_s13 = inlined_call_operand.vmem [shape: f32[2,1,64], index: 13, kind: input, shape index: {}]   ;;  %s8208_s15 = inlined_call_operand.vmem [shape: f32[2,1,384], index: 15, kind: input, shape index: {}]   ;;  %s8209_s20 = inlined_call_operand.vmem [shape: bf16[128,768], index: 20, kind: output, shape index: {2}]   ;;  %s8210_s17 = inlined_call_operand.vmem [shape: f32[168,256], index: 17, kind: input, shape index: {}]   ;;  %s8211_s16 = inlined_call_operand.vmem [shape: f32[8,64], index: 16, kind: input, shape index: {}]   ;;  %s8212_s21 = inlined_call_operand.vmem [shape: f32[2,16,256], index: 21, kind: output, shape index: {3}]   ;;  %s8213_s18 = inlined_call_operand.vmem [shape: f32[128,128], index: 18, kind: output, shape index: {0}]  }
   0x1   :  { %8365 = sst [smem:[#allocation84_spill]] %s8192_s1 }
   0x2   :  { %8366 = sst [smem:[#allocation85_spill]] %s8193_s0 }
   0x3   :  { %8367 = sst [smem:[#allocation86_spill]] %s8194_s3 }
   0x4   :  { %8368 = sst [smem:[#allocation87_spill]] %s8195_s2 }
   0x5   :  { %8369 = sst [smem:[#allocation88_spill]] %s8196_s5 }
   0x6   :  { %8370 = sst [smem:[#allocation89_spill]] %s8197_s7 }
   0x7   :  { %s8371_s26 = sld [smem:[#allocation84_spill]] }
   0x8   :  { %s8372_s1 = sld [smem:[#allocation85_spill]] }
   0x9   :  { %s8374_s30 = sld [smem:[#allocation87_spill]] }
   0xa   :  { %s8375_s22 = sld [smem:[#allocation88_spill]] }
   0xb   :  { %s8376_s25 = sld [smem:[#allocation89_spill]] }
   0xd   :  { %v5285_v0 = vld [vmem:[%s8371_s26 + $0x10] sm:$0xff]   ;;  %v5286_v1 = vld [vmem:[%s8371_s26 + $0x8] sm:$0xff]   ;;  %v5287_v4 = vld [vmem:[%s8371_s26] sm:$0xff]   ;;  %s8373_s26 = sld [smem:[#allocation86_spill]] }
   0xe   :  { %4993 = vmatprep.subr.bf16.mxu0 %v5285_v0  ;;  %5275 = vmatprep.subr.bf16.mxu1 %v5285_v0  ;;  %v64_v2 = vld [vmem:[%s8372_s1] sm:$0xff]  ;;  %v65_v3 = vld [vmem:[%s8372_s1 + $0x8] sm:$0xff]  ;;  %v66_v6 = vld [vmem:[%s8372_s1 + $0x10] sm:$0xff] }
   0xf   :  { %4994 = vmatpush3.bf16.msra.mxu0 %v5285_v0  ;;  %5278 = vmatpush3.bf16.msra.mxu1 %v5285_v0  ;;  %v86_v5 = vpack.c.bf16 %v65_v3, %v64_v2  ;;  %v67_v7 = vld [vmem:[%s8372_s1 + $0x18] sm:$0xff]  ;;  %v72_v8 = vld [vmem:[%s8372_s1 + $0x40] sm:$0xff]  ;;  %v69_v10 = vld [vmem:[%s8372_s1 + $0x28] sm:$0xff] }
  0x10   :  { %4995 = vmatprep.subr.bf16.mxu0 %v5286_v1  ;;  %5276 = vmatprep.subr.bf16.mxu1 %v5286_v1  ;;  %v68_v9 = vld [vmem:[%s8372_s1 + $0x20] sm:$0xff]  ;;  %v73_v11 = vld [vmem:[%s8372_s1 + $0x48] sm:$0xff]  ;;  %v74_v13 = vld [vmem:[%s8372_s1 + $0x50] sm:$0xff]  ;;  %v87_v18 = vpack.c.bf16 %v67_v7, %v66_v6 }
  0x11   :  { %4999 = vmatprep.mubr.msk.bf16.mxu0 %vm119_vm0, %v86_v5  ;;  %v90_v12 = vpack.c.bf16 %v73_v11, %v72_v8  ;;  %v75_v14 = vld [vmem:[%s8372_s1 + $0x58] sm:$0xff]  ;;  %v76_v15 = vld [vmem:[%s8372_s1 + $0x60] sm:$0xff]  ;;  %v77_v16 = vld [vmem:[%s8372_s1 + $0x68] sm:$0xff]  ;;  %v88_v20 = vpack.c.bf16 %v69_v10, %v68_v9 }
  0x12   :  { %v91_v19 = vpack.c.bf16 %v75_v14, %v74_v13  ;;  %v92_v21 = vpack.c.bf16 %v77_v16, %v76_v15  ;;  %v70_v22 = vld [vmem:[%s8372_s1 + $0x30] sm:$0xff]  ;;  %v71_v23 = vld [vmem:[%s8372_s1 + $0x38] sm:$0xff]  ;;  %v4434_v35 = vld [vmem:[%s8374_s30] ss:$0 sm:$0xff] }
  0x13   :  { %4996 = vmatpush3.bf16.msra.mxu0 %v5286_v1  ;;  %5279 = vmatpush3.bf16.msra.mxu1 %v5286_v1  ;;  %v5288_v17 = vld [vmem:[%s8373_s26 + $0x18] sm:$0xff]   ;;  %v78_v24 = vld [vmem:[%s8372_s1 + $0x70] sm:$0xff]  ;;  %v89_v26 = vpack.c.bf16 %v71_v23, %v70_v22  ;;  %v5290_v29 = vld [vmem:[%s8373_s26 + $0x8] sm:$0xff]  }
  0x14   :  { %4997 = vmatprep.subr.bf16.mxu0 %v5287_v4  ;;  %5277 = vmatprep.subr.bf16.mxu1 %v5287_v4  ;;  %v79_v25 = vld [vmem:[%s8372_s1 + $0x78] sm:$0xff]  ;;  %v5289_v28 = vld [vmem:[%s8373_s26 + $0x10] sm:$0xff]   ;;  %v5291_v30 = vld [vmem:[%s8373_s26] sm:$0xff]  }
  0x15   :  { %5007 = vmatprep.mubr.msk.bf16.mxu1 %vm119_vm0, %v90_v12  ;;  %v93_v27 = vpack.c.bf16 %v79_v25, %v78_v24  ;;  %v5292_v24 = vld [vmem:[%s8375_s22 + $0x8] sm:$0xff]   ;;  %v5293_v25 = vld [vmem:[%s8375_s22] sm:$0xff]  }
  0x17   :  { %4998 = vmatpush3.bf16.msra.mxu0 %v5287_v4  ;;  %5280 = vmatpush3.bf16.msra.mxu1 %v5287_v4 }
  0x18   :  { %5015 = vmatprep.subr.bf16.mxu1 %v5288_v17  ;;  %5039 = vmatprep.subr.bf16.mxu0 %v5292_v24 }
  0x1a   :  { %5000 = vmatmul.mubr.msk.bf16.vlgmr.msra.gmra.mxu0 %vm119_vm0, %v87_v18  ;;  %5008 = vmatmul.mubr.msk.bf16.vlgmr.msra.gmra.mxu1 %vm119_vm0, %v91_v19 }
  0x1b   :  { %5003 = vmatprep.mubr.msk.bf16.mxu0 %vm119_vm0, %v88_v20  ;;  %5011 = vmatprep.mubr.msk.bf16.mxu1 %vm119_vm0, %v92_v21 }
  0x1c   :  { %5016 = vmatpush3.bf16.msra.mxu1 %v5288_v17  ;;  %5040 = vmatpush3.bf16.msra.mxu0 %v5292_v24 }
  0x1d   :  { %5017 = vmatprep.subr.bf16.mxu1 %v5289_v28  ;;  %5041 = vmatprep.subr.bf16.mxu0 %v5293_v25 }
  0x20   :  { %5018 = vmatpush3.bf16.msra.mxu1 %v5289_v28  ;;  %5042 = vmatpush3.bf16.msra.mxu0 %v5293_v25 }
  0x21   :  { %5019 = vmatprep.subr.bf16.mxu1 %v5290_v29 }
  0x22   :  { %5004 = vmatmul.mubr.msk.bf16.gmra.mxu0 %vm119_vm0, %v89_v26  ;;  %5012 = vmatmul.mubr.msk.bf16.gmra.mxu1 %vm119_vm0, %v93_v27  ;;  %v5294_v26 = vld [vmem:[%s8376_s25 + $0x18] sm:$0xff]  }
  0x24   :  { %5020 = vmatpush3.bf16.msra.mxu1 %v5290_v29 }
  0x25   :  { %5021 = vmatprep.subr.bf16.mxu1 %v5291_v30 }
  0x28   :  { %5022 = vmatpush3.bf16.msra.mxu1 %v5291_v30  ;;  %v4446_v30 = vld [vmem:[%s8198_s4] ss:$0 sm:$0xff] }
  0x29   :  { %5059 = vmatprep.subr.bf16.mxu1 %v5294_v26 }
  0xda   :  { %v5001_v31 = vpop.f32.mrf.mxu0  ;;  %v5009_v32 = vpop.f32.mrf.mxu1 }
  0xdb   :  { %v187_v40 = vadd.f32 %v5001_v31, %v4434_v35  ;;  %v219_v7 = vadd.f32 %v5009_v32, %v4434_v35 }
  0xdc   :  { %v178_v33 = vpop.f32.mrf.mxu0  ;;  %v210_v34 = vpop.f32.mrf.mxu1 }
  0xdd   :  { %v179_v38 = vadd.f32 %v4434_v35, %v178_v33  ;;  %v243_v49 = vmax.f32 %v187_v40, 0.0  ;;  %v211_v52 = vadd.f32 %v4434_v35, %v210_v34  ;;  %v251_v13 = vmax.f32 %v219_v7, 0.0  ;;  %v5298_v7 = vld [vmem:[%s8375_s22 + $0x18] sm:$0xff]  }
  0xde   :  { %v5002_v36 = vpop.f32.mrf.mxu0  ;;  %v5010_v37 = vpop.f32.mrf.mxu1  ;;  %5083 = vmatprep.subr.bf16.mxu0 %v5298_v7 }
  0xdf   :  { %v190_v39 = vadd.f32 %v5002_v36, %v4434_v35  ;;  %v241_v47 = vmax.f32 %v179_v38, 0.0  ;;  %v249_v63 = vmax.f32 %v211_v52, 0.0  ;;  %v222_v8 = vadd.f32 %v5010_v37, %v4434_v35 }
  0xe0   :  { %v181_v41 = vpop.f32.mrf.mxu0  ;;  %v213_v42 = vpop.f32.mrf.mxu1 }
  0xe1   :  { %v182_v43 = vadd.f32 %v4434_v35, %v181_v41  ;;  %v244_v44 = vmax.f32 %v190_v39, 0.0  ;;  %v214_v56 = vadd.f32 %v4434_v35, %v213_v42  ;;  %v252_v14 = vmax.f32 %v222_v8, 0.0 }
  0xe2   :  { %v5005_v45 = vpop.f32.mrf.mxu0  ;;  %v5013_v46 = vpop.f32.mrf.mxu1 }
  0xe3   :  { %v242_v48 = vmax.f32 %v182_v43, 0.0  ;;  %v203_v50 = vadd.f32 %v5005_v45, %v4434_v35  ;;  %v266_v57 = vpack.c.bf16 %v244_v44, %v243_v49  ;;  %v250_v3 = vmax.f32 %v214_v56, 0.0 }
  0xe4   :  { %v194_v51 = vpop.f32.mrf.mxu0  ;;  %v226_v53 = vpop.f32.mrf.mxu1  ;;  %v270_v17 = vpack.c.bf16 %v252_v14, %v251_v13  ;;  %v235_v18 = vadd.f32 %v5013_v46, %v4434_v35 }
  0xe5   :  { %v265_v54 = vpack.c.bf16 %v242_v48, %v241_v47  ;;  %v195_v55 = vadd.f32 %v4434_v35, %v194_v51  ;;  %v247_v61 = vmax.f32 %v203_v50, 0.0  ;;  %v269_v10 = vpack.c.bf16 %v250_v3, %v249_v63 }
  0xe6   :  { %v5006_v58 = vpop.f32.mrf.mxu0  ;;  %v5014_v59 = vpop.f32.mrf.mxu1  ;;  %v227_v11 = vadd.f32 %v4434_v35, %v226_v53  ;;  %v255_v21 = vmax.f32 %v235_v18, 0.0 }
  0xe7   :  { %v206_v60 = vadd.f32 %v5006_v58, %v4434_v35  ;;  %5023 = vmatprep.mubr.msk.bf16.mxu1 %vm304_vm1, %v265_v54  ;;  %v245_v0 = vmax.f32 %v195_v55, 0.0  ;;  %v238_v19 = vadd.f32 %v5014_v59, %v4434_v35 }
  0xe8   :  { %v197_v62 = vpop.f32.mrf.mxu0  ;;  %5024 = vmatmul.mubr.msk.bf16.vlgmr.msra.gmra.mxu1 %vm304_vm1, %v266_v57  ;;  %v229_v4 = vpop.f32.mrf.mxu1  ;;  %v253_v15 = vmax.f32 %v227_v11, 0.0 }
  0xe9   :  { %v248_v1 = vmax.f32 %v206_v60, 0.0  ;;  %v198_v2 = vadd.f32 %v4434_v35, %v197_v62  ;;  %v230_v12 = vadd.f32 %v4434_v35, %v229_v4  ;;  %v256_v22 = vmax.f32 %v238_v19, 0.0  ;;  %5060 = vmatpush3.bf16.msra.mxu1 %v5294_v26  ;;  %v5295_v4 = vld [vmem:[%s8376_s25 + $0x10] sm:$0xff]  }
  0xea   :  { %5061 = vmatprep.subr.bf16.mxu1 %v5295_v4 }
  0xeb   :  { %v246_v5 = vmax.f32 %v198_v2, 0.0  ;;  %v268_v6 = vpack.c.bf16 %v248_v1, %v247_v61  ;;  %v254_v16 = vmax.f32 %v230_v12, 0.0  ;;  %v272_v23 = vpack.c.bf16 %v256_v22, %v255_v21 }
  0xed   :  { %v267_v9 = vpack.c.bf16 %v246_v5, %v245_v0  ;;  %v271_v20 = vpack.c.bf16 %v254_v16, %v253_v15  ;;  %5062 = vmatpush3.bf16.msra.mxu1 %v5295_v4  ;;  %v5296_v5 = vld [vmem:[%s8376_s25 + $0x8] sm:$0xff]  }
  0xee   :  { %5063 = vmatprep.subr.bf16.mxu1 %v5296_v5 }
  0xef   :  { %5027 = vmatprep.mubr.msk.bf16.mxu1 %vm304_vm1, %v267_v9 }
  0xf0   :  { %5028 = vmatmul.mubr.msk.bf16.gmra.mxu1 %vm304_vm1, %v268_v6  ;;  %v5297_v6 = vld [vmem:[%s8376_s25] sm:$0xff]  }
  0xf1   :  { %5031 = vmatprep.mubr.msk.bf16.mxu1 %vm304_vm1, %v269_v10  ;;  %5064 = vmatpush3.bf16.msra.mxu1 %v5296_v5  ;;  %v4459_v10 = vld [vmem:[%s8199_s6] ss:$0 sm:$0xff] }
  0xf2   :  { %5065 = vmatprep.subr.bf16.mxu1 %v5297_v6 }
  0xf5   :  { %5066 = vmatpush3.bf16.msra.mxu1 %v5297_v6 }
  0xf8   :  { %5032 = vmatmul.mubr.msk.bf16.gmra.mxu1 %vm304_vm1, %v270_v17 }
  0xf9   :  { %5035 = vmatprep.mubr.msk.bf16.mxu1 %vm304_vm1, %v271_v20 }
 0x100   :  { %5036 = vmatmul.mubr.msk.bf16.gmra.mxu1 %vm304_vm1, %v272_v23 }
 0x1a8   :  { %v5025_v27 = vpop.f32.mrf.mxu1 }
 0x1a9   :  { %v5702_v35 = vadd.f32 %v5025_v27, %v4446_v30 }
 0x1aa   :  { %v363_v28 = vpop.f32.mrf.mxu1 }
 0x1ab   :  { %v5698_v33 = vadd.f32 %v4446_v30, %v363_v28  ;;  %8380 = vst [vmem:[#allocation5_spill] sm:$0xff] %v5702_v35 }
 0x1ac   :  { %v5026_v29 = vpop.f32.mrf.mxu1 }
 0x1ad   :  { %v5696_v31 = vadd.f32 %v5026_v29, %v4446_v30  ;;  %8378 = vst [vmem:[#allocation3_spill] sm:$0xff] %v5698_v33 }
 0x1ae   :  { %v366_v32 = vpop.f32.mrf.mxu1 }
 0x1af   :  { %8377 = vst [vmem:[#allocation2_spill] sm:$0xff] %v5696_v31  ;;  %v5700_v34 = vadd.f32 %v4446_v30, %v366_v32  ;;  %v431_v38 = vpack.c.bf16 %v5696_v31, %v5702_v35 }
 0x1b0   :  { %v5029_v36 = vpop.f32.mrf.mxu1 }
 0x1b1   :  { %8379 = vst [vmem:[#allocation4_spill] sm:$0xff] %v5700_v34  ;;  %v430_v37 = vpack.c.bf16 %v5700_v34, %v5698_v33  ;;  %v5716_v45 = vadd.f32 %v5029_v36, %v4446_v30 }
 0x1b2   :  { %v379_v39 = vpop.f32.mrf.mxu1 }
 0x1b3   :  { %5043 = vmatprep.mubr.msk.bf16.mxu0 %vm457_vm2, %v430_v37  ;;  %v5712_v43 = vadd.f32 %v4446_v30, %v379_v39  ;;  %8384 = vst [vmem:[#allocation9_spill] sm:$0xff] %v5716_v45 }
 0x1b4   :  { %v5030_v40 = vpop.f32.mrf.mxu1  ;;  %5044 = vmatmul.mubr.msk.bf16.vlgmr.msra.gmra.mxu0 %vm457_vm2, %v431_v38 }
 0x1b5   :  { %v5710_v41 = vadd.f32 %v5030_v40, %v4446_v30  ;;  %8382 = vst [vmem:[#allocation7_spill] sm:$0xff] %v5712_v43  ;;  %5084 = vmatpush3.bf16.msra.mxu0 %v5298_v7 }
 0x1b6   :  { %v382_v42 = vpop.f32.mrf.mxu1 }
 0x1b7   :  { %8381 = vst [vmem:[#allocation6_spill] sm:$0xff] %v5710_v41  ;;  %v5714_v44 = vadd.f32 %v4446_v30, %v382_v42  ;;  %v433_v48 = vpack.c.bf16 %v5710_v41, %v5716_v45 }
 0x1b8   :  { %v5033_v46 = vpop.f32.mrf.mxu1 }
 0x1b9   :  { %8383 = vst [vmem:[#allocation8_spill] sm:$0xff] %v5714_v44  ;;  %v432_v47 = vpack.c.bf16 %v5714_v44, %v5712_v43  ;;  %v5723_v50 = vadd.f32 %v5033_v46, %v4446_v30 }
 0x1ba   :  { %v395_v49 = vpop.f32.mrf.mxu1 }
 0x1bb   :  { %5047 = vmatprep.mubr.msk.bf16.mxu0 %vm457_vm2, %v432_v47  ;;  %8385 = vst [vmem:[#allocation10_spill] sm:$0xff] %v5723_v50  ;;  %v5726_v52 = vadd.f32 %v4446_v30, %v395_v49 }
 0x1bc   :  { %v5034_v51 = vpop.f32.mrf.mxu1  ;;  %5048 = vmatmul.mubr.msk.bf16.gmra.mxu0 %vm457_vm2, %v433_v48 }
 0x1bd   :  { %8386 = vst [vmem:[#allocation11_spill] sm:$0xff] %v5726_v52  ;;  %v5728_v53 = vadd.f32 %v5034_v51, %v4446_v30 }
 0x1be   :  { %v398_v54 = vpop.f32.mrf.mxu1 }
 0x1bf   :  { %8387 = vst [vmem:[#allocation12_spill] sm:$0xff] %v5728_v53  ;;  %v5730_v55 = vadd.f32 %v4446_v30, %v398_v54  ;;  %v435_v56 = vpack.c.bf16 %v5728_v53, %v5723_v50 }
 0x1c0   :  { %v5037_v57 = vpop.f32.mrf.mxu1 }
 0x1c1   :  { %8388 = vst [vmem:[#allocation13_spill] sm:$0xff] %v5730_v55  ;;  %v434_v58 = vpack.c.bf16 %v5730_v55, %v5726_v52  ;;  %v5737_v60 = vadd.f32 %v5037_v57, %v4446_v30 }
 0x1c2   :  { %v411_v59 = vpop.f32.mrf.mxu1 }
 0x1c3   :  { %5051 = vmatprep.mubr.msk.bf16.mxu0 %vm457_vm2, %v434_v58  ;;  %8389 = vst [vmem:[#allocation14_spill] sm:$0xff] %v5737_v60  ;;  %v5740_v62 = vadd.f32 %v4446_v30, %v411_v59 }
 0x1c4   :  { %v5038_v61 = vpop.f32.mrf.mxu1  ;;  %5052 = vmatmul.mubr.msk.bf16.gmra.mxu0 %vm457_vm2, %v435_v56 }
 0x1c5   :  { %8390 = vst [vmem:[#allocation15_spill] sm:$0xff] %v5740_v62  ;;  %v5742_v63 = vadd.f32 %v5038_v61, %v4446_v30 }
 0x1c6   :  { %v414_v0 = vpop.f32.mrf.mxu1 }
 0x1c7   :  { %8391 = vst [vmem:[#allocation16_spill] sm:$0xff] %v5742_v63  ;;  %v5744_v1 = vadd.f32 %v4446_v30, %v414_v0  ;;  %v437_v2 = vpack.c.bf16 %v5742_v63, %v5737_v60 }
 0x1c9   :  { %8392 = vst [vmem:[#allocation17_spill] sm:$0xff] %v5744_v1  ;;  %v436_v3 = vpack.c.bf16 %v5744_v1, %v5740_v62 }
 0x1cb   :  { %5055 = vmatprep.mubr.msk.bf16.mxu0 %vm457_vm2, %v436_v3 }
 0x1cc   :  { %5056 = vmatmul.mubr.msk.bf16.gmra.mxu0 %vm457_vm2, %v437_v2 }
 0x274   :  { %v5045_v8 = vpop.f32.mrf.mxu0 }
 0x275   :  { %v525_v14 = vadd.f32 %v5045_v8, %v4459_v10 }
 0x276   :  { %v516_v9 = vpop.f32.mrf.mxu0 }
 0x277   :  { %v517_v12 = vadd.f32 %v4459_v10, %v516_v9  ;;  %v581_v21 = vmax.f32 %v525_v14, 0.0 }
 0x278   :  { %v5046_v11 = vpop.f32.mrf.mxu0 }
 0x279   :  { %v528_v13 = vadd.f32 %v5046_v11, %v4459_v10  ;;  %v579_v19 = vmax.f32 %v517_v12, 0.0 }
 0x27a   :  { %v519_v15 = vpop.f32.mrf.mxu0 }
 0x27b   :  { %v520_v16 = vadd.f32 %v4459_v10, %v519_v15  ;;  %v582_v17 = vmax.f32 %v528_v13, 0.0 }
 0x27c   :  { %v5049_v18 = vpop.f32.mrf.mxu0 }
 0x27d   :  { %v580_v20 = vmax.f32 %v520_v16, 0.0  ;;  %v604_v24 = vpack.c.bf16 %v582_v17, %v581_v21  ;;  %v541_v28 = vadd.f32 %v5049_v18, %v4459_v10  ;;  %v5299_v18 = vld [vmem:[%s8375_s22 + $0x10] sm:$0xff]  }
 0x27e   :  { %v532_v22 = vpop.f32.mrf.mxu0  ;;  %5085 = vmatprep.subr.bf16.mxu0 %v5299_v18 }
 0x27f   :  { %v603_v23 = vpack.c.bf16 %v580_v20, %v579_v19  ;;  %v533_v26 = vadd.f32 %v4459_v10, %v532_v22  ;;  %v585_v39 = vmax.f32 %v541_v28, 0.0  ;;  %5086 = vmatpush3.bf16.msra.mxu0 %v5299_v18  ;;  %v5300_v19 = vld [vmem:[%s8376_s25 + $0x38] sm:$0xff]  }
 0x280   :  { %v5050_v25 = vpop.f32.mrf.mxu0  ;;  %5103 = vmatprep.subr.bf16.mxu1 %v5300_v19 }
 0x281   :  { %v544_v27 = vadd.f32 %v5050_v25, %v4459_v10  ;;  %5067 = vmatprep.mubr.msk.bf16.mxu1 %vm304_vm1, %v603_v23  ;;  %v583_v37 = vmax.f32 %v533_v26, 0.0 }
 0x282   :  { %v535_v29 = vpop.f32.mrf.mxu0  ;;  %5068 = vmatmul.mubr.msk.bf16.vlgmr.msra.gmra.mxu1 %vm304_vm1, %v604_v24 }
 0x283   :  { %v536_v30 = vadd.f32 %v4459_v10, %v535_v29  ;;  %v586_v32 = vmax.f32 %v544_v27, 0.0  ;;  %5104 = vmatpush3.bf16.msra.mxu1 %v5300_v19 }
 0x284   :  { %v5053_v36 = vpop.f32.mrf.mxu0 }
 0x285   :  { %v584_v38 = vmax.f32 %v536_v30, 0.0  ;;  %v606_v46 = vpack.c.bf16 %v586_v32, %v585_v39  ;;  %v557_v51 = vadd.f32 %v5053_v36, %v4459_v10 }
 0x286   :  { %v548_v40 = vpop.f32.mrf.mxu0 }
 0x287   :  { %v605_v42 = vpack.c.bf16 %v584_v38, %v583_v37  ;;  %v549_v48 = vadd.f32 %v4459_v10, %v548_v40  ;;  %v589_v0 = vmax.f32 %v557_v51, 0.0 }
 0x288   :  { %v5054_v47 = vpop.f32.mrf.mxu0 }
 0x289   :  { %v560_v49 = vadd.f32 %v5054_v47, %v4459_v10  ;;  %5071 = vmatprep.mubr.msk.bf16.mxu1 %vm304_vm1, %v605_v42  ;;  %v587_v59 = vmax.f32 %v549_v48, 0.0 }
 0x28a   :  { %v551_v54 = vpop.f32.mrf.mxu0  ;;  %5072 = vmatmul.mubr.msk.bf16.gmra.mxu1 %vm304_vm1, %v606_v46 }
 0x28b   :  { %v552_v56 = vadd.f32 %v4459_v10, %v551_v54  ;;  %v590_v57 = vmax.f32 %v560_v49, 0.0 }
 0x28c   :  { %v5057_v58 = vpop.f32.mrf.mxu0 }
 0x28d   :  { %v588_v61 = vmax.f32 %v552_v56, 0.0  ;;  %v573_v2 = vadd.f32 %v5057_v58, %v4459_v10  ;;  %v608_v6 = vpack.c.bf16 %v590_v57, %v589_v0 }
 0x28e   :  { %v564_v3 = vpop.f32.mrf.mxu0 }
 0x28f   :  { %v607_v4 = vpack.c.bf16 %v588_v61, %v587_v59  ;;  %v565_v5 = vadd.f32 %v4459_v10, %v564_v3  ;;  %v593_v9 = vmax.f32 %v573_v2, 0.0 }
 0x290   :  { %v5058_v7 = vpop.f32.mrf.mxu0 }
 0x291   :  { %v576_v8 = vadd.f32 %v5058_v7, %v4459_v10  ;;  %5075 = vmatprep.mubr.msk.bf16.mxu1 %vm304_vm1, %v607_v4  ;;  %v591_v12 = vmax.f32 %v565_v5, 0.0 }
 0x292   :  { %v567_v11 = vpop.f32.mrf.mxu0  ;;  %5076 = vmatmul.mubr.msk.bf16.gmra.mxu1 %vm304_vm1, %v608_v6 }
 0x293   :  { %v594_v13 = vmax.f32 %v576_v8, 0.0  ;;  %v568_v14 = vadd.f32 %v4459_v10, %v567_v11  ;;  %v5784_v10 = vld [vmem:[%s8200_s8] ss:$0 sm:$0xff] }
 0x295   :  { %v592_v15 = vmax.f32 %v568_v14, 0.0  ;;  %v610_v16 = vpack.c.bf16 %v594_v13, %v593_v9 }
 0x297   :  { %v609_v17 = vpack.c.bf16 %v592_v15, %v591_v12 }
 0x299   :  { %5079 = vmatprep.mubr.msk.bf16.mxu1 %vm304_vm1, %v609_v17 }
 0x29a   :  { %5080 = vmatmul.mubr.msk.bf16.gmra.mxu1 %vm304_vm1, %v610_v16 }
 0x342   :  { %v5069_v20 = vpop.f32.mrf.mxu1 }
 0x343   :  { %v709_v21 = vadd.f32 %v5069_v20, %v5784_v10 }
 0x344   :  { %v700_v22 = vpop.f32.mrf.mxu1 }
 0x345   :  { %v4758_v23 = vpack.c.bf16 %v709_v21, %v709_v21  ;;  %v701_v24 = vadd.f32 %v5784_v10, %v700_v22  ;;  %v5810_v42 = vadd.f32 %v709_v21, %v5702_v35 }
 0x346   :  { %v5070_v25 = vpop.f32.mrf.mxu1 }
 0x347   :  { %845 = vst [vmem:[%s8201_s19 + $0x10] sm:$0xf] %v4758_v23  ;;  %v4756_v26 = vpack.c.bf16 %v701_v24, %v701_v24  ;;  %v712_v27 = vadd.f32 %v5070_v25, %v5784_v10  ;;  %v5800_v37 = vadd.f32 %v701_v24, %v5698_v33 }
 0x348   :  { %v703_v28 = vpop.f32.mrf.mxu1 }
 0x349   :  { %843 = vst [vmem:[%s8201_s19] sm:$0xf] %v4756_v26  ;;  %v4759_v29 = vpack.c.bf16 %v712_v27, %v712_v27  ;;  %v704_v30 = vadd.f32 %v5784_v10, %v703_v28  ;;  %v5797_v32 = vadd.f32 %v712_v27, %v5696_v31 }
 0x34a   :  { %v5073_v36 = vpop.f32.mrf.mxu1 }
 0x34b   :  { %846 = vst [vmem:[%s8201_s19 + $0x18] sm:$0xf] %v4759_v29  ;;  %v5806_v38 = vadd.f32 %v704_v30, %v5700_v34  ;;  %v4757_v39 = vpack.c.bf16 %v704_v30, %v704_v30  ;;  %v725_v40 = vadd.f32 %v5073_v36, %v5784_v10  ;;  %v865_v51 = vpack.c.bf16 %v5797_v32, %v5810_v42 }
 0x34c   :  { %v716_v46 = vpop.f32.mrf.mxu1 }
 0x34d   :  { %844 = vst [vmem:[%s8201_s19 + $0x8] sm:$0xf] %v4757_v39  ;;  %v864_v47 = vpack.c.bf16 %v5806_v38, %v5800_v37  ;;  %v4762_v48 = vpack.c.bf16 %v725_v40, %v725_v40  ;;  %v717_v49 = vadd.f32 %v5784_v10, %v716_v46  ;;  %v5844_v7 = vadd.f32 %v725_v40, %v5716_v45 }
 0x34e   :  { %v5074_v54 = vpop.f32.mrf.mxu1 }
 0x34f   :  { %849 = vst [vmem:[%s8201_s19 + $0x30] sm:$0xf] %v4762_v48  ;;  %v4760_v56 = vpack.c.bf16 %v717_v49, %v717_v49  ;;  %v728_v57 = vadd.f32 %v5074_v54, %v5784_v10  ;;  %5087 = vmatprep.mubr.msk.bf16.mxu0 %vm457_vm2, %v864_v47  ;;  %v5834_v3 = vadd.f32 %v717_v49, %v5712_v43 }
 0x350   :  { %v719_v58 = vpop.f32.mrf.mxu1  ;;  %5088 = vmatmul.mubr.msk.bf16.vlgmr.msra.gmra.mxu0 %vm457_vm2, %v865_v51 }
 0x351   :  { %847 = vst [vmem:[%s8201_s19 + $0x20] sm:$0xf] %v4760_v56  ;;  %v4763_v59 = vpack.c.bf16 %v728_v57, %v728_v57  ;;  %v720_v61 = vadd.f32 %v5784_v10, %v719_v58  ;;  %v5831_v0 = vadd.f32 %v728_v57, %v5710_v41 }
 0x352   :  { %v5077_v2 = vpop.f32.mrf.mxu1 }
 0x353   :  { %850 = vst [vmem:[%s8201_s19 + $0x38] sm:$0xf] %v4763_v59  ;;  %v5840_v4 = vadd.f32 %v720_v61, %v5714_v44  ;;  %v4761_v5 = vpack.c.bf16 %v720_v61, %v720_v61  ;;  %v741_v6 = vadd.f32 %v5077_v2, %v5784_v10  ;;  %v867_v13 = vpack.c.bf16 %v5831_v0, %v5844_v7  ;;  %v5301_v61 = vld [vmem:[%s8376_s25 + $0x30] sm:$0xff]   ;;  %v5302_v2 = vld [vmem:[%s8376_s25 + $0x28] sm:$0xff]  }
 0x354   :  { %v732_v8 = vpop.f32.mrf.mxu1  ;;  %5105 = vmatprep.subr.bf16.mxu1 %v5301_v61 }
 0x355   :  { %848 = vst [vmem:[%s8201_s19 + $0x28] sm:$0xf] %v4761_v5  ;;  %v866_v9 = vpack.c.bf16 %v5840_v4, %v5834_v3  ;;  %v4766_v11 = vpack.c.bf16 %v741_v6, %v741_v6  ;;  %v733_v12 = vadd.f32 %v5784_v10, %v732_v8  ;;  %v5878_v26 = vadd.f32 %v741_v6, %v5723_v50  ;;  %v5303_v5 = vld [vmem:[%s8376_s25 + $0x20] sm:$0xff]   ;;  %v5304_v6 = vld [vmem:[%s8202_s9 + $0x38] sm:$0xff]   ;;  %v5309_v8 = vld [vmem:[%s8203_s10 + $0x8] sm:$0xff]  }
 0x356   :  { %v5078_v14 = vpop.f32.mrf.mxu1  ;;  %5106 = vmatpush3.bf16.msra.mxu1 %v5301_v61  ;;  %5127 = vmatprep.subr.bf16.mxu0 %v5309_v8 }
 0x357   :  { %853 = vst [vmem:[%s8201_s19 + $0x50] sm:$0xf] %v4766_v11  ;;  %v4764_v15 = vpack.c.bf16 %v733_v12, %v733_v12  ;;  %v744_v16 = vadd.f32 %v5078_v14, %v5784_v10  ;;  %5091 = vmatprep.mubr.msk.bf16.mxu0 %vm457_vm2, %v866_v9  ;;  %v5868_v22 = vadd.f32 %v733_v12, %v5726_v52  ;;  %v5940_v12 = vld [vmem:[%s8199_s6 + $0x1] ss:$0 sm:$0xff] }
 0x358   :  { %v735_v17 = vpop.f32.mrf.mxu1  ;;  %5092 = vmatmul.mubr.msk.bf16.gmra.mxu0 %vm457_vm2, %v867_v13  ;;  %5107 = vmatprep.subr.bf16.mxu1 %v5302_v2 }
 0x359   :  { %851 = vst [vmem:[%s8201_s19 + $0x40] sm:$0xf] %v4764_v15  ;;  %v4767_v18 = vpack.c.bf16 %v744_v16, %v744_v16  ;;  %v736_v19 = vadd.f32 %v5784_v10, %v735_v17  ;;  %v5865_v20 = vadd.f32 %v744_v16, %v5728_v53  ;;  %5128 = vmatpush3.bf16.msra.mxu0 %v5309_v8 }
 0x35a   :  { %v5081_v21 = vpop.f32.mrf.mxu1  ;;  %5108 = vmatpush3.bf16.msra.mxu1 %v5302_v2 }
 0x35b   :  { %854 = vst [vmem:[%s8201_s19 + $0x58] sm:$0xf] %v4767_v18  ;;  %v5874_v23 = vadd.f32 %v736_v19, %v5730_v55  ;;  %v4765_v24 = vpack.c.bf16 %v736_v19, %v736_v19  ;;  %v757_v25 = vadd.f32 %v5081_v21, %v5784_v10  ;;  %v869_v36 = vpack.c.bf16 %v5865_v20, %v5878_v26 }
 0x35c   :  { %v748_v27 = vpop.f32.mrf.mxu1  ;;  %5109 = vmatprep.subr.bf16.mxu1 %v5303_v5 }
 0x35d   :  { %852 = vst [vmem:[%s8201_s19 + $0x48] sm:$0xf] %v4765_v24  ;;  %v868_v28 = vpack.c.bf16 %v5874_v23, %v5868_v22  ;;  %v4770_v29 = vpack.c.bf16 %v757_v25, %v757_v25  ;;  %v749_v30 = vadd.f32 %v5784_v10, %v748_v27  ;;  %v5911_v58 = vadd.f32 %v757_v25, %v5737_v60 }
 0x35e   :  { %v5082_v39 = vpop.f32.mrf.mxu1  ;;  %5110 = vmatpush3.bf16.msra.mxu1 %v5303_v5 }
 0x35f   :  { %857 = vst [vmem:[%s8201_s19 + $0x70] sm:$0xf] %v4770_v29  ;;  %v4768_v40 = vpack.c.bf16 %v749_v30, %v749_v30  ;;  %v760_v46 = vadd.f32 %v5082_v39, %v5784_v10  ;;  %5095 = vmatprep.mubr.msk.bf16.mxu0 %vm457_vm2, %v868_v28  ;;  %v5902_v54 = vadd.f32 %v749_v30, %v5740_v62  ;;  %v5305_v39 = vld [vmem:[%s8202_s9 + $0x30] sm:$0xff]  }
 0x360   :  { %v751_v47 = vpop.f32.mrf.mxu1  ;;  %5096 = vmatmul.mubr.msk.bf16.gmra.mxu0 %vm457_vm2, %v869_v36  ;;  %5147 = vmatprep.subr.bf16.mxu1 %v5304_v6 }
 0x361   :  { %855 = vst [vmem:[%s8201_s19 + $0x60] sm:$0xf] %v4768_v40  ;;  %v4771_v48 = vpack.c.bf16 %v760_v46, %v760_v46  ;;  %v752_v49 = vadd.f32 %v5784_v10, %v751_v47  ;;  %v5899_v51 = vadd.f32 %v760_v46, %v5742_v63 }
 0x363   :  { %858 = vst [vmem:[%s8201_s19 + $0x78] sm:$0xf] %v4771_v48  ;;  %v5908_v56 = vadd.f32 %v752_v49, %v5744_v1  ;;  %v4769_v57 = vpack.c.bf16 %v752_v49, %v752_v49  ;;  %v871_v59 = vpack.c.bf16 %v5899_v51, %v5911_v58 }
 0x365   :  { %856 = vst [vmem:[%s8201_s19 + $0x68] sm:$0xf] %v4769_v57  ;;  %v870_v10 = vpack.c.bf16 %v5908_v56, %v5902_v54 }
 0x367   :  { %5099 = vmatprep.mubr.msk.bf16.mxu0 %vm457_vm2, %v870_v10 }
 0x368   :  { %5100 = vmatmul.mubr.msk.bf16.gmra.mxu0 %vm457_vm2, %v871_v59  ;;  %v5306_v59 = vld [vmem:[%s8202_s9 + $0x28] sm:$0xff]  }
 0x410   :  { %v5089_v9 = vpop.f32.mrf.mxu0 }
 0x411   :  { %v959_v16 = vadd.f32 %v5089_v9, %v5940_v12 }
 0x412   :  { %v950_v11 = vpop.f32.mrf.mxu0 }
 0x413   :  { %v951_v14 = vadd.f32 %v5940_v12, %v950_v11  ;;  %v1015_v27 = vmax.f32 %v959_v16, 0.0 }
 0x414   :  { %v5090_v13 = vpop.f32.mrf.mxu0 }
 0x415   :  { %v962_v15 = vadd.f32 %v5090_v13, %v5940_v12  ;;  %v1013_v24 = vmax.f32 %v951_v14, 0.0 }
 0x416   :  { %v953_v17 = vpop.f32.mrf.mxu0 }
 0x417   :  { %v954_v18 = vadd.f32 %v5940_v12, %v953_v17  ;;  %v1016_v19 = vmax.f32 %v962_v15, 0.0 }
 0x418   :  { %v5093_v21 = vpop.f32.mrf.mxu0 }
 0x419   :  { %v1014_v25 = vmax.f32 %v954_v18, 0.0  ;;  %v1039_v30 = vpack.c.bf16 %v1016_v19, %v1015_v27  ;;  %v975_v47 = vadd.f32 %v5093_v21, %v5940_v12 }
 0x41a   :  { %v966_v28 = vpop.f32.mrf.mxu0 }
 0x41b   :  { %v1038_v29 = vpack.c.bf16 %v1014_v25, %v1013_v24  ;;  %v967_v40 = vadd.f32 %v5940_v12, %v966_v28  ;;  %v1019_v5 = vmax.f32 %v975_v47, 0.0  ;;  %v5308_v24 = vld [vmem:[%s8202_s9 + $0x18] sm:$0xff]  }
 0x41c   :  { %v5094_v36 = vpop.f32.mrf.mxu0 }
 0x41d   :  { %v978_v46 = vadd.f32 %v5094_v36, %v5940_v12  ;;  %5111 = vmatprep.mubr.msk.bf16.mxu1 %vm304_vm1, %v1038_v29  ;;  %v1017_v61 = vmax.f32 %v967_v40, 0.0 }
 0x41e   :  { %v969_v48 = vpop.f32.mrf.mxu0  ;;  %5112 = vmatmul.mubr.msk.bf16.vlgmr.msra.gmra.mxu1 %vm304_vm1, %v1039_v30 }
 0x41f   :  { %v970_v49 = vadd.f32 %v5940_v12, %v969_v48  ;;  %5148 = vmatpush3.bf16.msra.mxu1 %v5304_v6  ;;  %v1020_v57 = vmax.f32 %v978_v46, 0.0  ;;  %v5307_v6 = vld [vmem:[%s8202_s9 + $0x20] sm:$0xff]  }
 0x420   :  { %v5097_v10 = vpop.f32.mrf.mxu0  ;;  %5149 = vmatprep.subr.bf16.mxu1 %v5305_v39 }
 0x421   :  { %v1018_v2 = vmax.f32 %v970_v49, 0.0  ;;  %v1041_v11 = vpack.c.bf16 %v1020_v57, %v1019_v5  ;;  %v991_v16 = vadd.f32 %v5097_v10, %v5940_v12 }
 0x422   :  { %v982_v8 = vpop.f32.mrf.mxu0 }
 0x423   :  { %v1040_v9 = vpack.c.bf16 %v1018_v2, %v1017_v61  ;;  %5150 = vmatpush3.bf16.msra.mxu1 %v5305_v39  ;;  %v983_v14 = vadd.f32 %v5940_v12, %v982_v8  ;;  %v1023_v28 = vmax.f32 %v991_v16, 0.0  ;;  %v5310_v8 = vld [vmem:[%s8202_s9 + $0x10] sm:$0xff]  }
 0x424   :  { %v5098_v13 = vpop.f32.mrf.mxu0  ;;  %5151 = vmatprep.subr.bf16.mxu1 %v5306_v59 }
 0x425   :  { %v994_v15 = vadd.f32 %v5098_v13, %v5940_v12  ;;  %5115 = vmatprep.mubr.msk.bf16.mxu1 %vm304_vm1, %v1040_v9  ;;  %v1021_v25 = vmax.f32 %v983_v14, 0.0  ;;  %v5312_v9 = vld [vmem:[%s8202_s9] sm:$0xff]  }
 0x426   :  { %v985_v17 = vpop.f32.mrf.mxu0  ;;  %5116 = vmatmul.mubr.msk.bf16.gmra.mxu1 %vm304_vm1, %v1041_v11  ;;  %v5313_v11 = vld [vmem:[%s8203_s10] sm:$0xff]  }
 0x427   :  { %v986_v18 = vadd.f32 %v5940_v12, %v985_v17  ;;  %5152 = vmatpush3.bf16.msra.mxu1 %v5306_v59  ;;  %v1024_v19 = vmax.f32 %v994_v15, 0.0  ;;  %5129 = vmatprep.subr.bf16.mxu0 %v5313_v11  ;;  %v5993_v13 = vld [vmem:[%s8200_s8 + $0x1] ss:$0 sm:$0xff] }
 0x428   :  { %v5101_v21 = vpop.f32.mrf.mxu0  ;;  %5153 = vmatprep.subr.bf16.mxu1 %v5307_v6  ;;  %5130 = vmatpush3.bf16.msra.mxu0 %v5313_v11 }
 0x429   :  { %v1022_v27 = vmax.f32 %v986_v18, 0.0  ;;  %v1043_v36 = vpack.c.bf16 %v1024_v19, %v1023_v28  ;;  %v1007_v47 = vadd.f32 %v5101_v21, %v5940_v12 }
 0x42a   :  { %v998_v29 = vpop.f32.mrf.mxu0 }
 0x42b   :  { %v1042_v30 = vpack.c.bf16 %v1022_v27, %v1021_v25  ;;  %5154 = vmatpush3.bf16.msra.mxu1 %v5307_v6  ;;  %v999_v40 = vadd.f32 %v5940_v12, %v998_v29  ;;  %v1027_v61 = vmax.f32 %v1007_v47, 0.0 }
 0x42c   :  { %v5102_v39 = vpop.f32.mrf.mxu0  ;;  %5155 = vmatprep.subr.bf16.mxu1 %v5308_v24 }
 0x42d   :  { %v1010_v46 = vadd.f32 %v5102_v39, %v5940_v12  ;;  %5119 = vmatprep.mubr.msk.bf16.mxu1 %vm304_vm1, %v1042_v30  ;;  %v1025_v10 = vmax.f32 %v999_v40, 0.0 }
 0x42e   :  { %v1001_v48 = vpop.f32.mrf.mxu0  ;;  %5120 = vmatmul.mubr.msk.bf16.gmra.mxu1 %vm304_vm1, %v1043_v36 }
 0x42f   :  { %v1002_v49 = vadd.f32 %v5940_v12, %v1001_v48  ;;  %5156 = vmatpush3.bf16.msra.mxu1 %v5308_v24  ;;  %v1028_v57 = vmax.f32 %v1010_v46, 0.0  ;;  %v5311_v12 = vld [vmem:[%s8202_s9 + $0x8] sm:$0xff]  }
 0x430   :  { %5157 = vmatprep.subr.bf16.mxu1 %v5310_v8 }
 0x431   :  { %v1026_v59 = vmax.f32 %v1002_v49, 0.0  ;;  %v1045_v5 = vpack.c.bf16 %v1028_v57, %v1027_v61 }
 0x433   :  { %v1044_v2 = vpack.c.bf16 %v1026_v59, %v1025_v10  ;;  %5158 = vmatpush3.bf16.msra.mxu1 %v5310_v8 }
 0x434   :  { %5159 = vmatprep.subr.bf16.mxu1 %v5311_v12 }
 0x435   :  { %5123 = vmatprep.mubr.msk.bf16.mxu1 %vm304_vm1, %v1044_v2 }
 0x436   :  { %5124 = vmatmul.mubr.msk.bf16.gmra.mxu1 %vm304_vm1, %v1045_v5 }
 0x437   :  { %5160 = vmatpush3.bf16.msra.mxu1 %v5311_v12 }
 0x438   :  { %5161 = vmatprep.subr.bf16.mxu1 %v5312_v9 }
 0x43b   :  { %5162 = vmatpush3.bf16.msra.mxu1 %v5312_v9 }
 0x4de   :  { %v5113_v6 = vpop.f32.mrf.mxu1 }
 0x4df   :  { %v1145_v14 = vadd.f32 %v5113_v6, %v5993_v13 }
 0x4e0   :  { %v1136_v15 = vpop.f32.mrf.mxu1 }
 0x4e1   :  { %v4774_v16 = vpack.c.bf16 %v1145_v14, %v1145_v14  ;;  %v1137_v17 = vadd.f32 %v5993_v13, %v1136_v15  ;;  %v6019_v46 = vadd.f32 %v1145_v14, %v5810_v42 }
 0x4e2   :  { %v5114_v18 = vpop.f32.mrf.mxu1 }
 0x4e3   :  { %1281 = vst [vmem:[%s8201_s19 + $0x14] sm:$0xf] %v4774_v16  ;;  %v4772_v19 = vpack.c.bf16 %v1137_v17, %v1137_v17  ;;  %v1148_v21 = vadd.f32 %v5114_v18, %v5993_v13  ;;  %v6009_v30 = vadd.f32 %v1137_v17, %v5800_v37  ;;  %8396 = vst [vmem:[#allocation21_spill] sm:$0xff] %v6019_v46 }
 0x4e4   :  { %v1139_v24 = vpop.f32.mrf.mxu1 }
 0x4e5   :  { %1279 = vst [vmem:[%s8201_s19 + $0x4] sm:$0xf] %v4772_v19  ;;  %v4775_v25 = vpack.c.bf16 %v1148_v21, %v1148_v21  ;;  %v1140_v27 = vadd.f32 %v5993_v13, %v1139_v24  ;;  %v6006_v28 = vadd.f32 %v1148_v21, %v5797_v32  ;;  %8394 = vst [vmem:[#allocation19_spill] sm:$0xff] %v6009_v30 }
 0x4e6   :  { %v5117_v29 = vpop.f32.mrf.mxu1  ;;  %v1216_v48 = vpack.c.bf16 %v1148_v21, %v1145_v14 }
 0x4e7   :  { %8393 = vst [vmem:[#allocation18_spill] sm:$0xff] %v6006_v28  ;;  %1282 = vst [vmem:[%s8201_s19 + $0x1c] sm:$0xf] %v4775_v25  ;;  %v6015_v36 = vadd.f32 %v1140_v27, %v5806_v38  ;;  %v4773_v39 = vpack.c.bf16 %v1140_v27, %v1140_v27  ;;  %v1161_v40 = vadd.f32 %v5117_v29, %v5993_v13 }
 0x4e8   :  { %v1152_v47 = vpop.f32.mrf.mxu1  ;;  %v1215_v32 = vpack.c.bf16 %v1140_v27, %v1137_v17  ;;  %v1316_v57 = vpack.c.bf16 %v6006_v28, %v6019_v46 }
 0x4e9   :  { %8395 = vst [vmem:[#allocation20_spill] sm:$0xff] %v6015_v36  ;;  %1280 = vst [vmem:[%s8201_s19 + $0xc] sm:$0xf] %v4773_v39  ;;  %v1315_v37 = vpack.c.bf16 %v6015_v36, %v6009_v30  ;;  %v4778_v49 = vpack.c.bf16 %v1161_v40, %v1161_v40  ;;  %v1153_v38 = vadd.f32 %v5993_v13, %v1152_v47 }
 0x4ea   :  { %5163 = vmatprep.mubr.bf16.mxu1 %v1215_v32  ;;  %v5118_v10 = vpop.f32.mrf.mxu1  ;;  %v6053_v15 = vadd.f32 %v1161_v40, %v5844_v7 }
 0x4eb   :  { %1285 = vst [vmem:[%s8201_s19 + $0x34] sm:$0xf] %v4778_v49  ;;  %v4776_v42 = vpack.c.bf16 %v1153_v38, %v1153_v38  ;;  %v1164_v59 = vadd.f32 %v5118_v10, %v5993_v13  ;;  %5164 = vmatmul.mubr.bf16.vlgmr.msra.gmra.mxu1 %v1216_v48  ;;  %5131 = vmatprep.mubr.msk.bf16.mxu0 %vm457_vm2, %v1315_v37 }
 0x4ec   :  { %v1155_v61 = vpop.f32.mrf.mxu1  ;;  %5132 = vmatmul.mubr.msk.bf16.vlgmr.msra.gmra.mxu0 %vm457_vm2, %v1316_v57  ;;  %v6043_v9 = vadd.f32 %v1153_v38, %v5834_v3  ;;  %8400 = vst [vmem:[#allocation25_spill] sm:$0xff] %v6053_v15 }
 0x4ed   :  { %1283 = vst [vmem:[%s8201_s19 + $0x24] sm:$0xf] %v4776_v42  ;;  %v4779_v2 = vpack.c.bf16 %v1164_v59, %v1164_v59  ;;  %v1156_v5 = vadd.f32 %v5993_v13, %v1155_v61  ;;  %v6040_v8 = vadd.f32 %v1164_v59, %v5831_v0 }
 0x4ee   :  { %v5121_v12 = vpop.f32.mrf.mxu1  ;;  %8398 = vst [vmem:[#allocation23_spill] sm:$0xff] %v6043_v9 }
 0x4ef   :  { %8397 = vst [vmem:[#allocation22_spill] sm:$0xff] %v6040_v8  ;;  %1286 = vst [vmem:[%s8201_s19 + $0x3c] sm:$0xf] %v4779_v2  ;;  %v6049_v11 = vadd.f32 %v1156_v5, %v5840_v4  ;;  %v4777_v6 = vpack.c.bf16 %v1156_v5, %v1156_v5  ;;  %v1177_v14 = vadd.f32 %v5121_v12, %v5993_v13 }
 0x4f0   :  { %v1168_v16 = vpop.f32.mrf.mxu1  ;;  %v1217_v0 = vpack.c.bf16 %v1156_v5, %v1153_v38  ;;  %v1218_v4 = vpack.c.bf16 %v1164_v59, %v1161_v40  ;;  %v1318_v19 = vpack.c.bf16 %v6040_v8, %v6053_v15 }
 0x4f1   :  { %8399 = vst [vmem:[#allocation24_spill] sm:$0xff] %v6049_v11  ;;  %1284 = vst [vmem:[%s8201_s19 + $0x2c] sm:$0xf] %v4777_v6  ;;  %v1317_v3 = vpack.c.bf16 %v6049_v11, %v6043_v9  ;;  %v4782_v17 = vpack.c.bf16 %v1177_v14, %v1177_v14  ;;  %v1169_v18 = vadd.f32 %v5993_v13, %v1168_v16 }
 0x4f2   :  { %5167 = vmatprep.mubr.bf16.mxu1 %v1217_v0  ;;  %v5122_v21 = vpop.f32.mrf.mxu1  ;;  %v6087_v49 = vadd.f32 %v1177_v14, %v5878_v26 }
 0x4f3   :  { %1289 = vst [vmem:[%s8201_s19 + $0x54] sm:$0xf] %v4782_v17  ;;  %v4780_v7 = vpack.c.bf16 %v1169_v18, %v1169_v18  ;;  %v1180_v24 = vadd.f32 %v5122_v21, %v5993_v13  ;;  %5168 = vmatmul.mubr.bf16.gmra.mxu1 %v1218_v4  ;;  %5135 = vmatprep.mubr.msk.bf16.mxu0 %vm457_vm2, %v1317_v3  ;;  %v5317_v4 = vld [vmem:[%s8204_s12] sm:$0xff]   ;;  %v5320_v21 = vld [vmem:[%s8205_s14 + $0x4c] ss:$12 sps:$4 sm:$0xff]  }
 0x4f4   :  { %v1171_v25 = vpop.f32.mrf.mxu1  ;;  %5136 = vmatmul.mubr.msk.bf16.gmra.mxu0 %vm457_vm2, %v1318_v19  ;;  %v6077_v47 = vadd.f32 %v1169_v18, %v5868_v22  ;;  %8404 = vst [vmem:[#allocation29_spill] sm:$0xff] %v6087_v49  ;;  %v5318_v19 = vld [vmem:[%s8205_s14 + $0x48] ss:$12 sps:$4 sm:$0xff]   ;;  %1961 = vmatprep.subr.bf16.mxu1 %v5320_v21 }
 0x4f5   :  { %1287 = vst [vmem:[%s8201_s19 + $0x44] sm:$0xf] %v4780_v7  ;;  %v4783_v27 = vpack.c.bf16 %v1180_v24, %v1180_v24  ;;  %v1172_v29 = vadd.f32 %v5993_v13, %v1171_v25  ;;  %v6074_v39 = vadd.f32 %v1180_v24, %v5865_v20  ;;  %v5321_v7 = vld [vmem:[%s8205_s14 + $0x50] ss:$12 sps:$4 sm:$0xff]   ;;  %1962 = vmatpush1.bf16.msra.mxu1 %v5318_v19 }
 0x4f6   :  { %v5125_v40 = vpop.f32.mrf.mxu1  ;;  %8402 = vst [vmem:[#allocation27_spill] sm:$0xff] %v6077_v47 }
 0x4f7   :  { %8401 = vst [vmem:[#allocation26_spill] sm:$0xff] %v6074_v39  ;;  %1290 = vst [vmem:[%s8201_s19 + $0x5c] sm:$0xf] %v4783_v27  ;;  %v6083_v32 = vadd.f32 %v1172_v29, %v5874_v23  ;;  %v4781_v48 = vpack.c.bf16 %v1172_v29, %v1172_v29  ;;  %v1193_v37 = vadd.f32 %v5125_v40, %v5993_v13 }
 0x4f8   :  { %v1184_v38 = vpop.f32.mrf.mxu1  ;;  %v1219_v20 = vpack.c.bf16 %v1172_v29, %v1169_v18  ;;  %v1220_v23 = vpack.c.bf16 %v1180_v24, %v1177_v14  ;;  %v1320_v42 = vpack.c.bf16 %v6074_v39, %v6087_v49  ;;  %v5316_v18 = vld [vmem:[%s8204_s12 + $0x8] sm:$0xff]  }
 0x4f9   :  { %8403 = vst [vmem:[#allocation28_spill] sm:$0xff] %v6083_v32  ;;  %1288 = vst [vmem:[%s8201_s19 + $0x4c] sm:$0xf] %v4781_v48  ;;  %v1319_v22 = vpack.c.bf16 %v6083_v32, %v6077_v47  ;;  %v4786_v57 = vpack.c.bf16 %v1193_v37, %v1193_v37  ;;  %v1185_v10 = vadd.f32 %v5993_v13, %v1184_v38 }
 0x4fa   :  { %5171 = vmatprep.mubr.bf16.mxu1 %v1219_v20  ;;  %v5126_v59 = vpop.f32.mrf.mxu1  ;;  %v6120_v17 = vadd.f32 %v1193_v37, %v5911_v58  ;;  %v5315_v58 = vld [vmem:[%s8204_s12 + $0x10] sm:$0xff]   ;;  %v6155_v20 = vld [vmem:[%s8206_s11] ss:$0 sm:$0xff] }
 0x4fb   :  { %1293 = vst [vmem:[%s8201_s19 + $0x74] sm:$0xf] %v4786_v57  ;;  %v4784_v26 = vpack.c.bf16 %v1185_v10, %v1185_v10  ;;  %v1196_v61 = vadd.f32 %v5126_v59, %v5993_v13  ;;  %5172 = vmatmul.mubr.bf16.gmra.mxu1 %v1220_v23  ;;  %5139 = vmatprep.mubr.msk.bf16.mxu0 %vm457_vm2, %v1319_v22 }
 0x4fc   :  { %v1187_v2 = vpop.f32.mrf.mxu1  ;;  %5140 = vmatmul.mubr.msk.bf16.gmra.mxu0 %vm457_vm2, %v1320_v42  ;;  %v6111_v14 = vadd.f32 %v1185_v10, %v5902_v54  ;;  %8408 = vst [vmem:[#allocation33_spill] sm:$0xff] %v6120_v17 }
 0x4fd   :  { %1291 = vst [vmem:[%s8201_s19 + $0x64] sm:$0xf] %v4784_v26  ;;  %v4787_v5 = vpack.c.bf16 %v1196_v61, %v1196_v61  ;;  %v1188_v12 = vadd.f32 %v5993_v13, %v1187_v2  ;;  %v6108_v6 = vadd.f32 %v1196_v61, %v5899_v51  ;;  %v1222_v54 = vpack.c.bf16 %v1196_v61, %v1193_v37 }
 0x4fe   :  { %8406 = vst [vmem:[#allocation31_spill] sm:$0xff] %v6111_v14 }
 0x4ff   :  { %8405 = vst [vmem:[#allocation30_spill] sm:$0xff] %v6108_v6  ;;  %1294 = vst [vmem:[%s8201_s19 + $0x7c] sm:$0xf] %v4787_v5  ;;  %v6117_v16 = vadd.f32 %v1188_v12, %v5908_v56  ;;  %v4785_v0 = vpack.c.bf16 %v1188_v12, %v1188_v12  ;;  %v1221_v3 = vpack.c.bf16 %v1188_v12, %v1185_v10  ;;  %v5314_v56 = vld [vmem:[%s8204_s12 + $0x18] sm:$0xff]  }
 0x500   :  { %v1322_v13 = vpack.c.bf16 %v6108_v6, %v6120_v17  ;;  %5179 = vmatprep.subr.bf16.mxu0 %v5314_v56 }
 0x501   :  { %8407 = vst [vmem:[#allocation32_spill] sm:$0xff] %v6117_v16  ;;  %1292 = vst [vmem:[%s8201_s19 + $0x6c] sm:$0xf] %v4785_v0  ;;  %v1321_v51 = vpack.c.bf16 %v6117_v16, %v6111_v14  ;;  %5175 = vmatprep.mubr.bf16.mxu1 %v1221_v3  ;;  %5180 = vmatpush3.bf16.msra.mxu0 %v5314_v56 }
 0x502   :  { %5181 = vmatprep.subr.bf16.mxu0 %v5315_v58 }
 0x503   :  { %5176 = vmatmul.mubr.bf16.gmra.mxu1 %v1222_v54  ;;  %5143 = vmatprep.mubr.msk.bf16.mxu0 %vm457_vm2, %v1321_v51 }
 0x504   :  { %5144 = vmatmul.mubr.msk.bf16.gmra.mxu0 %vm457_vm2, %v1322_v13 }
 0x505   :  { %5182 = vmatpush3.bf16.msra.mxu0 %v5315_v58 }
 0x506   :  { %5183 = vmatprep.subr.bf16.mxu0 %v5316_v18 }
 0x509   :  { %5184 = vmatpush3.bf16.msra.mxu0 %v5316_v18 }
 0x50a   :  { %5185 = vmatprep.subr.bf16.mxu0 %v5317_v4 }
 0x50d   :  { %5186 = vmatpush3.bf16.msra.mxu0 %v5317_v4 }
 0x50e   :  { %5203 = vmatprep.subr.bf16.mxu0 %v5321_v7 }
 0x5ab   :  { %v5165_v24 = vpop.f32.mrf.mxu1 }
 0x5ac   :  { %v5133_v25 = vpop.f32.mrf.mxu0 }
 0x5ad   :  { %v1538_v27 = vpop.f32.mrf.mxu1  ;;  %v1547_v37 = vadd.f32 %v5165_v24, %v5133_v25 }
 0x5ae   :  { %v1393_v29 = vpop.f32.mrf.mxu0 }
 0x5af   :  { %v1539_v40 = vadd.f32 %v1538_v27, %v1393_v29  ;;  %v5166_v48 = vpop.f32.mrf.mxu1  ;;  %v6164_v61 = vadd.f32 %v6155_v20, %v1547_v37 }
 0x5b0   :  { %v5134_v38 = vpop.f32.mrf.mxu0 }
 0x5b1   :  { %v1550_v22 = vadd.f32 %v5166_v48, %v5134_v38  ;;  %v1541_v57 = vpop.f32.mrf.mxu1  ;;  %v6158_v23 = vadd.f32 %v6155_v20, %v1539_v40  ;;  %8411 = vst [vmem:[#allocation36_spill] sm:$0xff] %v6164_v61  ;;  %v8222_v58 = vmax.f32 %v6164_v61, 0.0 }
 0x5b2   :  { %v1396_v10 = vpop.f32.mrf.mxu0 }
 0x5b3   :  { %8409 = vst [vmem:[#allocation34_spill] sm:$0xff] %v6158_v23  ;;  %v6161_v42 = vadd.f32 %v6155_v20, %v1550_v22  ;;  %v1542_v59 = vadd.f32 %v1541_v57, %v1396_v10  ;;  %v5169_v26 = vpop.f32.mrf.mxu1  ;;  %v8233_v51 = vmax.f32 %v6158_v23, 0.0  ;;  %v6691_v23 = vld [vmem:[%s8210_s17 + $0xf8] sm:$0xff] }
 0x5b4   :  { %v5137_v2 = vpop.f32.mrf.mxu0 }
 0x5b5   :  { %8410 = vst [vmem:[#allocation35_spill] sm:$0xff] %v6161_v42  ;;  %v6167_v5 = vadd.f32 %v6155_v20, %v1542_v59  ;;  %v1554_v12 = vpop.f32.mrf.mxu1  ;;  %v8224_v0 = vmax.f32 %v6161_v42, 0.0  ;;  %v1563_v18 = vadd.f32 %v5169_v26, %v5137_v2 }
 0x5b6   :  { %v1409_v3 = vpop.f32.mrf.mxu0 }
 0x5b7   :  { %v8234_v54 = vmax.f32 %v6167_v5, 0.0  ;;  %v1555_v13 = vadd.f32 %v1554_v12, %v1409_v3  ;;  %v5170_v56 = vpop.f32.mrf.mxu1  ;;  %v1649_v25 = vpack.c.bf16 %v8224_v0, %v8222_v58  ;;  %v6189_v38 = vadd.f32 %v6155_v20, %v1563_v18 }
 0x5b8   :  { %v5138_v4 = vpop.f32.mrf.mxu0 }
 0x5b9   :  { %v1648_v19 = vpack.c.bf16 %v8234_v54, %v8233_v51  ;;  %v1566_v21 = vadd.f32 %v5170_v56, %v5138_v4  ;;  %v1557_v24 = vpop.f32.mrf.mxu1  ;;  %v6182_v29 = vadd.f32 %v6155_v20, %v1555_v13  ;;  %8414 = vst [vmem:[#allocation39_spill] sm:$0xff] %v6189_v38  ;;  %v8219_v56 = vmax.f32 %v6189_v38, 0.0 }
 0x5ba   :  { %v1412_v27 = vpop.f32.mrf.mxu0 }
 0x5bb   :  { %8412 = vst [vmem:[#allocation37_spill] sm:$0xff] %v6182_v29  ;;  %v6185_v40 = vadd.f32 %v6155_v20, %v1566_v21  ;;  %v1558_v48 = vadd.f32 %v1557_v24, %v1412_v27  ;;  %v5173_v37 = vpop.f32.mrf.mxu1  ;;  %5187 = vmatprep.mubr.msk.bf16.mxu0 %vm304_vm1, %v1648_v19  ;;  %v8221_v2 = vmax.f32 %v6182_v29, 0.0 }
 0x5bc   :  { %v5141_v22 = vpop.f32.mrf.mxu0  ;;  %5188 = vmatmul.mubr.msk.bf16.vlgmr.msra.gmra.mxu0 %vm304_vm1, %v1649_v25 }
 0x5bd   :  { %8413 = vst [vmem:[#allocation38_spill] sm:$0xff] %v6185_v40  ;;  %v6193_v57 = vadd.f32 %v6155_v20, %v1558_v48  ;;  %v1570_v10 = vpop.f32.mrf.mxu1  ;;  %5204 = vmatpush3.bf16.msra.mxu0 %v5321_v7  ;;  %v8220_v59 = vmax.f32 %v6185_v40, 0.0  ;;  %v1579_v18 = vadd.f32 %v5173_v37, %v5141_v22 }
 0x5be   :  { %v1425_v26 = vpop.f32.mrf.mxu0 }
 0x5bf   :  { %8415 = vst [vmem:[#allocation40_spill] sm:$0xff] %v6193_v57  ;;  %v8223_v12 = vmax.f32 %v6193_v57, 0.0  ;;  %v1571_v3 = vadd.f32 %v1570_v10, %v1425_v26  ;;  %v5174_v13 = vpop.f32.mrf.mxu1  ;;  %v1651_v24 = vpack.c.bf16 %v8220_v59, %v8219_v56  ;;  %v6215_v10 = vadd.f32 %v6155_v20, %v1579_v18 }
 0x5c0   :  { %v5142_v4 = vpop.f32.mrf.mxu0 }
 0x5c1   :  { %v1650_v19 = vpack.c.bf16 %v8223_v12, %v8221_v2  ;;  %v1582_v21 = vadd.f32 %v5174_v13, %v5142_v4  ;;  %v1573_v7 = vpop.f32.mrf.mxu1  ;;  %v6208_v27 = vadd.f32 %v6155_v20, %v1571_v3  ;;  %8418 = vst [vmem:[#allocation43_spill] sm:$0xff] %v6215_v10 }
 0x5c2   :  { %v1428_v25 = vpop.f32.mrf.mxu0 }
 0x5c3   :  { %8416 = vst [vmem:[#allocation41_spill] sm:$0xff] %v6208_v27  ;;  %v6211_v48 = vadd.f32 %v6155_v20, %v1582_v21  ;;  %v1574_v37 = vadd.f32 %v1573_v7, %v1428_v25  ;;  %v5177_v22 = vpop.f32.mrf.mxu1  ;;  %5191 = vmatprep.mubr.msk.bf16.mxu0 %vm304_vm1, %v1650_v19  ;;  %v8231_v21 = vmax.f32 %v6208_v27, 0.0  ;;  %v8225_v19 = vmax.f32 %v6215_v10, 0.0 }
 0x5c4   :  { %v5145_v26 = vpop.f32.mrf.mxu0  ;;  %5192 = vmatmul.mubr.msk.bf16.gmra.mxu0 %vm304_vm1, %v1651_v24 }
 0x5c5   :  { %8417 = vst [vmem:[#allocation42_spill] sm:$0xff] %v6211_v48  ;;  %v6219_v13 = vadd.f32 %v6155_v20, %v1574_v37  ;;  %v1586_v4 = vpop.f32.mrf.mxu1  ;;  %v8230_v3 = vmax.f32 %v6211_v48, 0.0  ;;  %v1595_v18 = vadd.f32 %v5177_v22, %v5145_v26 }
 0x5c6   :  { %v1441_v56 = vpop.f32.mrf.mxu0 }
 0x5c7   :  { %8419 = vst [vmem:[#allocation44_spill] sm:$0xff] %v6219_v13  ;;  %v8232_v7 = vmax.f32 %v6219_v13, 0.0  ;;  %v1587_v25 = vadd.f32 %v1586_v4, %v1441_v56  ;;  %v5178_v59 = vpop.f32.mrf.mxu1  ;;  %v1653_v58 = vpack.c.bf16 %v8230_v3, %v8225_v19  ;;  %v6241_v26 = vadd.f32 %v6155_v20, %v1595_v18  ;;  %v5325_v18 = vld [vmem:[%s8205_s14 + $0x38] ss:$12 sps:$4 sm:$0xff]  }
 0x5c8   :  { %v5146_v2 = vpop.f32.mrf.mxu0  ;;  %5205 = vmatprep.subr.bf16.mxu0 %v5325_v18 }
 0x5c9   :  { %v1652_v24 = vpack.c.bf16 %v8232_v7, %v8231_v21  ;;  %v1598_v37 = vadd.f32 %v5178_v59, %v5146_v2  ;;  %v1589_v12 = vpop.f32.mrf.mxu1  ;;  %v6234_v56 = vadd.f32 %v6155_v20, %v1587_v25  ;;  %8422 = vst [vmem:[#allocation47_spill] sm:$0xff] %v6241_v26  ;;  %5206 = vmatpush3.bf16.msra.mxu0 %v5325_v18  ;;  %v8236_v18 = vmov 0  }
 0x5ca   :  { %v1444_v0 = vpop.f32.mrf.mxu0  ;;  %1985 = vmatprep.mubr.bf16.mxu1 %v8236_v18 }
 0x5cb   :  { %8420 = vst [vmem:[#allocation45_spill] sm:$0xff] %v6234_v56  ;;  %v6237_v4 = vadd.f32 %v6155_v20, %v1598_v37  ;;  %v1590_v22 = vadd.f32 %v1589_v12, %v1444_v0  ;;  %5195 = vmatprep.mubr.msk.bf16.mxu0 %vm304_vm1, %v1652_v24  ;;  %v8228_v19 = vmax.f32 %v6234_v56, 0.0  ;;  %v8226_v37 = vmax.f32 %v6241_v26, 0.0  ;;  %v5322_v12 = vld [vmem:[%s8205_s14 + $0x30] ss:$12 sps:$4 sm:$0xff]  }
 0x5cc   :  { %5196 = vmatmul.mubr.msk.bf16.gmra.mxu0 %vm304_vm1, %v1653_v58  ;;  %v5328_v24 = vld [vmem:[%s8205_s14 + $0x1c] ss:$12 sps:$4 sm:$0xff]  }
 0x5cd   :  { %8421 = vst [vmem:[#allocation46_spill] sm:$0xff] %v6237_v4  ;;  %v6245_v59 = vadd.f32 %v6155_v20, %v1590_v22  ;;  %v8227_v2 = vmax.f32 %v6237_v4, 0.0  ;;  %v5324_v20 = vld [vmem:[%s8205_s14 + $0x34] ss:$12 sps:$4 sm:$0xff]   ;;  %v5326_v22 = vld [vmem:[%s8205_s14 + $0x18] ss:$12 sps:$4 sm:$0xff]  }
 0x5ce   :  { %1963 = vmatprep.subr.bf16.mxu1 %v5324_v20  ;;  %v5330_v20 = vld [vmem:[%s8205_s14] ss:$12 sps:$4 sm:$0xff]  }
 0x5cf   :  { %8423 = vst [vmem:[#allocation48_spill] sm:$0xff] %v6245_v59  ;;  %v8229_v25 = vmax.f32 %v6245_v59, 0.0  ;;  %v1655_v58 = vpack.c.bf16 %v8227_v2, %v8226_v37  ;;  %1964 = vmatpush1.bf16.msra.mxu1 %v5322_v12  ;;  %v5333_v12 = vld [vmem:[%s8205_s14 + $0x8] ss:$12 sps:$4 sm:$0xff]  }
 0x5d0   :  { %1965 = vmatprep.subr.bf16.mxu1 %v5328_v24 }
 0x5d1   :  { %v1654_v0 = vpack.c.bf16 %v8229_v25, %v8228_v19 }
 0x5d3   :  { %5199 = vmatprep.mubr.msk.bf16.mxu0 %vm304_vm1, %v1654_v0  ;;  %v5329_v0 = vld [vmem:[%s8205_s14 + $0x20] ss:$12 sps:$4 sm:$0xff]   ;;  %1966 = vmatpush1.bf16.msra.mxu1 %v5326_v22 }
 0x5d4   :  { %5200 = vmatmul.mubr.msk.bf16.gmra.mxu0 %vm304_vm1, %v1655_v58  ;;  %5207 = vmatprep.subr.bf16.mxu0 %v5329_v0  ;;  %v5332_v58 = vld [vmem:[%s8205_s14 + $0x4] ss:$12 sps:$4 sm:$0xff]  }
 0x5d5   :  { %5208 = vmatpush3.bf16.msra.mxu0 %v5329_v0  ;;  %1967 = vmatprep.subr.bf16.mxu1 %v5332_v58  ;;  %v4572_v0 = vld [vmem:[%s8207_s13] ss:$0 sm:$0xff] }
 0x5d6   :  { %5209 = vmatprep.subr.bf16.mxu0 %v5333_v12 }
 0x5d7   :  { %1968 = vmatpush1.bf16.msra.mxu1 %v5330_v20 }
 0x5d8   :  { %2673 = vmatprep.subr.mxu1 %v6691_v23 }
 0x5d9   :  { %5210 = vmatpush3.bf16.msra.mxu0 %v5333_v12 }
 0x67c   :  { %v5189_v24 = vpop.f32.mrf.mxu0 }
 0x67d   :  { %v1754_v25 = vadd.f32 %v5189_v24, %v4572_v0 }
 0x67e   :  { %v1745_v22 = vpop.f32.mrf.mxu0 }
 0x67f   :  { %v1746_v2 = vadd.f32 %v4572_v0, %v1745_v22  ;;  %v1810_v12 = vmax.f32 %v1754_v25, 0.0 }
 0x680   :  { %v5190_v37 = vpop.f32.mrf.mxu0 }
 0x681   :  { %v1757_v19 = vadd.f32 %v5190_v37, %v4572_v0  ;;  %v1808_v20 = vmax.f32 %v1746_v2, 0.0 }
 0x682   :  { %v1748_v3 = vpop.f32.mrf.mxu0 }
 0x683   :  { %v1749_v21 = vadd.f32 %v4572_v0, %v1748_v3  ;;  %v1811_v7 = vmax.f32 %v1757_v19, 0.0  ;;  %v8424_v3 = vmov 0  }
 0x684   :  { %v5193_v58 = vpop.f32.mrf.mxu0 }
 0x685   :  { %v1809_v51 = vmax.f32 %v1749_v21, 0.0  ;;  %v1841_v18 = vpack.c.bf16 %v1811_v7, %v1810_v12  ;;  %v1770_v22 = vadd.f32 %v5193_v58, %v4572_v0 }
 0x686   :  { %v1761_v54 = vpop.f32.mrf.mxu0 }
 0x687   :  { %v1840_v63 = vpack.c.bf16 %v1809_v51, %v1808_v20  ;;  %v1762_v53 = vadd.f32 %v4572_v0, %v1761_v54  ;;  %v1814_v51 = vmax.f32 %v1770_v22, 0.0 }
 0x688   :  { %v5194_v1 = vpop.f32.mrf.mxu0 }
 0x689   :  { %v1773_v60 = vadd.f32 %v5194_v1, %v4572_v0  ;;  %4597 = vmatmul.mubr.msk.bf16.vlgmr.msra.gmra.mxu1 %vm304_vm1, %v1840_v63  ;;  %5211 = vmatprep.mubr.msk.bf16.mxu0 %vm304_vm1, %v1840_v63  ;;  %v1812_v25 = vmax.f32 %v1762_v53, 0.0 }
 0x68a   :  { %v1764_v37 = vpop.f32.mrf.mxu0  ;;  %5212 = vmatmul.mubr.msk.bf16.vlgmr.msra.gmra.mxu0 %vm304_vm1, %v1841_v18  ;;  %1995 = vmatprep.mubr.bf16.mxu1 %v8424_v3 }
 0x68b   :  { %v1765_v19 = vadd.f32 %v4572_v0, %v1764_v37  ;;  %v1815_v2 = vmax.f32 %v1773_v60, 0.0 }
 0x68c   :  { %v5197_v21 = vpop.f32.mrf.mxu0 }
 0x68d   :  { %v1813_v24 = vmax.f32 %v1765_v19, 0.0  ;;  %v1843_v54 = vpack.c.bf16 %v1815_v2, %v1814_v51  ;;  %v1786_v63 = vadd.f32 %v5197_v21, %v4572_v0 }
 0x68e   :  { %v1777_v7 = vpop.f32.mrf.mxu0 }
 0x68f   :  { %v1842_v20 = vpack.c.bf16 %v1813_v24, %v1812_v25  ;;  %v1778_v12 = vadd.f32 %v4572_v0, %v1777_v7  ;;  %v1818_v25 = vmax.f32 %v1786_v63, 0.0 }
 0x690   :  { %v5198_v1 = vpop.f32.mrf.mxu0 }
 0x691   :  { %v1789_v55 = vadd.f32 %v5198_v1, %v4572_v0  ;;  %4598 = vmatmul.mubr.msk.bf16.gmra.mxu1 %vm304_vm1, %v1841_v18  ;;  %5215 = vmatprep.mubr.msk.bf16.mxu0 %vm304_vm1, %v1842_v20  ;;  %v1816_v22 = vmax.f32 %v1778_v12, 0.0 }
 0x692   :  { %v1780_v58 = vpop.f32.mrf.mxu0  ;;  %5216 = vmatmul.mubr.msk.bf16.gmra.mxu0 %vm304_vm1, %v1843_v54  ;;  %2005 = vmatprep.mubr.bf16.mxu1 %v8424_v3 }
 0x693   :  { %v1781_v60 = vadd.f32 %v4572_v0, %v1780_v58  ;;  %v1819_v53 = vmax.f32 %v1789_v55, 0.0 }
 0x694   :  { %v5201_v37 = vpop.f32.mrf.mxu0 }
 0x695   :  { %v1817_v19 = vmax.f32 %v1781_v60, 0.0  ;;  %v1845_v51 = vpack.c.bf16 %v1819_v53, %v1818_v25  ;;  %v1802_v21 = vadd.f32 %v5201_v37, %v4572_v0 }
 0x696   :  { %v1793_v2 = vpop.f32.mrf.mxu0 }
 0x697   :  { %v1844_v24 = vpack.c.bf16 %v1817_v19, %v1816_v22  ;;  %v1794_v1 = vadd.f32 %v4572_v0, %v1793_v2  ;;  %v1822_v60 = vmax.f32 %v1802_v21, 0.0 }
 0x698   :  { %v5202_v7 = vpop.f32.mrf.mxu0 }
 0x699   :  { %v1805_v18 = vadd.f32 %v5202_v7, %v4572_v0  ;;  %4599 = vmatmul.mubr.msk.bf16.gmra.mxu1 %vm304_vm1, %v1842_v20  ;;  %5219 = vmatprep.mubr.msk.bf16.mxu0 %vm304_vm1, %v1844_v24  ;;  %v1820_v58 = vmax.f32 %v1794_v1, 0.0 }
 0x69a   :  { %v1796_v62 = vpop.f32.mrf.mxu0  ;;  %5220 = vmatmul.mubr.msk.bf16.gmra.mxu0 %vm304_vm1, %v1845_v51  ;;  %2015 = vmatprep.mubr.bf16.mxu1 %v8424_v3 }
 0x69b   :  { %v1797_v55 = vadd.f32 %v4572_v0, %v1796_v62  ;;  %v1823_v12 = vmax.f32 %v1805_v18, 0.0  ;;  %v1850_v62 = vlaneseq }
 0x69d   :  { %v1821_v63 = vmax.f32 %v1797_v55, 0.0  ;;  %v1847_v53 = vpack.c.bf16 %v1823_v12, %v1822_v60  ;;  %v6315_v0 = vshrl.u32 %v1850_v62, 7 }
 0x69f   :  { %v1846_v22 = vpack.c.bf16 %v1821_v63, %v1820_v58  ;;  %8425 = vst [vmem:[#allocation49_spill] sm:$0xff] %v6315_v0  ;;  %v8245_v20 = vsub.s32 2, %v6315_v0  ;;  %v8244_v37 = vsub.s32 0, %v6315_v0  ;;  %v8243_v19 = vsub.s32 1, %v6315_v0 }
 0x6a1   :  { %4600 = vmatmul.mubr.msk.bf16.gmra.mxu1 %vm304_vm1, %v1843_v54  ;;  %5223 = vmatprep.mubr.msk.bf16.mxu0 %vm304_vm1, %v1846_v22  ;;  %v1848_v54 = vld [vmem:[%s8208_s15] sm:$0x7] }
 0x6a2   :  { %5224 = vmatmul.mubr.msk.bf16.gmra.mxu0 %vm304_vm1, %v1847_v53  ;;  %2025 = vmatprep.mubr.bf16.mxu1 %v8424_v3  ;;  %v6325_v25 = vrot.slane %v1848_v54, %v8245_v20  ;;  %v6329_v2 = vrot.slane %v1848_v54, %v8244_v37 }
 0x6a9   :  { %4601 = vmatmul.mubr.msk.bf16.gmra.mxu1 %vm304_vm1, %v1844_v24  ;;  %v6333_v24 = vrot.slane %v1848_v54, %v8243_v19 }
 0x6aa   :  { %2035 = vmatprep.mubr.bf16.mxu1 %v8424_v3 }
 0x6b1   :  { %4602 = vmatmul.mubr.msk.bf16.gmra.mxu1 %vm304_vm1, %v1845_v51 }
 0x6b2   :  { %2045 = vmatprep.mubr.bf16.mxu1 %v8424_v3 }
 0x6b9   :  { %4603 = vmatmul.mubr.msk.bf16.gmra.mxu1 %vm304_vm1, %v1846_v22 }
 0x6ba   :  { %2055 = vmatprep.mubr.bf16.mxu1 %v8424_v3 }
 0x6c1   :  { %4604 = vmatmul.mubr.msk.bf16.gmra.mxu1 %vm304_vm1, %v1847_v53 }
 0x749   :  { %v1987_v51 = vpop.f32.mrf.mxu1 }
 0x74a   :  { %v5213_v7 = vpop.f32.mrf.mxu0  ;;  %v6339_v21 = vadd.f32 %v1987_v51, %v6329_v2 }
 0x74b   :  { %v6336_v1 = vadd.f32 %v5213_v7, %v6325_v25  ;;  %v1989_v18 = vpop.f32.mrf.mxu1 }
 0x74c   :  { %8426 = vst [vmem:[#allocation50_spill] sm:$0xff] %v6339_v21  ;;  %v6342_v55 = vadd.f32 %v1989_v18, %v6333_v24  ;;  %v2100_v12 = vpop.f32.mrf.mxu0 }
 0x74d   :  { %v4793_v58 = vpack.c.bf16 %v6336_v1, %v6336_v1  ;;  %v6347_v63 = vadd.f32 %v2100_v12, %v6325_v25  ;;  %v1991_v60 = vpop.f32.mrf.mxu1 }
 0x74e   :  { %v4788_v22 = vpack.c.bf16 %v6342_v55, %v6339_v21  ;;  %v5214_v53 = vpop.f32.mrf.mxu0  ;;  %v6365_v18 = vadd.f32 %v1991_v60, %v6329_v2 }
 0x74f   :  { %2344 = vst [vmem:[%s8209_s20 + $0x38] sm:$0xf] %v4793_v58  ;;  %v4789_v62 = vpack.c.bf16 %v6347_v63, %v6347_v63  ;;  %v6357_v54 = vadd.f32 %v5214_v53, %v6325_v25  ;;  %v1993_v51 = vpop.f32.mrf.mxu1  ;;  %v2372_v7 = vsel %vm2371_vm3, %v6347_v63, -inf }
 0x750   :  { %2339 = vst [vmem:[%s8209_s20] sm:$0xff] %v4788_v22  ;;  %v6368_v12 = vadd.f32 %v1993_v51, %v6333_v24  ;;  %v2103_v58 = vpop.f32.mrf.mxu0  ;;  %v2373_v19 = vmax.f32 %v6342_v55, %v2372_v7 }
 0x751   :  { %2340 = vst [vmem:[%s8209_s20 + $0x8] sm:$0xf] %v4789_v62  ;;  %v4795_v53 = vpack.c.bf16 %v6357_v54, %v6357_v54  ;;  %v6377_v37 = vadd.f32 %v2103_v58, %v6325_v25  ;;  %v1997_v22 = vpop.f32.mrf.mxu1 }
 0x752   :  { %v4790_v60 = vpack.c.bf16 %v6368_v12, %v6365_v18  ;;  %v5217_v20 = vpop.f32.mrf.mxu0  ;;  %2374 = vmax.xlane.f32.xlu0 %v2373_v19  ;;  %v6395_v19 = vadd.f32 %v1997_v22, %v6329_v2  ;;  %v2380_v22 = vsel %vm2371_vm3, %v6336_v1, -inf }
 0x753   :  { %2346 = vst [vmem:[%s8209_s20 + $0x50] sm:$0xf] %v4795_v53  ;;  %v4791_v51 = vpack.c.bf16 %v6377_v37, %v6377_v37  ;;  %v6387_v62 = vadd.f32 %v5217_v20, %v6325_v25  ;;  %v1999_v7 = vpop.f32.mrf.mxu1  ;;  %v2376_v58 = vsel %vm2371_vm3, %v6377_v37, -inf }
 0x754   :  { %2341 = vst [vmem:[%s8209_s20 + $0x18] sm:$0xff] %v4790_v60  ;;  %8427 = vst [vmem:[#allocation51_spill] sm:$0xff] %v6395_v19  ;;  %v6398_v41 = vadd.f32 %v1999_v7, %v6333_v24  ;;  %v2116_v53 = vpop.f32.mrf.mxu0  ;;  %v2377_v50 = vmax.f32 %v6368_v12, %v2376_v58 }
 0x755   :  { %2342 = vst [vmem:[%s8209_s20 + $0x20] sm:$0xf] %v4791_v51  ;;  %v4801_v20 = vpack.c.bf16 %v6387_v62, %v6387_v62  ;;  %v6407_v44 = vadd.f32 %v2116_v53, %v6325_v25  ;;  %v2001_v60 = vpop.f32.mrf.mxu1 }
 0x756   :  { %v4792_v7 = vpack.c.bf16 %v6398_v41, %v6395_v19  ;;  %v5218_v52 = vpop.f32.mrf.mxu0  ;;  %2378 = vmax.xlane.f32.xlu0 %v2377_v50  ;;  %v2381_v58 = vmax.f32 %v6398_v41, %v2380_v22  ;;  %v6426_v45 = vadd.f32 %v2001_v60, %v6329_v2  ;;  %v2384_v60 = vsel %vm2371_vm3, %v6357_v54, -inf }
 0x757   :  { %2352 = vst [vmem:[%s8209_s20 + $0x98] sm:$0xf] %v4801_v20  ;;  %v4797_v51 = vpack.c.bf16 %v6407_v44, %v6407_v44  ;;  %v6420_v53 = vadd.f32 %v5218_v52, %v6325_v25  ;;  %v2003_v31 = vpop.f32.mrf.mxu1 }
 0x758   :  { %2343 = vst [vmem:[%s8209_s20 + $0x30] sm:$0xff] %v4792_v7  ;;  %8428 = vst [vmem:[#allocation52_spill] sm:$0xff] %v6426_v45  ;;  %v6429_v50 = vadd.f32 %v2003_v31, %v6333_v24  ;;  %2382 = vmax.xlane.f32.xlu1 %v2381_v58  ;;  %v2119_v22 = vpop.f32.mrf.mxu0 }
 0x759   :  { %2348 = vst [vmem:[%s8209_s20 + $0x68] sm:$0xf] %v4797_v51  ;;  %v4803_v52 = vpack.c.bf16 %v6420_v53, %v6420_v53  ;;  %v6437_v20 = vadd.f32 %v2119_v22, %v6325_v25  ;;  %v2007_v43 = vpop.f32.mrf.mxu1 }
 0x75a   :  { %v4794_v31 = vpack.c.bf16 %v6429_v50, %v6426_v45  ;;  %v5221_v7 = vpop.f32.mrf.mxu0  ;;  %v2385_v58 = vmax.f32 %v6429_v50, %v2384_v60  ;;  %v6456_v34 = vadd.f32 %v2007_v43, %v6329_v2  ;;  %v2388_v43 = vsel %vm2371_vm3, %v6407_v44, -inf }
 0x75b   :  { %2354 = vst [vmem:[%s8209_s20 + $0xb0] sm:$0xf] %v4803_v52  ;;  %v4799_v51 = vpack.c.bf16 %v6437_v20, %v6437_v20  ;;  %v6450_v22 = vadd.f32 %v5221_v7, %v6325_v25  ;;  %v2009_v35 = vpop.f32.mrf.mxu1 }
 0x75c   :  { %2345 = vst [vmem:[%s8209_s20 + $0x48] sm:$0xff] %v4794_v31  ;;  %8429 = vst [vmem:[#allocation53_spill] sm:$0xff] %v6456_v34  ;;  %v6459_v60 = vadd.f32 %v2009_v35, %v6333_v24  ;;  %2386 = vmax.xlane.f32.xlu1 %v2385_v58  ;;  %v2132_v33 = vpop.f32.mrf.mxu0 }
 0x75d   :  { %2350 = vst [vmem:[%s8209_s20 + $0x80] sm:$0xf] %v4799_v51  ;;  %v4809_v52 = vpack.c.bf16 %v6450_v22, %v6450_v22  ;;  %v6467_v7 = vadd.f32 %v2132_v33, %v6325_v25  ;;  %v2011_v6 = vpop.f32.mrf.mxu1 }
 0x75e   :  { %v4796_v35 = vpack.c.bf16 %v6459_v60, %v6456_v34  ;;  %v5222_v31 = vpop.f32.mrf.mxu0  ;;  %v2389_v58 = vmax.f32 %v6459_v60, %v2388_v43  ;;  %v6486_v17 = vadd.f32 %v2011_v6, %v6329_v2  ;;  %v2392_v6 = vsel %vm2371_vm3, %v6437_v20, -inf }
 0x75f   :  { %2360 = vst [vmem:[%s8209_s20 + $0xf8] sm:$0xf] %v4809_v52  ;;  %v4805_v51 = vpack.c.bf16 %v6467_v7, %v6467_v7  ;;  %v6480_v33 = vadd.f32 %v5222_v31, %v6325_v25  ;;  %v2013_v16 = vpop.f32.mrf.mxu1 }
 0x760   :  { %2347 = vst [vmem:[%s8209_s20 + $0x60] sm:$0xff] %v4796_v35  ;;  %8430 = vst [vmem:[#allocation54_spill] sm:$0xff] %v6486_v17  ;;  %v6489_v43 = vadd.f32 %v2013_v16, %v6333_v24  ;;  %v2135_v39 = vpop.f32.mrf.mxu0  ;;  %2390 = vmax.xlane.f32.xlu0 %v2389_v58 }
 0x761   :  { %2356 = vst [vmem:[%s8209_s20 + $0xc8] sm:$0xf] %v4805_v51  ;;  %v4811_v52 = vpack.c.bf16 %v6480_v33, %v6480_v33  ;;  %v6497_v31 = vadd.f32 %v2135_v39, %v6325_v25  ;;  %v2017_v14 = vpop.f32.mrf.mxu1 }
 0x762   :  { %v4798_v16 = vpack.c.bf16 %v6489_v43, %v6486_v17  ;;  %v5225_v35 = vpop.f32.mrf.mxu0  ;;  %v2393_v58 = vmax.f32 %v6489_v43, %v2392_v6  ;;  %v6516_v49 = vadd.f32 %v2017_v14, %v6329_v2  ;;  %v2396_v14 = vsel %vm2371_vm3, %v6387_v62, -inf }
 0x763   :  { %2362 = vst [vmem:[%s8209_s20 + $0x110] sm:$0xf] %v4811_v52  ;;  %v4807_v51 = vpack.c.bf16 %v6497_v31, %v6497_v31  ;;  %v6510_v39 = vadd.f32 %v5225_v35, %v6325_v25  ;;  %v2019_v32 = vpop.f32.mrf.mxu1 }
 0x764   :  { %2349 = vst [vmem:[%s8209_s20 + $0x78] sm:$0xff] %v4798_v16  ;;  %8431 = vst [vmem:[#allocation55_spill] sm:$0xff] %v6516_v49  ;;  %v6519_v6 = vadd.f32 %v2019_v32, %v6333_v24  ;;  %2394 = vmax.xlane.f32.xlu1 %v2393_v58  ;;  %v2148_v8 = vpop.f32.mrf.mxu0 }
 0x765   :  { %2358 = vst [vmem:[%s8209_s20 + $0xe0] sm:$0xf] %v4807_v51  ;;  %v4817_v52 = vpack.c.bf16 %v6510_v39, %v6510_v39  ;;  %v6527_v35 = vadd.f32 %v2148_v8, %v6325_v25  ;;  %v2021_v47 = vpop.f32.mrf.mxu1 }
 0x766   :  { %v4800_v32 = vpack.c.bf16 %v6519_v6, %v6516_v49  ;;  %v5226_v16 = vpop.f32.mrf.mxu0  ;;  %v2397_v58 = vmax.f32 %v6519_v6, %v2396_v14  ;;  %v6546_v15 = vadd.f32 %v2021_v47, %v6329_v2  ;;  %v2400_v47 = vsel %vm2371_vm3, %v6420_v53, -inf }
 0x767   :  { %2368 = vst [vmem:[%s8209_s20 + $0x158] sm:$0xf] %v4817_v52  ;;  %v4813_v51 = vpack.c.bf16 %v6527_v35, %v6527_v35  ;;  %v6540_v8 = vadd.f32 %v5226_v16, %v6325_v25  ;;  %v2023_v11 = vpop.f32.mrf.mxu1 }
 0x768   :  { %2351 = vst [vmem:[%s8209_s20 + $0x90] sm:$0xff] %v4800_v32  ;;  %8432 = vst [vmem:[#allocation56_spill] sm:$0xff] %v6546_v15  ;;  %v6549_v14 = vadd.f32 %v2023_v11, %v6333_v24  ;;  %2398 = vmax.xlane.f32.xlu0 %v2397_v58  ;;  %v2151_v28 = vpop.f32.mrf.mxu0 }
 0x769   :  { %2364 = vst [vmem:[%s8209_s20 + $0x128] sm:$0xf] %v4813_v51  ;;  %v4819_v52 = vpack.c.bf16 %v6540_v8, %v6540_v8  ;;  %v6557_v16 = vadd.f32 %v2151_v28, %v6325_v25  ;;  %v2027_v9 = vpop.f32.mrf.mxu1 }
 0x76a   :  { %v4802_v11 = vpack.c.bf16 %v6549_v14, %v6546_v15  ;;  %v2401_v32 = vmax.f32 %v6549_v14, %v2400_v47  ;;  %v6573_v28 = vadd.f32 %v2027_v9, %v6329_v2  ;;  %v2404_v47 = vsel %vm2371_vm3, %v6467_v7, -inf }
 0x76b   :  { %2370 = vst [vmem:[%s8209_s20 + $0x170] sm:$0xf] %v4819_v52  ;;  %v4815_v58 = vpack.c.bf16 %v6557_v16, %v6557_v16  ;;  %v2029_v51 = vpop.f32.mrf.mxu1 }
 0x76c   :  { %2353 = vst [vmem:[%s8209_s20 + $0xa8] sm:$0xff] %v4802_v11  ;;  %8433 = vst [vmem:[#allocation57_spill] sm:$0xff] %v6573_v28  ;;  %v6576_v25 = vadd.f32 %v2029_v51, %v6333_v24  ;;  %2402 = vmax.xlane.f32.xlu1 %v2401_v32  ;;  %v2408_v51 = vsel %vm2371_vm3, %v6497_v31, -inf }
 0x76d   :  { %2366 = vst [vmem:[%s8209_s20 + $0x140] sm:$0xf] %v4815_v58  ;;  %v2031_v52 = vpop.f32.mrf.mxu1 }
 0x76e   :  { %v4804_v46 = vpack.c.bf16 %v6576_v25, %v6573_v28  ;;  %v2405_v11 = vmax.f32 %v6576_v25, %v2404_v47  ;;  %v6590_v9 = vadd.f32 %v2031_v52, %v6329_v2 }
 0x76f   :  { %v2033_v30 = vpop.f32.mrf.mxu1 }
 0x770   :  { %2355 = vst [vmem:[%s8209_s20 + $0xc0] sm:$0xff] %v4804_v46  ;;  %8434 = vst [vmem:[#allocation58_spill] sm:$0xff] %v6590_v9  ;;  %v6593_v32 = vadd.f32 %v2033_v30, %v6333_v24  ;;  %2406 = vmax.xlane.f32.xlu0 %v2405_v11  ;;  %v2412_v11 = vsel %vm2371_vm3, %v6450_v22, -inf }
 0x771   :  { %v2037_v58 = vpop.f32.mrf.mxu1 }
 0x772   :  { %v4806_v36 = vpack.c.bf16 %v6593_v32, %v6590_v9  ;;  %v2409_v47 = vmax.f32 %v6593_v32, %v2408_v51  ;;  %v6604_v46 = vadd.f32 %v2037_v58, %v6329_v2 }
 0x773   :  { %v2039_v0 = vpop.f32.mrf.mxu1 }
 0x774   :  { %2357 = vst [vmem:[%s8209_s20 + $0xd8] sm:$0xff] %v4806_v36  ;;  %8435 = vst [vmem:[#allocation59_spill] sm:$0xff] %v6604_v46  ;;  %v6607_v30 = vadd.f32 %v2039_v0, %v6333_v24  ;;  %2410 = vmax.xlane.f32.xlu1 %v2409_v47  ;;  %v2416_v47 = vsel %vm2371_vm3, %v6480_v33, -inf }
 0x775   :  { %v2041_v52 = vpop.f32.mrf.mxu1 }
 0x776   :  { %v4808_v3 = vpack.c.bf16 %v6607_v30, %v6604_v46  ;;  %v2413_v51 = vmax.f32 %v6607_v30, %v2412_v11  ;;  %v6618_v36 = vadd.f32 %v2041_v52, %v6329_v2 }
 0x777   :  { %v2043_v26 = vpop.f32.mrf.mxu1 }
 0x778   :  { %2359 = vst [vmem:[%s8209_s20 + $0xf0] sm:$0xff] %v4808_v3  ;;  %8436 = vst [vmem:[#allocation60_spill] sm:$0xff] %v6618_v36  ;;  %v6621_v0 = vadd.f32 %v2043_v26, %v6333_v24  ;;  %2414 = vmax.xlane.f32.xlu0 %v2413_v51  ;;  %v2420_v51 = vsel %vm2371_vm3, %v6527_v35, -inf }
 0x779   :  { %v2047_v58 = vpop.f32.mrf.mxu1 }
 0x77a   :  { %v4810_v4 = vpack.c.bf16 %v6621_v0, %v6618_v36  ;;  %v2417_v11 = vmax.f32 %v6621_v0, %v2416_v47  ;;  %v6632_v3 = vadd.f32 %v2047_v58, %v6329_v2 }
 0x77b   :  { %v2049_v56 = vpop.f32.mrf.mxu1 }
 0x77c   :  { %2361 = vst [vmem:[%s8209_s20 + $0x108] sm:$0xff] %v4810_v4  ;;  %8437 = vst [vmem:[#allocation61_spill] sm:$0xff] %v6632_v3  ;;  %v6635_v26 = vadd.f32 %v2049_v56, %v6333_v24  ;;  %2418 = vmax.xlane.f32.xlu1 %v2417_v11  ;;  %v2424_v11 = vsel %vm2371_vm3, %v6557_v16, -inf }
 0x77d   :  { %v2051_v52 = vpop.f32.mrf.mxu1 }
 0x77e   :  { %v4812_v46 = vpack.c.bf16 %v6635_v26, %v6632_v3  ;;  %v2421_v47 = vmax.f32 %v6635_v26, %v2420_v51  ;;  %v6646_v4 = vadd.f32 %v2051_v52, %v6329_v2 }
 0x77f   :  { %v2053_v10 = vpop.f32.mrf.mxu1 }
 0x780   :  { %2363 = vst [vmem:[%s8209_s20 + $0x120] sm:$0xff] %v4812_v46  ;;  %8438 = vst [vmem:[#allocation62_spill] sm:$0xff] %v6646_v4  ;;  %v6649_v56 = vadd.f32 %v2053_v10, %v6333_v24  ;;  %2422 = vmax.xlane.f32.xlu0 %v2421_v47  ;;  %v2428_v47 = vsel %vm2371_vm3, %v6510_v39, -inf }
 0x781   :  { %v2057_v58 = vpop.f32.mrf.mxu1 }
 0x782   :  { %v4814_v3 = vpack.c.bf16 %v6649_v56, %v6646_v4  ;;  %v2425_v51 = vmax.f32 %v6649_v56, %v2424_v11  ;;  %v6660_v46 = vadd.f32 %v2057_v58, %v6329_v2  ;;  %v2432_v58 = vsel %vm2371_vm3, %v6540_v8, -inf }
 0x783   :  { %v2059_v59 = vpop.f32.mrf.mxu1 }
 0x784   :  { %2365 = vst [vmem:[%s8209_s20 + $0x138] sm:$0xff] %v4814_v3  ;;  %8439 = vst [vmem:[#allocation63_spill] sm:$0xff] %v6660_v46  ;;  %v6663_v10 = vadd.f32 %v2059_v59, %v6333_v24  ;;  %2426 = vmax.xlane.f32.xlu1 %v2425_v51 }
 0x785   :  { %v2061_v52 = vpop.f32.mrf.mxu1 }
 0x786   :  { %v4816_v4 = vpack.c.bf16 %v6663_v10, %v6660_v46  ;;  %v2429_v11 = vmax.f32 %v6663_v10, %v2428_v47  ;;  %v6674_v3 = vadd.f32 %v2061_v52, %v6329_v2 }
 0x787   :  { %v2063_v36 = vpop.f32.mrf.mxu1 }
 0x788   :  { %2367 = vst [vmem:[%s8209_s20 + $0x150] sm:$0xff] %v4816_v4  ;;  %8440 = vst [vmem:[#allocation64_spill] sm:$0xff] %v6674_v3  ;;  %v6677_v59 = vadd.f32 %v2063_v36, %v6333_v24  ;;  %2430 = vmax.xlane.f32.xlu0 %v2429_v11  ;;  %v8295_v4 = vmov 0.0  }
 0x789   :  { %2621 = vmatprep.mubr.f32.mxu0 %v8295_v4 }
 0x78a   :  { %v4818_v51 = vpack.c.bf16 %v6677_v59, %v6674_v3  ;;  %v2433_v47 = vmax.f32 %v6677_v59, %v2432_v58 }
 0x78c   :  { %2369 = vst [vmem:[%s8209_s20 + $0x168] sm:$0xff] %v4818_v51  ;;  %2434 = vmax.xlane.f32.xlu1 %v2433_v47 }
 0x7db   :  { %v2375_v2 = vpop.xlane.xlu0 %2374 }
 0x7df   :  { %v2379_v36 = vpop.xlane.xlu0 %2378 }
 0x7e1   :  { %v2383_v24 = vpop.xlane.xlu1 %2382 }
 0x7e5   :  { %v2387_v52 = vpop.xlane.xlu1 %2386 }
 0x7e9   :  { %v2391_v11 = vpop.xlane.xlu0 %2390 }
 0x7ea   :  { %v2436_v40 = vmax.f32 %v2375_v2, %v2391_v11  ;;  %v6815_v11 = vld [vmem:[%s8210_s17 + $0x50] sm:$0xff] }
 0x7eb   :  { %8443 = vst [vmem:[#allocation67_spill] sm:$0xff] %v6815_v11 }
 0x7ed   :  { %v2395_v46 = vpop.xlane.xlu1 %2394 }
 0x7ee   :  { %v2437_v13 = vmax.f32 %v2379_v36, %v2395_v46  ;;  %v6779_v46 = vld [vmem:[%s8210_s17 + $0x80] sm:$0xff] }
 0x7ef   :  { %v6803_v36 = vld [vmem:[%s8210_s17 + $0x60] sm:$0xff] }
 0x7f0   :  { %8441 = vst [vmem:[#allocation65_spill] sm:$0xff] %v6803_v36 }
 0x7f1   :  { %v2399_v48 = vpop.xlane.xlu0 %2398 }
 0x7f2   :  { %v2438_v51 = vmax.f32 %v2383_v24, %v2399_v48  ;;  %v6696_v48 = vld [vmem:[%s8210_s17 + $0xf0] sm:$0xff]  ;;  %v6797_v24 = vld [vmem:[%s8210_s17 + $0x68] sm:$0xff] }
 0x7f3   :  { %2674 = vmatpush1.msra.mxu1 %v6696_v48 }
 0x7f5   :  { %v2403_v28 = vpop.xlane.xlu1 %2402 }
 0x7f6   :  { %v2439_v47 = vmax.f32 %v2387_v52, %v2403_v28  ;;  %v6809_v52 = vld [vmem:[%s8210_s17 + $0x58] sm:$0xff] }
 0x7f7   :  { %8442 = vst [vmem:[#allocation66_spill] sm:$0xff] %v6809_v52 }
 0x7f9   :  { %v2407_v27 = vpop.xlane.xlu0 %2406 }
 0x7fa   :  { %v2440_v61 = vmax.f32 %v2436_v40, %v2407_v27  ;;  %v6737_v40 = vld [vmem:[%s8210_s17 + $0xb8] sm:$0xff]  ;;  %v6749_v27 = vld [vmem:[%s8210_s17 + $0xa8] sm:$0xff] }
 0x7fd   :  { %v2411_v3 = vpop.xlane.xlu1 %2410 }
 0x7fe   :  { %v2441_v4 = vmax.f32 %v2437_v13, %v2411_v3  ;;  %v6755_v13 = vld [vmem:[%s8210_s17 + $0xa0] sm:$0xff]  ;;  %v6785_v3 = vld [vmem:[%s8210_s17 + $0x78] sm:$0xff] }
 0x801   :  { %v2415_v49 = vpop.xlane.xlu0 %2414 }
 0x802   :  { %v2442_v34 = vmax.f32 %v2438_v51, %v2415_v49  ;;  %v6701_v49 = vld [vmem:[%s8210_s17 + $0xe8] sm:$0xff] }
 0x803   :  { %2675 = vmatprep.subr.mxu1 %v6701_v49  ;;  %v6821_v51 = vld [vmem:[%s8210_s17 + $0x48] sm:$0xff] }
 0x804   :  { %8444 = vst [vmem:[#allocation68_spill] sm:$0xff] %v6821_v51 }
 0x805   :  { %v2419_v58 = vpop.xlane.xlu1 %2418 }
 0x806   :  { %v2443_v29 = vmax.f32 %v2439_v47, %v2419_v58  ;;  %v6827_v47 = vld [vmem:[%s8210_s17 + $0x40] sm:$0xff] }
 0x807   :  { %8445 = vst [vmem:[#allocation69_spill] sm:$0xff] %v6827_v47 }
 0x809   :  { %v2423_v38 = vpop.xlane.xlu0 %2422 }
 0x80a   :  { %v2444_v42 = vmax.f32 %v2440_v61, %v2423_v38  ;;  %v6719_v61 = vld [vmem:[%s8210_s17 + $0xd0] sm:$0xff] }
 0x80b   :  { %v6743_v38 = vld [vmem:[%s8210_s17 + $0xb0] sm:$0xff] }
 0x80d   :  { %v2427_v9 = vpop.xlane.xlu1 %2426 }
 0x80e   :  { %v2445_v17 = vmax.f32 %v2441_v4, %v2427_v9  ;;  %v6773_v9 = vld [vmem:[%s8210_s17 + $0x88] sm:$0xff]  ;;  %v6791_v4 = vld [vmem:[%s8210_s17 + $0x70] sm:$0xff] }
 0x811   :  { %v2431_v15 = vpop.xlane.xlu0 %2430 }
 0x812   :  { %v2446_v57 = vmax.f32 %v2442_v34, %v2431_v15  ;;  %v6707_v34 = vld [vmem:[%s8210_s17 + $0xe0] sm:$0xff]  ;;  %v6713_v15 = vld [vmem:[%s8210_s17 + $0xd8] sm:$0xff] }
 0x813   :  { %2676 = vmatpush1.msra.mxu1 %v6707_v34 }
 0x814   :  { %2677 = vmatprep.subr.mxu1 %v6713_v15 }
 0x815   :  { %v2435_v19 = vpop.xlane.xlu1 %2434  ;;  %2678 = vmatpush1.msra.mxu1 %v6719_v61 }
 0x816   :  { %v2447_v45 = vmax.f32 %v2443_v29, %v2435_v19  ;;  %v6767_v19 = vld [vmem:[%s8210_s17 + $0x90] sm:$0xff] }
 0x818   :  { %v2449_v21 = vmax.f32 %v2446_v57, %v2447_v45  ;;  %v2448_v45 = vmax.f32 %v2444_v42, %v2445_v17  ;;  %v6725_v17 = vld [vmem:[%s8210_s17 + $0xc8] sm:$0xff]  ;;  %v6731_v42 = vld [vmem:[%s8210_s17 + $0xc0] sm:$0xff] }
 0x819   :  { %2679 = vmatprep.subr.mxu1 %v6725_v17 }
 0x81a   :  { %v2450_v29 = vmax.f32 %v2448_v45, %v2449_v21  ;;  %2680 = vmatpush1.msra.mxu1 %v6731_v42  ;;  %v6761_v21 = vld [vmem:[%s8210_s17 + $0x98] sm:$0xff] }
 0x81b   :  { %2681 = vmatprep.subr.mxu1 %v6737_v40  ;;  %v6833_v45 = vld [vmem:[%s8210_s17 + $0x38] sm:$0xff] }
 0x81c   :  { %v2451_v57 = vrot.slane %v2450_v29, 4  ;;  %2682 = vmatpush1.msra.mxu1 %v6743_v38  ;;  %8446 = vst [vmem:[#allocation70_spill] sm:$0xff] %v6833_v45 }
 0x81d   :  { %2683 = vmatprep.subr.mxu1 %v6749_v27 }
 0x81e   :  { %v2452_v28 = vmax.f32 %v2450_v29, %v2451_v57  ;;  %2684 = vmatpush1.msra.mxu1 %v6755_v13  ;;  %v6839_v29 = vld [vmem:[%s8210_s17 + $0x30] sm:$0xff] }
 0x81f   :  { %2685 = vmatprep.subr.mxu1 %v6761_v21  ;;  %8447 = vst [vmem:[#allocation71_spill] sm:$0xff] %v6839_v29 }
 0x820   :  { %2686 = vmatpush1.msra.mxu1 %v6767_v19  ;;  %v2453_v2 = vrot.slane %v2452_v28, 2 }
 0x821   :  { %2687 = vmatprep.subr.mxu1 %v6773_v9 }
 0x822   :  { %2688 = vmatpush1.msra.mxu1 %v6779_v46  ;;  %v2454_v58 = vmax.f32 %v2452_v28, %v2453_v2  ;;  %v6845_v28 = vld [vmem:[%s8210_s17 + $0x28] sm:$0xff]  ;;  %v6851_v2 = vld [vmem:[%s8210_s17 + $0x20] sm:$0xff] }
 0x823   :  { %2689 = vmatprep.subr.mxu1 %v6785_v3  ;;  %8448 = vst [vmem:[#allocation72_spill] sm:$0xff] %v6845_v28  ;;  %8449 = vst [vmem:[#allocation73_spill] sm:$0xff] %v6851_v2 }
 0x824   :  { %2690 = vmatpush1.msra.mxu1 %v6791_v4  ;;  %v2455_v57 = vrot.slane %v2454_v58, 1 }
 0x825   :  { %2691 = vmatprep.subr.mxu1 %v6797_v24 }
 0x826   :  { %2692 = vmatpush1.msra.mxu1 %v6803_v36 }
 0x827   :  { %2693 = vmatprep.subr.mxu1 %v6809_v52 }
 0x828   :  { %2694 = vmatpush1.msra.mxu1 %v6815_v11 }
 0x829   :  { %2695 = vmatprep.subr.mxu1 %v6821_v51  ;;  %v6857_v51 = vld [vmem:[%s8210_s17 + $0x18] sm:$0xff] }
 0x82a   :  { %2696 = vmatpush1.msra.mxu1 %v6827_v47  ;;  %8450 = vst [vmem:[#allocation74_spill] sm:$0xff] %v6857_v51  ;;  %v6863_v47 = vld [vmem:[%s8210_s17 + $0x10] sm:$0xff] }
 0x82b   :  { %2697 = vmatprep.subr.mxu1 %v6833_v45  ;;  %8451 = vst [vmem:[#allocation75_spill] sm:$0xff] %v6863_v47  ;;  %v6865_v45 = vmax.f32 %v2454_v58, %v2455_v57  ;;  %v6883_v58 = vld [vmem:[%s8210_s17 + $0x148] sm:$0xff]  ;;  %v6889_v57 = vld [vmem:[%s8210_s17 + $0x140] sm:$0xff] }
 0x82c   :  { %2698 = vmatpush1.msra.mxu1 %v6839_v29  ;;  %v6871_v29 = vld [vmem:[%s8210_s17 + $0x8] sm:$0xff]  ;;  %8454 = vst [vmem:[#allocation78_spill] sm:$0xff] %v6883_v58  ;;  %8455 = vst [vmem:[#allocation79_spill] sm:$0xff] %v6889_v57 }
 0x82d   :  { %2699 = vmatprep.subr.mxu1 %v6845_v28  ;;  %8452 = vst [vmem:[#allocation76_spill] sm:$0xff] %v6871_v29  ;;  %v6877_v28 = vld [vmem:[%s8210_s17] sm:$0xff]  ;;  %v2467_v52 = vsub.f32 %v6489_v43, %v6865_v45  ;;  %v2463_v43 = vsub.f32 %v6429_v50, %v6865_v45 }
 0x82e   :  { %2700 = vmatpush1.msra.mxu1 %v6851_v2  ;;  %8453 = vst [vmem:[#allocation77_spill] sm:$0xff] %v6877_v28  ;;  %v2472_v2 = vsub.f32 %v6420_v53, %v6865_v45  ;;  %v6919_v53 = vld [vmem:[%s8210_s17 + $0x120] sm:$0xff] }
 0x82f   :  { %2701 = vmatprep.subr.mxu1 %v6857_v51  ;;  %v2471_v51 = vsub.f32 %v6549_v14, %v6865_v45  ;;  %v6911_v14 = vld [vmem:[%s8210_s17 + $0x128] sm:$0xff]  ;;  %8458 = vst [vmem:[#allocation82_spill] sm:$0xff] %v6919_v53  ;;  %v2501_v50 = vmul.f32 1.442695, %v2463_v43  ;;  %v2481_v43 = vsub.f32 %v6635_v26, %v6865_v45  ;;  %v2478_v26 = vsub.f32 %v6450_v22, %v6865_v45 }
 0x830   :  { %2702 = vmatpush1.msra.mxu1 %v6863_v47  ;;  %v6897_v47 = vld [vmem:[%s8210_s17 + $0x138] sm:$0xff]  ;;  %v2475_v22 = vsub.f32 %v6593_v32, %v6865_v45 }
 0x831   :  { %2703 = vmatprep.subr.mxu1 %v6871_v29  ;;  %8456 = vst [vmem:[#allocation80_spill] sm:$0xff] %v6897_v47  ;;  %v6905_v29 = vld [vmem:[%s8210_s17 + $0x130] sm:$0xff]  ;;  %v2517_v11 = vmul.f32 1.442695, %v2471_v51 }
 0x832   :  { %2704 = vmatpush1.msra.mxu1 %v6877_v28  ;;  %8457 = vst [vmem:[#allocation81_spill] sm:$0xff] %v6905_v29  ;;  %v2470_v28 = vsub.f32 %v6387_v62, %v6865_v45  ;;  %v2468_v62 = vsub.f32 %v6437_v20, %v6865_v45  ;;  %v2464_v20 = vsub.f32 %v6357_v54, %v6865_v45 }
 0x833   :  { %2727 = vmatprep.subr.mxu1 %v6883_v58  ;;  %v2469_v58 = vsub.f32 %v6519_v6, %v6865_v45  ;;  %v2466_v6 = vsub.f32 %v6407_v44, %v6865_v45  ;;  %5354 = vpow2.f32 %v2517_v11  ;;  %v2462_v44 = vsub.f32 %v6336_v1, %v6865_v45 }
 0x834   :  { %2728 = vmatpush2.msra.mxu1 %v6889_v57  ;;  %v6927_v57 = vld [vmem:[%s8210_s17 + $0x118] sm:$0xff]  ;;  %v2515_v51 = vmul.f32 1.442695, %v2470_v28  ;;  %v2460_v11 = vsub.f32 %v6377_v37, %v6865_v45  ;;  %v2503_v54 = vmul.f32 1.442695, %v2464_v20  ;;  %v2458_v1 = vsub.f32 %v6347_v63, %v6865_v45 }
 0x835   :  { %2729 = vmatprep.subr.mxu1 %v6897_v47  ;;  %8459 = vst [vmem:[#allocation83_spill] sm:$0xff] %v6927_v57  ;;  %v2519_v47 = vmul.f32 1.442695, %v2472_v2  ;;  %v2513_v36 = vmul.f32 1.442695, %v2469_v58  ;;  %v2488_v37 = vsub.f32 %v6540_v8, %v6865_v45  ;;  %v2486_v63 = vsub.f32 %v6510_v39, %v6865_v45 }
 0x836   :  { %2730 = vmatpush2.msra.mxu1 %v6905_v29  ;;  %v2465_v29 = vsub.f32 %v6459_v60, %v6865_v45  ;;  %v2511_v2 = vmul.f32 1.442695, %v2468_v62  ;;  %v2507_v28 = vmul.f32 1.442695, %v2466_v6  ;;  %v2484_v8 = vsub.f32 %v6557_v16, %v6865_v45 }
 0x837   :  { %2731 = vmatprep.subr.mxu1 %v6911_v14  ;;  %5356 = vpow2.f32 %v2519_v47  ;;  %v2459_v47 = vsub.f32 %v6368_v12, %v6865_v45  ;;  %v2487_v12 = vsub.f32 %v6677_v59, %v6865_v45  ;;  %v2551_v6 = vmul.f32 1.442695, %v2488_v37 }
 0x838   :  { %2732 = vmatpush2.msra.mxu1 %v6919_v53  ;;  %v2509_v53 = vmul.f32 1.442695, %v2467_v52  ;;  %5358 = vpow2.f32 %v2515_v51  ;;  %v2505_v60 = vmul.f32 1.442695, %v2465_v29  ;;  %v2499_v52 = vmul.f32 1.442695, %v2462_v44 }
 0x839   :  { %2733 = vmatprep.subr.mxu1 %v6927_v57  ;;  %v2461_v57 = vsub.f32 %v6398_v41, %v6865_v45  ;;  %5360 = vpow2.f32 %v2513_v36  ;;  %v2457_v41 = vsub.f32 %v6342_v55, %v6865_v45  ;;  %v2495_v36 = vmul.f32 1.442695, %v2460_v11 }
 0x83a   :  { %5362 = vpow2.f32 %v2511_v2  ;;  %v2493_v58 = vmul.f32 1.442695, %v2459_v47  ;;  %v2485_v55 = vsub.f32 %v6663_v10, %v6865_v45  ;;  %v2483_v59 = vsub.f32 %v6649_v56, %v6865_v45 }
 0x83b   :  { %5364 = vpow2.f32 %v2509_v53  ;;  %v2497_v29 = vmul.f32 1.442695, %v2461_v57  ;;  %v2491_v53 = vmul.f32 1.442695, %v2458_v1  ;;  %v2489_v57 = vmul.f32 1.442695, %v2457_v41 }
 0x83c   :  { %5366 = vpow2.f32 %v2507_v28  ;;  %v2549_v20 = vmul.f32 1.442695, %v2487_v12  ;;  %v2482_v39 = vsub.f32 %v6527_v35, %v6865_v45  ;;  %v2547_v2 = vmul.f32 1.442695, %v2486_v63 }
 0x83d   :  { %5368 = vpow2.f32 %v2505_v60  ;;  %v2545_v16 = vmul.f32 1.442695, %v2485_v55  ;;  %v2480_v28 = vsub.f32 %v6480_v33, %v6865_v45  ;;  %v2543_v56 = vmul.f32 1.442695, %v2484_v8 }
 0x83e   :  { %5370 = vpow2.f32 %v2503_v54  ;;  %v2479_v35 = vsub.f32 %v6621_v0, %v6865_v45  ;;  %v2541_v11 = vmul.f32 1.442695, %v2483_v59  ;;  %v2539_v47 = vmul.f32 1.442695, %v2482_v39 }
 0x83f   :  { %5372 = vpow2.f32 %v2501_v50  ;;  %v2477_v33 = vsub.f32 %v6607_v30, %v6865_v45  ;;  %v2537_v1 = vmul.f32 1.442695, %v2481_v43  ;;  %v2476_v0 = vsub.f32 %v6497_v31, %v6865_v45 }
 0x840   :  { %5374 = vpow2.f32 %v2499_v52  ;;  %v5355_v62 = vpop.eup %5354  ;;  %v2535_v41 = vmul.f32 1.442695, %v2480_v28  ;;  %v2533_v37 = vmul.f32 1.442695, %v2479_v35  ;;  %v2474_v30 = vsub.f32 %v6467_v7, %v6865_v45 }
 0x841   :  { %5376 = vpow2.f32 %v2497_v29  ;;  %v2531_v12 = vmul.f32 1.442695, %v2478_v26  ;;  %v2473_v31 = vsub.f32 %v6576_v25, %v6865_v45  ;;  %v2529_v63 = vmul.f32 1.442695, %v2477_v33  ;;  %v2553_v25 = vld [vmem:[%s8211_s16] sm:$0xff] }
 0x842   :  { %5378 = vpow2.f32 %v2495_v36  ;;  %v2527_v55 = vmul.f32 1.442695, %v2476_v0  ;;  %v2523_v7 = vmul.f32 1.442695, %v2474_v30  ;;  %v8460_v39 = vmov 0.0   ;;  %v8464_v0 = vld [vmem:[#allocation50_spill] sm:$0xff] }
 0x843   :  { %5380 = vpow2.f32 %v2493_v58 }
 0x844   :  { %v5357_v51 = vpop.eup %5356  ;;  %5382 = vpow2.f32 %v2491_v53 }
 0x845   :  { %2573 = vmatprep.subr.mxu0 %v5357_v51  ;;  %v5359_v10 = vpop.eup %5358  ;;  %5384 = vpow2.f32 %v2489_v57  ;;  %v2525_v57 = vmul.f32 1.442695, %v2475_v22  ;;  %v5336_v22 = vld [vmem:[%s8204_s12 + $0x28] sm:$0xff]  }
 0x846   :  { %2574 = vmatpush1.msra.mxu0 %v5355_v62  ;;  %v5361_v44 = vpop.eup %5360  ;;  %5386 = vpow2.f32 %v2551_v6  ;;  %v2521_v6 = vmul.f32 1.442695, %v2473_v31  ;;  %v8468_v31 = vld [vmem:[#allocation40_spill] sm:$0xff] }
 0x847   :  { %2575 = vmatprep.subr.mxu0 %v5359_v10  ;;  %v5363_v60 = vpop.eup %5362  ;;  %5388 = vpow2.f32 %v2549_v20 }
 0x848   :  { %2576 = vmatpush1.msra.mxu0 %v5361_v44  ;;  %v5365_v54 = vpop.eup %5364  ;;  %5390 = vpow2.f32 %v2547_v2 }
 0x849   :  { %2577 = vmatprep.subr.mxu0 %v5363_v60  ;;  %v5367_v50 = vpop.eup %5366  ;;  %5392 = vpow2.f32 %v2545_v16 }
 0x84a   :  { %2578 = vmatpush1.msra.mxu0 %v5365_v54  ;;  %v5369_v52 = vpop.eup %5368  ;;  %5394 = vpow2.f32 %v2543_v56  ;;  %v8461_v54 = vmax.f32 %v6167_v5, 0.0  ;;  %v5335_v5 = vld [vmem:[%s8204_s12 + $0x30] sm:$0xff]  }
 0x84b   :  { %2579 = vmatprep.subr.mxu0 %v5367_v50  ;;  %v5371_v29 = vpop.eup %5370  ;;  %5396 = vpow2.f32 %v2541_v11  ;;  %v5334_v50 = vld [vmem:[%s8204_s12 + $0x38] sm:$0xff]  }
 0x84c   :  { %2580 = vmatpush1.msra.mxu0 %v5369_v52  ;;  %v5373_v36 = vpop.eup %5372  ;;  %5398 = vpow2.f32 %v2539_v47  ;;  %v6996_v26 = vadd.f32 %v6365_v18, %v8461_v54 }
 0x84d   :  { %2581 = vmatprep.subr.mxu0 %v5371_v29  ;;  %v5375_v58 = vpop.eup %5374  ;;  %5400 = vpow2.f32 %v2537_v1  ;;  %v8462_v1 = vld [vmem:[#allocation34_spill] sm:$0xff] }
 0x84e   :  { %2582 = vmatpush1.msra.mxu0 %v5373_v36  ;;  %v5377_v53 = vpop.eup %5376  ;;  %5402 = vpow2.f32 %v2535_v41  ;;  %v8463_v52 = vmax.f32 %v8462_v1, 0.0  ;;  %v8465_v36 = vld [vmem:[#allocation35_spill] sm:$0xff] }
 0x84f   :  { %2583 = vmatprep.subr.mxu0 %v5375_v58  ;;  %v5379_v32 = vpop.eup %5378  ;;  %5404 = vpow2.f32 %v2533_v37  ;;  %v5337_v37 = vld [vmem:[%s8204_s12 + $0x20] sm:$0xff]   ;;  %v8466_v30 = vmax.f32 %v8465_v36, 0.0 }
 0x850   :  { %2584 = vmatpush1.msra.mxu0 %v5377_v53  ;;  %v5381_v62 = vpop.eup %5380  ;;  %5406 = vpow2.f32 %v2531_v12  ;;  %v7004_v41 = vadd.f32 %v8464_v0, %v8463_v52  ;;  %v8467_v12 = vld [vmem:[#allocation52_spill] sm:$0xff]  ;;  %v8470_v53 = vld [vmem:[#allocation54_spill] sm:$0xff] }
 0x851   :  { %2585 = vmatprep.subr.mxu0 %v5379_v32  ;;  %v5383_v8 = vpop.eup %5382  ;;  %5408 = vpow2.f32 %v2529_v63  ;;  %v7022_v58 = vadd.f32 %v8467_v12, %v8466_v30  ;;  %v8469_v63 = vmax.f32 %v8468_v31, 0.0  ;;  %v8471_v32 = vld [vmem:[#allocation36_spill] sm:$0xff]  ;;  %v8494_v30 = vld [vmem:[#allocation62_spill] sm:$0xff]  ;;  %v8495_v31 = vld [vmem:[#allocation43_spill] sm:$0xff] }
 0x852   :  { %2586 = vmatpush1.msra.mxu0 %v5381_v62  ;;  %v5385_v45 = vpop.eup %5384  ;;  %5410 = vpow2.f32 %v2527_v55  ;;  %v2949_v18 = vpack.c.bf16 %v6996_v26, %v7004_v41  ;;  %v8473_v62 = vld [vmem:[#allocation51_spill] sm:$0xff] }
 0x853   :  { %2587 = vmatprep.subr.mxu0 %v5383_v8  ;;  %v5387_v51 = vpop.eup %5386  ;;  %5412 = vpow2.f32 %v2525_v57  ;;  %v7027_v55 = vadd.f32 %v8470_v53, %v8469_v63  ;;  %v8472_v57 = vmax.f32 %v8471_v32, 0.0  ;;  %v8474_v8 = vld [vmem:[#allocation37_spill] sm:$0xff]  ;;  %v8496_v63 = vmax.f32 %v8495_v31, 0.0  ;;  %v8497_v53 = vld [vmem:[#allocation59_spill] sm:$0xff] }
 0x854   :  { %2588 = vmatpush1.msra.mxu0 %v5385_v45  ;;  %v5389_v59 = vpop.eup %5388  ;;  %5414 = vpow2.f32 %v2523_v7 }
 0x855   :  { %4645 = vmatmul.mubr.msk.f32.vlgmr.msra.gmra.mxu0 %vm304_vm1, %v2553_v25  ;;  %2766 = vmatprep.subr.mxu0 %v5387_v51  ;;  %v5391_v20 = vpop.eup %5390  ;;  %5416 = vpow2.f32 %v2521_v6  ;;  %v7032_v7 = vadd.f32 %v8473_v62, %v8472_v57  ;;  %v8475_v6 = vmax.f32 %v8474_v8, 0.0  ;;  %v7084_v32 = vadd.f32 %v8497_v53, %v8496_v63  ;;  %v8498_v57 = vld [vmem:[#allocation45_spill] sm:$0xff]  ;;  %v8522_v63 = vld [vmem:[#allocation80_spill] sm:$0xff] }
 0x856   :  { %2767 = vmatpush1.msra.mxu0 %v5389_v59  ;;  %2814 = vmatprep.mubr.f32.mxu0 %v8460_v39  ;;  %v5393_v2 = vpop.eup %5392  ;;  %v8499_v62 = vmax.f32 %v8498_v57, 0.0  ;;  %v8500_v8 = vld [vmem:[#allocation61_spill] sm:$0xff] }
 0x857   :  { %2768 = vmatprep.subr.mxu0 %v5391_v20  ;;  %v5395_v10 = vpop.eup %5394  ;;  %v2950_v51 = vpack.c.bf16 %v7022_v58, %v7032_v7  ;;  %v8477_v20 = vld [vmem:[#allocation38_spill] sm:$0xff] }
 0x858   :  { %2769 = vmatpush1.msra.mxu0 %v5393_v2  ;;  %v5397_v43 = vpop.eup %5396  ;;  %v8478_v2 = vmax.f32 %v8477_v20, 0.0 }
 0x859   :  { %2770 = vmatprep.subr.mxu0 %v5395_v10  ;;  %v5399_v16 = vpop.eup %5398  ;;  %v8479_v10 = vld [vmem:[#allocation56_spill] sm:$0xff] }
 0x85a   :  { %2771 = vmatpush1.msra.mxu0 %v5397_v43  ;;  %v5401_v44 = vpop.eup %5400  ;;  %v7048_v43 = vadd.f32 %v8479_v10, %v8478_v2  ;;  %v8503_v2 = vld [vmem:[#allocation64_spill] sm:$0xff] }
 0x85b   :  { %2772 = vmatprep.subr.mxu0 %v5399_v16  ;;  %v5403_v28 = vpop.eup %5402  ;;  %v8480_v16 = vld [vmem:[#allocation44_spill] sm:$0xff] }
 0x85c   :  { %2773 = vmatpush1.msra.mxu0 %v5401_v44  ;;  %v5405_v56 = vpop.eup %5404  ;;  %v8481_v44 = vmax.f32 %v8480_v16, 0.0  ;;  %v8504_v16 = vld [vmem:[#allocation47_spill] sm:$0xff] }
 0x85d   :  { %2774 = vmatprep.subr.mxu0 %v5403_v28  ;;  %v5407_v60 = vpop.eup %5406  ;;  %v8482_v28 = vld [vmem:[#allocation58_spill] sm:$0xff] }
 0x85e   :  { %2775 = vmatpush1.msra.mxu0 %v5405_v56  ;;  %v5409_v35 = vpop.eup %5408  ;;  %v7053_v56 = vadd.f32 %v8482_v28, %v8481_v44  ;;  %v8505_v44 = vmax.f32 %v8504_v16, 0.0  ;;  %v8506_v28 = vld [vmem:[#allocation63_spill] sm:$0xff] }
 0x85f   :  { %2776 = vmatprep.subr.mxu0 %v5407_v60  ;;  %v5411_v11 = vpop.eup %5410  ;;  %v8483_v60 = vld [vmem:[#allocation39_spill] sm:$0xff] }
 0x860   :  { %2777 = vmatpush1.msra.mxu0 %v5409_v35  ;;  %v5413_v47 = vpop.eup %5412  ;;  %v8484_v35 = vmax.f32 %v8483_v60, 0.0  ;;  %v7105_v60 = vadd.f32 %v8506_v28, %v8505_v44  ;;  %v8525_v16 = vld [vmem:[#allocation83_spill] sm:$0xff] }
 0x861   :  { %2778 = vmatprep.subr.mxu0 %v5411_v11  ;;  %v5415_v33 = vpop.eup %5414  ;;  %v8485_v11 = vld [vmem:[#allocation55_spill] sm:$0xff] }
 0x862   :  { %2779 = vmatpush1.msra.mxu0 %v5413_v47  ;;  %v5417_v29 = vpop.eup %5416  ;;  %v7058_v54 = vadd.f32 %v8485_v11, %v8484_v35  ;;  %v8486_v47 = vld [vmem:[#allocation41_spill] sm:$0xff]  ;;  %v7113_v11 = vld [vmem:[%s8210_s17 + $0x110] sm:$0xff] }
 0x863   :  { %2780 = vmatprep.subr.mxu0 %v5415_v33  ;;  %v8488_v33 = vld [vmem:[#allocation57_spill] sm:$0xff]  ;;  %2734 = vmatpush2.msra.mxu1 %v7113_v11 }
 0x864   :  { %2781 = vmatpush1.msra.mxu0 %v5417_v29  ;;  %v2952_v52 = vpack.c.bf16 %v7048_v43, %v7058_v54  ;;  %v8489_v29 = vld [vmem:[#allocation42_spill] sm:$0xff]  ;;  %v5344_v28 = vld [vmem:[%s8205_s14 + $0xac] ss:$12 sps:$4 sm:$0xff]  }
 0x865   :  { %4647 = vmatmul.mubr.msk.f32.vlgmr.msra.gmra.mxu0 %vm304_vm1, %v2553_v25  ;;  %5227 = vmatprep.subr.bf16.mxu0 %v5334_v50  ;;  %v8476_v25 = vld [vmem:[#allocation53_spill] sm:$0xff] }
 0x866   :  { %5228 = vmatpush3.bf16.msra.mxu0 %v5334_v50  ;;  %5235 = vmatprep.mubr.msk.bf16.mxu0 %vm304_vm1, %v2949_v18  ;;  %v7037_v45 = vadd.f32 %v8476_v25, %v8475_v6  ;;  %v8487_v50 = vmax.f32 %v8486_v47, 0.0  ;;  %v8491_v18 = vld [vmem:[#allocation60_spill] sm:$0xff]  ;;  %v7089_v6 = vadd.f32 %v8500_v8, %v8499_v62  ;;  %v7118_v47 = vld [vmem:[%s8210_s17 + $0x108] sm:$0xff]  ;;  %v8523_v62 = vld [vmem:[#allocation81_spill] sm:$0xff] }
 0x867   :  { %5229 = vmatprep.subr.bf16.mxu0 %v5335_v5  ;;  %2735 = vmatprep.subr.mxu1 %v7118_v47 }
 0x868   :  { %v2951_v59 = vpack.c.bf16 %v7027_v55, %v7037_v45  ;;  %v7063_v1 = vadd.f32 %v8488_v33, %v8487_v50  ;;  %v7125_v50 = vld [vmem:[%s8210_s17 + $0x100] sm:$0xff]  ;;  %v5338_v33 = vld [vmem:[%s8205_s14 + $0xb0] ss:$12 sps:$4 sm:$0xff]  }
 0x869   :  { %2736 = vmatpush2.msra.mxu1 %v7125_v50 }
 0x86a   :  { %5230 = vmatpush3.bf16.msra.mxu0 %v5335_v5  ;;  %v2953_v0 = vpack.c.bf16 %v7053_v56, %v7063_v1  ;;  %v8490_v5 = vmax.f32 %v8489_v29, 0.0  ;;  %2866 = vmatprep.subr.mxu1 %v6691_v23  ;;  %v5341_v23 = vld [vmem:[%s8205_s14 + $0x68] ss:$12 sps:$4 sm:$0xff]  }
 0x86b   :  { %5231 = vmatprep.subr.bf16.mxu0 %v5336_v22 }
 0x86e   :  { %5232 = vmatpush3.bf16.msra.mxu0 %v5336_v22  ;;  %v7074_v22 = vadd.f32 %v8491_v18, %v8490_v5  ;;  %v8520_v18 = vld [vmem:[#allocation78_spill] sm:$0xff] }
 0x86f   :  { %5233 = vmatprep.subr.bf16.mxu0 %v5337_v37 }
 0x870   :  { %v2954_v25 = vpack.c.bf16 %v7074_v22, %v7084_v32 }
 0x872   :  { %5234 = vmatpush3.bf16.msra.mxu0 %v5337_v37  ;;  %v8492_v37 = vld [vmem:[#allocation48_spill] sm:$0xff] }
 0x873   :  { %v8493_v36 = vmax.f32 %v8492_v37, 0.0  ;;  %5251 = vmatprep.subr.bf16.mxu0 %v5338_v33 }
 0x875   :  { %5236 = vmatmul.mubr.msk.bf16.vlgmr.msra.gmra.mxu0 %vm304_vm1, %v2950_v51  ;;  %v7079_v12 = vadd.f32 %v8494_v30, %v8493_v36  ;;  %v8521_v30 = vld [vmem:[#allocation79_spill] sm:$0xff] }
 0x876   :  { %5239 = vmatprep.mubr.msk.bf16.mxu0 %vm304_vm1, %v2951_v59  ;;  %v8501_v59 = vld [vmem:[#allocation46_spill] sm:$0xff]  ;;  %5252 = vmatpush3.bf16.msra.mxu0 %v5338_v33 }
 0x877   :  { %v2955_v51 = vpack.c.bf16 %v7079_v12, %v7089_v6  ;;  %v8502_v20 = vmax.f32 %v8501_v59, 0.0 }
 0x879   :  { %v7100_v10 = vadd.f32 %v8503_v2, %v8502_v20  ;;  %v8524_v2 = vld [vmem:[#allocation82_spill] sm:$0xff] }
 0x87b   :  { %v2956_v35 = vpack.c.bf16 %v7100_v10, %v7105_v60 }
 0x87d   :  { %5240 = vmatmul.mubr.msk.bf16.gmra.mxu0 %vm304_vm1, %v2952_v52  ;;  %v5339_v52 = vld [vmem:[%s8205_s14 + $0x98] ss:$12 sps:$4 sm:$0xff]  }
 0x87e   :  { %5243 = vmatprep.mubr.msk.bf16.mxu0 %vm304_vm1, %v2953_v0  ;;  %5253 = vmatprep.subr.bf16.mxu0 %v5339_v52  ;;  %v5340_v0 = vld [vmem:[%s8205_s14 + $0x80] ss:$12 sps:$4 sm:$0xff]  }
 0x87f   :  { %5254 = vmatpush3.bf16.msra.mxu0 %v5339_v52 }
 0x880   :  { %5255 = vmatprep.subr.bf16.mxu0 %v5340_v0 }
 0x883   :  { %5256 = vmatpush3.bf16.msra.mxu0 %v5340_v0  ;;  %v5347_v0 = vld [vmem:[%s8205_s14 + $0x94] ss:$12 sps:$4 sm:$0xff]  }
 0x884   :  { %5257 = vmatprep.subr.bf16.mxu0 %v5341_v23 }
 0x885   :  { %5244 = vmatmul.mubr.msk.bf16.gmra.mxu0 %vm304_vm1, %v2954_v25 }
 0x886   :  { %5247 = vmatprep.mubr.msk.bf16.mxu0 %vm304_vm1, %v2955_v51 }
 0x887   :  { %5258 = vmatpush3.bf16.msra.mxu0 %v5341_v23 }
 0x88d   :  { %5248 = vmatmul.mubr.msk.bf16.gmra.mxu0 %vm304_vm1, %v2956_v35 }
 0x915   :  { %v2623_v29 = vpop.f32.mrf.mxu0 }
 0x917   :  { %v2625_v5 = vpop.f32.mrf.mxu0 }
 0x918   :  { %4646 = vmatprep.mubr.msk.f32.mxu1 %vm2371_vm3, %v2625_v5 }
 0x919   :  { %2738 = vmatmul.mubr.f32.vlgmr.msra.gmra.mxu1 %v2623_v29 }
 0x91a   :  { %2867 = vmatpush1.msra.mxu1 %v6696_v48 }
 0x91b   :  { %2868 = vmatprep.subr.mxu1 %v6701_v49 }
 0x91c   :  { %2869 = vmatpush1.msra.mxu1 %v6707_v34  ;;  %v8507_v34 = vld [vmem:[#allocation65_spill] sm:$0xff] }
 0x91d   :  { %2870 = vmatprep.subr.mxu1 %v6713_v15  ;;  %v8508_v15 = vld [vmem:[#allocation66_spill] sm:$0xff] }
 0x91e   :  { %2871 = vmatpush1.msra.mxu1 %v6719_v61  ;;  %v8509_v61 = vld [vmem:[#allocation67_spill] sm:$0xff] }
 0x91f   :  { %2872 = vmatprep.subr.mxu1 %v6725_v17  ;;  %v8510_v17 = vld [vmem:[#allocation68_spill] sm:$0xff] }
 0x920   :  { %2873 = vmatpush1.msra.mxu1 %v6731_v42  ;;  %v8511_v42 = vld [vmem:[#allocation69_spill] sm:$0xff] }
 0x921   :  { %2874 = vmatprep.subr.mxu1 %v6737_v40  ;;  %v8512_v40 = vld [vmem:[#allocation70_spill] sm:$0xff] }
 0x922   :  { %2875 = vmatpush1.msra.mxu1 %v6743_v38  ;;  %v8513_v38 = vld [vmem:[#allocation71_spill] sm:$0xff] }
 0x923   :  { %2876 = vmatprep.subr.mxu1 %v6749_v27  ;;  %v8514_v27 = vld [vmem:[#allocation72_spill] sm:$0xff] }
 0x924   :  { %2877 = vmatpush1.msra.mxu1 %v6755_v13  ;;  %v8515_v13 = vld [vmem:[#allocation73_spill] sm:$0xff] }
 0x925   :  { %2878 = vmatprep.subr.mxu1 %v6761_v21  ;;  %v2816_v48 = vpop.f32.mrf.mxu0  ;;  %v8516_v21 = vld [vmem:[#allocation74_spill] sm:$0xff] }
 0x926   :  { %2879 = vmatpush1.msra.mxu1 %v6767_v19 }
 0x927   :  { %2880 = vmatprep.subr.mxu1 %v6773_v9  ;;  %v2818_v49 = vpop.f32.mrf.mxu0  ;;  %v8517_v9 = vld [vmem:[#allocation75_spill] sm:$0xff] }
 0x928   :  { %2881 = vmatpush1.msra.mxu1 %v6779_v46  ;;  %4648 = vmatprep.mubr.msk.f32.mxu1 %vm2371_vm3, %v2818_v49  ;;  %v8518_v46 = vld [vmem:[#allocation76_spill] sm:$0xff] }
 0x929   :  { %2882 = vmatprep.subr.mxu1 %v6785_v3 }
 0x92a   :  { %2883 = vmatpush1.msra.mxu1 %v6791_v4  ;;  %v8519_v4 = vld [vmem:[#allocation77_spill] sm:$0xff] }
 0x92b   :  { %2884 = vmatprep.subr.mxu1 %v6797_v24  ;;  %v7177_v24 = vld [vmem:[%s8207_s13 + $0x1] ss:$0 sm:$0xff] }
 0x92c   :  { %2885 = vmatpush1.msra.mxu1 %v8507_v34  ;;  %v5345_v34 = vld [vmem:[%s8205_s14 + $0x90] ss:$12 sps:$4 sm:$0xff]  }
 0x92d   :  { %2886 = vmatprep.subr.mxu1 %v8508_v15  ;;  %v8526_v15 = vmov 0  }
 0x92e   :  { %2887 = vmatpush1.msra.mxu1 %v8509_v61 }
 0x92f   :  { %2888 = vmatprep.subr.mxu1 %v8510_v17 }
 0x930   :  { %2889 = vmatpush1.msra.mxu1 %v8511_v42 }
 0x931   :  { %2890 = vmatprep.subr.mxu1 %v8512_v40 }
 0x932   :  { %2891 = vmatpush1.msra.mxu1 %v8513_v38 }
 0x933   :  { %2892 = vmatprep.subr.mxu1 %v8514_v27 }
 0x934   :  { %2893 = vmatpush1.msra.mxu1 %v8515_v13  ;;  %v5348_v13 = vld [vmem:[%s8205_s14 + $0x78] ss:$12 sps:$4 sm:$0xff]  }
 0x935   :  { %2894 = vmatprep.subr.mxu1 %v8516_v21  ;;  %v5237_v19 = vpop.f32.mrf.mxu0 }
 0x936   :  { %2895 = vmatpush1.msra.mxu1 %v8517_v9  ;;  %v3056_v57 = vadd.f32 %v5237_v19, %v7177_v24  ;;  %v5353_v19 = vld [vmem:[%s8205_s14 + $0x64] ss:$12 sps:$4 sm:$0xff]  }
 0x937   :  { %2896 = vmatprep.subr.mxu1 %v8518_v46  ;;  %v3047_v3 = vpop.f32.mrf.mxu0 }
 0x938   :  { %2897 = vmatpush1.msra.mxu1 %v8519_v4  ;;  %v3048_v36 = vadd.f32 %v7177_v24, %v3047_v3  ;;  %v3112_v35 = vmax.f32 %v3056_v57, 0.0 }
 0x939   :  { %2920 = vmatprep.subr.mxu1 %v8520_v18  ;;  %v5238_v37 = vpop.f32.mrf.mxu0 }
 0x93a   :  { %2921 = vmatpush2.msra.mxu1 %v8521_v30  ;;  %v3059_v31 = vadd.f32 %v5238_v37, %v7177_v24  ;;  %v3110_v51 = vmax.f32 %v3048_v36, 0.0  ;;  %v5351_v36 = vld [vmem:[%s8205_s14 + $0x60] ss:$12 sps:$4 sm:$0xff]  }
 0x93b   :  { %2922 = vmatprep.subr.mxu1 %v8522_v63  ;;  %v3050_v53 = vpop.f32.mrf.mxu0 }
 0x93c   :  { %2923 = vmatpush2.msra.mxu1 %v8523_v62  ;;  %v3051_v8 = vadd.f32 %v7177_v24, %v3050_v53  ;;  %v3113_v59 = vmax.f32 %v3059_v31, 0.0 }
 0x93d   :  { %2924 = vmatprep.subr.mxu1 %v6911_v14  ;;  %v5241_v25 = vpop.f32.mrf.mxu0  ;;  %v5342_v14 = vld [vmem:[%s8205_s14 + $0xa8] ss:$12 sps:$4 sm:$0xff]  }
 0x93e   :  { %v3111_v20 = vmax.f32 %v3051_v8, 0.0  ;;  %2925 = vmatpush2.msra.mxu1 %v8524_v2  ;;  %v7201_v23 = vpack.c.bf16 %v3113_v59, %v3112_v35 }
 0x93f   :  { %2926 = vmatprep.subr.mxu1 %v8525_v16  ;;  %v3063_v44 = vpop.f32.mrf.mxu0 }
 0x940   :  { %v3143_v33 = vpack.c.bf16 %v3111_v20, %v3110_v51  ;;  %2927 = vmatpush2.msra.mxu1 %v7113_v11  ;;  %v3064_v29 = vadd.f32 %v7177_v24, %v3063_v44 }
 0x941   :  { %2928 = vmatprep.subr.mxu1 %v7118_v47  ;;  %v5242_v52 = vpop.f32.mrf.mxu0  ;;  %v3072_v47 = vadd.f32 %v5241_v25, %v7177_v24 }
 0x942   :  { %2929 = vmatpush2.msra.mxu1 %v7125_v50  ;;  %v3075_v5 = vadd.f32 %v5242_v52, %v7177_v24  ;;  %5259 = vmatprep.mubr.msk.bf16.mxu0 %vm304_vm1, %v3143_v33  ;;  %v3114_v61 = vmax.f32 %v3064_v29, 0.0 }
 0x943   :  { %2931 = vmatmul.mubr.f32.vlgmr.msra.gmra.mxu1 %v2816_v48  ;;  %3265 = vmatprep.subr.bf16.mxu1 %v5344_v28  ;;  %v3066_v11 = vpop.f32.mrf.mxu0  ;;  %v5350_v48 = vld [vmem:[%s8205_s14 + $0x7c] ss:$12 sps:$4 sm:$0xff]   ;;  %v3116_v38 = vmax.f32 %v3072_v47, 0.0 }
 0x944   :  { %v3067_v49 = vadd.f32 %v7177_v24, %v3066_v11  ;;  %3266 = vmatpush1.bf16.msra.mxu1 %v5342_v14  ;;  %5260 = vmatmul.mubr.msk.bf16.vlgmr.msra.gmra.mxu0 %vm304_vm1, %v7201_v23  ;;  %v3117_v17 = vmax.f32 %v3075_v5, 0.0  ;;  %v8527_v5 = vld [vmem:[#allocation49_spill] sm:$0xff] }
 0x945   :  { %v5245_v50 = vpop.f32.mrf.mxu0  ;;  %3267 = vmatprep.subr.bf16.mxu1 %v5347_v0  ;;  %3289 = vmatprep.mubr.bf16.mxu1 %v8526_v15  ;;  %v8528_v11 = vsub.s32 2, %v8527_v5 }
 0x946   :  { %v3115_v42 = vmax.f32 %v3067_v49, 0.0  ;;  %v3146_v9 = vpack.c.bf16 %v3117_v17, %v3116_v38  ;;  %v3088_v18 = vadd.f32 %v5245_v50, %v7177_v24 }
 0x947   :  { %v3079_v40 = vpop.f32.mrf.mxu0 }
 0x948   :  { %v3145_v27 = vpack.c.bf16 %v3115_v42, %v3114_v61  ;;  %3268 = vmatpush1.bf16.msra.mxu1 %v5345_v34  ;;  %v3080_v46 = vadd.f32 %v7177_v24, %v3079_v40  ;;  %v3120_v62 = vmax.f32 %v3088_v18, 0.0 }
 0x949   :  { %v5246_v21 = vpop.f32.mrf.mxu0  ;;  %3269 = vmatprep.subr.bf16.mxu1 %v5350_v48 }
 0x94a   :  { %v3091_v3 = vadd.f32 %v5246_v21, %v7177_v24  ;;  %5263 = vmatprep.mubr.msk.bf16.mxu0 %vm304_vm1, %v3145_v27  ;;  %v3118_v31 = vmax.f32 %v3080_v46, 0.0 }
 0x94b   :  { %v3082_v4 = vpop.f32.mrf.mxu0 }
 0x94c   :  { %v3083_v37 = vadd.f32 %v7177_v24, %v3082_v4  ;;  %3270 = vmatpush1.bf16.msra.mxu1 %v5348_v13  ;;  %5264 = vmatmul.mubr.msk.bf16.gmra.mxu0 %vm304_vm1, %v3146_v9  ;;  %v3121_v63 = vmax.f32 %v3091_v3, 0.0 }
 0x94d   :  { %v5249_v30 = vpop.f32.mrf.mxu0  ;;  %3271 = vmatprep.subr.bf16.mxu1 %v5353_v19 }
 0x94e   :  { %v3119_v53 = vmax.f32 %v3083_v37, 0.0  ;;  %v3148_v51 = vpack.c.bf16 %v3121_v63, %v3120_v62  ;;  %v3104_v16 = vadd.f32 %v5249_v30, %v7177_v24  ;;  %v8529_v63 = vsub.s32 0, %v8527_v5 }
 0x94f   :  { %v3095_v57 = vpop.f32.mrf.mxu0 }
 0x950   :  { %v3147_v8 = vpack.c.bf16 %v3119_v53, %v3118_v31  ;;  %3272 = vmatpush1.bf16.msra.mxu1 %v5351_v36  ;;  %v3096_v59 = vadd.f32 %v7177_v24, %v3095_v57  ;;  %v3124_v52 = vmax.f32 %v3104_v16, 0.0  ;;  %v8530_v57 = vsub.s32 1, %v8527_v5 }
 0x951   :  { %v5250_v25 = vpop.f32.mrf.mxu0 }
 0x952   :  { %v3107_v20 = vadd.f32 %v5250_v25, %v7177_v24  ;;  %5267 = vmatprep.mubr.msk.bf16.mxu0 %vm304_vm1, %v3147_v8  ;;  %v3122_v28 = vmax.f32 %v3096_v59, 0.0 }
 0x953   :  { %4702 = vmatmul.mubr.msk.bf16.vlgmr.msra.gmra.mxu1 %vm304_vm1, %v3143_v33  ;;  %v3098_v2 = vpop.f32.mrf.mxu0 }
 0x954   :  { %v3099_v44 = vadd.f32 %v7177_v24, %v3098_v2  ;;  %5268 = vmatmul.mubr.msk.bf16.gmra.mxu0 %vm304_vm1, %v3148_v51  ;;  %3299 = vmatprep.mubr.bf16.mxu1 %v8526_v15  ;;  %v3125_v35 = vmax.f32 %v3107_v20, 0.0 }
 0x956   :  { %v3123_v14 = vmax.f32 %v3099_v44, 0.0  ;;  %v3150_v29 = vpack.c.bf16 %v3125_v35, %v3124_v52 }
 0x958   :  { %v3149_v0 = vpack.c.bf16 %v3123_v14, %v3122_v28 }
 0x95a   :  { %5271 = vmatprep.mubr.msk.bf16.mxu0 %vm304_vm1, %v3149_v0 }
 0x95b   :  { %4703 = vmatmul.mubr.msk.bf16.gmra.mxu1 %vm304_vm1, %v7201_v23  ;;  %v4689_v23 = vld [vmem:[%s8208_s15 + $0x3] sm:$0x7] }
 0x95c   :  { %5272 = vmatmul.mubr.msk.bf16.gmra.mxu0 %vm304_vm1, %v3150_v29  ;;  %3309 = vmatprep.mubr.bf16.mxu1 %v8526_v15  ;;  %v7269_v47 = vrot.slane %v4689_v23, %v8528_v11  ;;  %v7327_v53 = vrot.slane %v4689_v23, %v8529_v63  ;;  %v7331_v62 = vrot.slane %v4689_v23, %v8530_v57 }
 0x95d   :  { %3924 = vmatprep.mubr.f32.mxu0 %v8460_v39 }
 0x963   :  { %4704 = vmatmul.mubr.msk.bf16.gmra.mxu1 %vm304_vm1, %v3145_v27 }
 0x964   :  { %3319 = vmatprep.mubr.bf16.mxu1 %v8526_v15 }
 0x96b   :  { %4705 = vmatmul.mubr.msk.bf16.gmra.mxu1 %vm304_vm1, %v3146_v9 }
 0x96c   :  { %3329 = vmatprep.mubr.bf16.mxu1 %v8526_v15 }
 0x973   :  { %4706 = vmatmul.mubr.msk.bf16.gmra.mxu1 %vm304_vm1, %v3147_v8 }
 0x974   :  { %3339 = vmatprep.mubr.bf16.mxu1 %v8526_v15 }
 0x97b   :  { %4707 = vmatmul.mubr.msk.bf16.gmra.mxu1 %vm304_vm1, %v3148_v51 }
 0x97c   :  { %3349 = vmatprep.mubr.bf16.mxu1 %v8526_v15 }
 0x983   :  { %4708 = vmatmul.mubr.msk.bf16.gmra.mxu1 %vm304_vm1, %v3149_v0 }
 0x984   :  { %3359 = vmatprep.mubr.bf16.mxu1 %v8526_v15 }
 0x98b   :  { %4709 = vmatmul.mubr.msk.bf16.gmra.mxu1 %vm304_vm1, %v3150_v29 }
 0x9d9   :  { %v2739_v24 = vpop.f32.mrf.mxu1 }
 0x9da   :  { %2744 = vst [vmem:[%s8212_s21] sm:$0xff] %v2739_v24 }
 0x9db   :  { %v2741_v33 = vpop.f32.mrf.mxu1 }
 0x9dc   :  { %2745 = vst [vmem:[%s8212_s21 + $0x8] sm:$0xff] %v2741_v33 }
 0xa03   :  { %v2932_v49 = vpop.f32.mrf.mxu1 }
 0xa04   :  { %4649 = vst [vmem:[%s8212_s21 + $0x20] sm:$0xff] %v2932_v49  ;;  %v5261_v34 = vpop.f32.mrf.mxu0 }
 0xa05   :  { %v7275_v50 = vadd.f32 %v5261_v34, %v7269_v47  ;;  %v2934_v48 = vpop.f32.mrf.mxu1 }
 0xa06   :  { %4650 = vst [vmem:[%s8212_s21 + $0x28] sm:$0xff] %v2934_v48  ;;  %v3404_v15 = vpop.f32.mrf.mxu0 }
 0xa07   :  { %v4825_v61 = vpack.c.bf16 %v7275_v50, %v7275_v50  ;;  %v7283_v17 = vadd.f32 %v3404_v15, %v7269_v47 }
 0xa08   :  { %v5262_v42 = vpop.f32.mrf.mxu0 }
 0xa09   :  { %3648 = vst [vmem:[%s8209_s20 + $0x44] sm:$0xf] %v4825_v61  ;;  %v4821_v40 = vpack.c.bf16 %v7283_v17, %v7283_v17  ;;  %v7291_v38 = vadd.f32 %v5262_v42, %v7269_v47  ;;  %v3675_v29 = vsel %vm2371_vm3, %v7283_v17, -inf }
 0xa0a   :  { %v3407_v27 = vpop.f32.mrf.mxu0 }
 0xa0b   :  { %3644 = vst [vmem:[%s8209_s20 + $0x14] sm:$0xf] %v4821_v40  ;;  %v4827_v13 = vpack.c.bf16 %v7291_v38, %v7291_v38  ;;  %v7299_v21 = vadd.f32 %v3407_v27, %v7269_v47 }
 0xa0c   :  { %v5265_v19 = vpop.f32.mrf.mxu0 }
 0xa0d   :  { %3650 = vst [vmem:[%s8209_s20 + $0x5c] sm:$0xf] %v4827_v13  ;;  %v4823_v9 = vpack.c.bf16 %v7299_v21, %v7299_v21  ;;  %v7307_v46 = vadd.f32 %v5265_v19, %v7269_v47  ;;  %v3679_v27 = vsel %vm2371_vm3, %v7299_v21, -inf }
 0xa0e   :  { %v3420_v3 = vpop.f32.mrf.mxu0 }
 0xa0f   :  { %3646 = vst [vmem:[%s8209_s20 + $0x2c] sm:$0xf] %v4823_v9  ;;  %v4833_v4 = vpack.c.bf16 %v7307_v46, %v7307_v46  ;;  %v7315_v18 = vadd.f32 %v3420_v3, %v7269_v47 }
 0xa10   :  { %v5266_v37 = vpop.f32.mrf.mxu0 }
 0xa11   :  { %3656 = vst [vmem:[%s8209_s20 + $0xa4] sm:$0xf] %v4833_v4  ;;  %v4829_v36 = vpack.c.bf16 %v7315_v18, %v7315_v18  ;;  %v7323_v30 = vadd.f32 %v5266_v37, %v7269_v47 }
 0xa12   :  { %v3423_v31 = vpop.f32.mrf.mxu0 }
 0xa13   :  { %3652 = vst [vmem:[%s8209_s20 + $0x74] sm:$0xf] %v4829_v36  ;;  %v4835_v8 = vpack.c.bf16 %v7323_v30, %v7323_v30  ;;  %v7339_v25 = vadd.f32 %v3423_v31, %v7269_v47  ;;  %v3291_v51 = vpop.f32.mrf.mxu1 }
 0xa14   :  { %v5269_v59 = vpop.f32.mrf.mxu0  ;;  %v7350_v44 = vadd.f32 %v3291_v51, %v7327_v53 }
 0xa15   :  { %3658 = vst [vmem:[%s8209_s20 + $0xbc] sm:$0xf] %v4835_v8  ;;  %v4831_v20 = vpack.c.bf16 %v7339_v25, %v7339_v25  ;;  %v7347_v2 = vadd.f32 %v5269_v59, %v7269_v47  ;;  %v3293_v16 = vpop.f32.mrf.mxu1  ;;  %v3683_v59 = vsel %vm2371_vm3, %v7275_v50, -inf }
 0xa16   :  { %v7353_v28 = vadd.f32 %v3293_v16, %v7331_v62  ;;  %v3436_v35 = vpop.f32.mrf.mxu0 }
 0xa17   :  { %8531 = vst [vmem:[#allocation34_spill] sm:$0xff] %v7347_v2  ;;  %3654 = vst [vmem:[%s8209_s20 + $0x8c] sm:$0xf] %v4831_v20  ;;  %v4841_v14 = vpack.c.bf16 %v7347_v2, %v7347_v2  ;;  %v7361_v52 = vadd.f32 %v3436_v35, %v7269_v47  ;;  %v3295_v0 = vpop.f32.mrf.mxu1 }
 0xa18   :  { %v4820_v24 = vpack.c.bf16 %v7353_v28, %v7350_v44  ;;  %v5270_v33 = vpop.f32.mrf.mxu0  ;;  %v3676_v23 = vmax.f32 %v7353_v28, %v3675_v29  ;;  %v7380_v34 = vadd.f32 %v3295_v0, %v7327_v53 }
 0xa19   :  { %8532 = vst [vmem:[#allocation50_spill] sm:$0xff] %v7361_v52  ;;  %3664 = vst [vmem:[%s8209_s20 + $0x104] sm:$0xf] %v4841_v14  ;;  %v4837_v5 = vpack.c.bf16 %v7361_v52, %v7361_v52  ;;  %v7374_v11 = vadd.f32 %v5270_v33, %v7269_v47  ;;  %v3297_v49 = vpop.f32.mrf.mxu1 }
 0xa1a   :  { %3643 = vst [vmem:[%s8209_s20 + $0xc] sm:$0xff] %v4820_v24  ;;  %v7383_v48 = vadd.f32 %v3297_v49, %v7331_v62  ;;  %v3439_v15 = vpop.f32.mrf.mxu0  ;;  %3677 = vmax.xlane.f32.xlu0 %v3676_v23 }
 0xa1b   :  { %8533 = vst [vmem:[#allocation35_spill] sm:$0xff] %v7374_v11  ;;  %3660 = vst [vmem:[%s8209_s20 + $0xd4] sm:$0xf] %v4837_v5  ;;  %v4843_v61 = vpack.c.bf16 %v7374_v11, %v7374_v11  ;;  %v7391_v42 = vadd.f32 %v3439_v15, %v7269_v47  ;;  %v3301_v40 = vpop.f32.mrf.mxu1 }
 0xa1c   :  { %v4822_v13 = vpack.c.bf16 %v7383_v48, %v7380_v34  ;;  %v5273_v19 = vpop.f32.mrf.mxu0  ;;  %v3680_v9 = vmax.f32 %v7383_v48, %v3679_v27  ;;  %v7410_v36 = vadd.f32 %v3301_v40, %v7327_v53 }
 0xa1d   :  { %8534 = vst [vmem:[#allocation52_spill] sm:$0xff] %v7391_v42  ;;  %3666 = vst [vmem:[%s8209_s20 + $0x11c] sm:$0xf] %v4843_v61  ;;  %v4839_v3 = vpack.c.bf16 %v7391_v42, %v7391_v42  ;;  %v7404_v4 = vadd.f32 %v5273_v19, %v7269_v47  ;;  %v3303_v37 = vpop.f32.mrf.mxu1  ;;  %v3687_v61 = vsel %vm2371_vm3, %v7291_v38, -inf }
 0xa1e   :  { %3645 = vst [vmem:[%s8209_s20 + $0x24] sm:$0xff] %v4822_v13  ;;  %v7413_v31 = vadd.f32 %v3303_v37, %v7331_v62  ;;  %3681 = vmax.xlane.f32.xlu1 %v3680_v9  ;;  %v3452_v63 = vpop.f32.mrf.mxu0  ;;  %v3691_v37 = vsel %vm2371_vm3, %v7315_v18, -inf }
 0xa1f   :  { %3662 = vst [vmem:[%s8209_s20 + $0xec] sm:$0xf] %v4839_v3  ;;  %v4849_v57 = vpack.c.bf16 %v7404_v4, %v7404_v4  ;;  %v7421_v8 = vadd.f32 %v3452_v63, %v7269_v47  ;;  %v3305_v51 = vpop.f32.mrf.mxu1 }
 0xa20   :  { %v4824_v20 = vpack.c.bf16 %v7413_v31, %v7410_v36  ;;  %v5274_v16 = vpop.f32.mrf.mxu0  ;;  %v3684_v35 = vmax.f32 %v7413_v31, %v3683_v59  ;;  %v7440_v24 = vadd.f32 %v3305_v51, %v7327_v53 }
 0xa21   :  { %8535 = vst [vmem:[#allocation40_spill] sm:$0xff] %v7421_v8  ;;  %3672 = vst [vmem:[%s8209_s20 + $0x164] sm:$0xf] %v4849_v57  ;;  %v4845_v14 = vpack.c.bf16 %v7421_v8, %v7421_v8  ;;  %v7434_v0 = vadd.f32 %v5274_v16, %v7269_v47  ;;  %v3307_v29 = vpop.f32.mrf.mxu1 }
 0xa22   :  { %3647 = vst [vmem:[%s8209_s20 + $0x3c] sm:$0xff] %v4824_v20  ;;  %v7443_v33 = vadd.f32 %v3307_v29, %v7331_v62  ;;  %3685 = vmax.xlane.f32.xlu0 %v3684_v35  ;;  %v3455_v23 = vpop.f32.mrf.mxu0  ;;  %v3695_v35 = vsel %vm2371_vm3, %v7339_v25, -inf }
 0xa23   :  { %3668 = vst [vmem:[%s8209_s20 + $0x134] sm:$0xf] %v4845_v14  ;;  %v4851_v5 = vpack.c.bf16 %v7434_v0, %v7434_v0  ;;  %v7451_v49 = vadd.f32 %v3455_v23, %v7269_v47  ;;  %v3311_v15 = vpop.f32.mrf.mxu1 }
 0xa24   :  { %v4826_v40 = vpack.c.bf16 %v7443_v33, %v7440_v24  ;;  %v3688_v27 = vmax.f32 %v7443_v33, %v3687_v61  ;;  %v7467_v47 = vadd.f32 %v3311_v15, %v7327_v53 }
 0xa25   :  { %3674 = vst [vmem:[%s8209_s20 + $0x17c] sm:$0xf] %v4851_v5  ;;  %v4847_v13 = vpack.c.bf16 %v7451_v49, %v7451_v49  ;;  %v3313_v19 = vpop.f32.mrf.mxu1 }
 0xa26   :  { %3649 = vst [vmem:[%s8209_s20 + $0x54] sm:$0xff] %v4826_v40  ;;  %v7470_v9 = vadd.f32 %v3313_v19, %v7331_v62  ;;  %3689 = vmax.xlane.f32.xlu1 %v3688_v27  ;;  %v3699_v40 = vsel %vm2371_vm3, %v7307_v46, -inf }
 0xa27   :  { %3670 = vst [vmem:[%s8209_s20 + $0x14c] sm:$0xf] %v4847_v13  ;;  %v3315_v3 = vpop.f32.mrf.mxu1 }
 0xa28   :  { %v4828_v63 = vpack.c.bf16 %v7470_v9, %v7467_v47  ;;  %v3692_v57 = vmax.f32 %v7470_v9, %v3691_v37  ;;  %v7484_v59 = vadd.f32 %v3315_v3, %v7327_v53 }
 0xa29   :  { %v3317_v51 = vpop.f32.mrf.mxu1 }
 0xa2a   :  { %3651 = vst [vmem:[%s8209_s20 + $0x6c] sm:$0xff] %v4828_v63  ;;  %v7487_v20 = vadd.f32 %v3317_v51, %v7331_v62  ;;  %3693 = vmax.xlane.f32.xlu0 %v3692_v57  ;;  %v3703_v57 = vsel %vm2371_vm3, %v7323_v30, -inf }
 0xa2b   :  { %v3321_v16 = vpop.f32.mrf.mxu1 }
 0xa2c   :  { %v4830_v14 = vpack.c.bf16 %v7487_v20, %v7484_v59  ;;  %v3696_v29 = vmax.f32 %v7487_v20, %v3695_v35  ;;  %v7498_v5 = vadd.f32 %v3321_v16, %v7327_v53 }
 0xa2d   :  { %v3323_v23 = vpop.f32.mrf.mxu1 }
 0xa2e   :  { %3653 = vst [vmem:[%s8209_s20 + $0x84] sm:$0xff] %v4830_v14  ;;  %v7501_v15 = vadd.f32 %v3323_v23, %v7331_v62  ;;  %3697 = vmax.xlane.f32.xlu1 %v3696_v29 }
 0xa2f   :  { %v3325_v61 = vpop.f32.mrf.mxu1 }
 0xa30   :  { %v4832_v27 = vpack.c.bf16 %v7501_v15, %v7498_v5  ;;  %v3700_v13 = vmax.f32 %v7501_v15, %v3699_v40  ;;  %v7512_v3 = vadd.f32 %v3325_v61, %v7327_v53  ;;  %v3707_v61 = vsel %vm2371_vm3, %v7361_v52, -inf }
 0xa31   :  { %v3327_v19 = vpop.f32.mrf.mxu1 }
 0xa32   :  { %3655 = vst [vmem:[%s8209_s20 + $0x9c] sm:$0xff] %v4832_v27  ;;  %v7515_v37 = vadd.f32 %v3327_v19, %v7331_v62  ;;  %3701 = vmax.xlane.f32.xlu0 %v3700_v13 }
 0xa33   :  { %v3331_v63 = vpop.f32.mrf.mxu1 }
 0xa34   :  { %v4834_v51 = vpack.c.bf16 %v7515_v37, %v7512_v3  ;;  %v3704_v16 = vmax.f32 %v7515_v37, %v3703_v57  ;;  %v7526_v14 = vadd.f32 %v3331_v63, %v7327_v53 }
 0xa35   :  { %v3333_v35 = vpop.f32.mrf.mxu1 }
 0xa36   :  { %3657 = vst [vmem:[%s8209_s20 + $0xb4] sm:$0xff] %v4834_v51  ;;  %v7529_v29 = vadd.f32 %v3333_v35, %v7331_v62  ;;  %3705 = vmax.xlane.f32.xlu1 %v3704_v16  ;;  %v3711_v51 = vsel %vm2371_vm3, %v7391_v42, -inf }
 0xa37   :  { %v3335_v23 = vpop.f32.mrf.mxu1 }
 0xa38   :  { %8536 = vst [vmem:[#allocation54_spill] sm:$0xff] %v7529_v29  ;;  %v4836_v40 = vpack.c.bf16 %v7529_v29, %v7526_v14  ;;  %v3708_v27 = vmax.f32 %v7529_v29, %v3707_v61  ;;  %v7540_v19 = vadd.f32 %v3335_v23, %v7327_v53 }
 0xa39   :  { %v3337_v13 = vpop.f32.mrf.mxu1 }
 0xa3a   :  { %3659 = vst [vmem:[%s8209_s20 + $0xcc] sm:$0xff] %v4836_v40  ;;  %v7543_v63 = vadd.f32 %v3337_v13, %v7331_v62  ;;  %3709 = vmax.xlane.f32.xlu0 %v3708_v27  ;;  %v3715_v13 = vsel %vm2371_vm3, %v7347_v2, -inf }
 0xa3b   :  { %v3341_v57 = vpop.f32.mrf.mxu1 }
 0xa3c   :  { %8537 = vst [vmem:[#allocation36_spill] sm:$0xff] %v7543_v63  ;;  %v4838_v16 = vpack.c.bf16 %v7543_v63, %v7540_v19  ;;  %v3712_v35 = vmax.f32 %v7543_v63, %v3711_v51  ;;  %v7554_v23 = vadd.f32 %v3341_v57, %v7327_v53 }
 0xa3d   :  { %v3343_v61 = vpop.f32.mrf.mxu1 }
 0xa3e   :  { %3661 = vst [vmem:[%s8209_s20 + $0xe4] sm:$0xff] %v4838_v16  ;;  %v7557_v40 = vadd.f32 %v3343_v61, %v7331_v62  ;;  %3713 = vmax.xlane.f32.xlu1 %v3712_v35  ;;  %v3719_v61 = vsel %vm2371_vm3, %v7374_v11, -inf }
 0xa3f   :  { %v3345_v27 = vpop.f32.mrf.mxu1 }
 0xa40   :  { %8538 = vst [vmem:[#allocation51_spill] sm:$0xff] %v7557_v40  ;;  %v4840_v39 = vpack.c.bf16 %v7557_v40, %v7554_v23  ;;  %v3716_v51 = vmax.f32 %v7557_v40, %v3715_v13  ;;  %v7568_v57 = vadd.f32 %v3345_v27, %v7327_v53 }
 0xa41   :  { %v3347_v29 = vpop.f32.mrf.mxu1 }
 0xa42   :  { %3663 = vst [vmem:[%s8209_s20 + $0xfc] sm:$0xff] %v4840_v39  ;;  %v7571_v16 = vadd.f32 %v3347_v29, %v7331_v62  ;;  %3717 = vmax.xlane.f32.xlu0 %v3716_v51  ;;  %v3723_v51 = vsel %vm2371_vm3, %v7421_v8, -inf }
 0xa43   :  { %v3351_v35 = vpop.f32.mrf.mxu1 }
 0xa44   :  { %8539 = vst [vmem:[#allocation37_spill] sm:$0xff] %v7571_v16  ;;  %v4842_v52 = vpack.c.bf16 %v7571_v16, %v7568_v57  ;;  %v3720_v13 = vmax.f32 %v7571_v16, %v3719_v61  ;;  %v7582_v39 = vadd.f32 %v3351_v35, %v7327_v53 }
 0xa45   :  { %v3353_v63 = vpop.f32.mrf.mxu1 }
 0xa46   :  { %3665 = vst [vmem:[%s8209_s20 + $0x114] sm:$0xff] %v4842_v52  ;;  %v7585_v29 = vadd.f32 %v3353_v63, %v7331_v62  ;;  %3721 = vmax.xlane.f32.xlu1 %v3720_v13  ;;  %v3727_v13 = vsel %vm2371_vm3, %v7451_v49, -inf }
 0xa47   :  { %v3355_v27 = vpop.f32.mrf.mxu1 }
 0xa48   :  { %8540 = vst [vmem:[#allocation53_spill] sm:$0xff] %v7585_v29  ;;  %v4844_v42 = vpack.c.bf16 %v7585_v29, %v7582_v39  ;;  %v3724_v61 = vmax.f32 %v7585_v29, %v3723_v51  ;;  %v7596_v52 = vadd.f32 %v3355_v27, %v7327_v53 }
 0xa49   :  { %v3357_v40 = vpop.f32.mrf.mxu1 }
 0xa4a   :  { %3667 = vst [vmem:[%s8209_s20 + $0x12c] sm:$0xff] %v4844_v42  ;;  %v7599_v63 = vadd.f32 %v3357_v40, %v7331_v62  ;;  %3725 = vmax.xlane.f32.xlu0 %v3724_v61  ;;  %v3731_v61 = vsel %vm2371_vm3, %v7404_v4, -inf }
 0xa4b   :  { %v3361_v35 = vpop.f32.mrf.mxu1 }
 0xa4c   :  { %v4846_v2 = vpack.c.bf16 %v7599_v63, %v7596_v52  ;;  %v3728_v51 = vmax.f32 %v7599_v63, %v3727_v13  ;;  %v3362_v42 = vadd.f32 %v3361_v35, %v7327_v53 }
 0xa4d   :  { %v3363_v16 = vpop.f32.mrf.mxu1 }
 0xa4e   :  { %3669 = vst [vmem:[%s8209_s20 + $0x144] sm:$0xff] %v4846_v2  ;;  %v7611_v40 = vadd.f32 %v3363_v16, %v7331_v62  ;;  %3729 = vmax.xlane.f32.xlu1 %v3728_v51  ;;  %v3735_v16 = vsel %vm2371_vm3, %v7434_v0, -inf }
 0xa4f   :  { %v3365_v27 = vpop.f32.mrf.mxu1 }
 0xa50   :  { %8541 = vst [vmem:[#allocation38_spill] sm:$0xff] %v7611_v40  ;;  %v4848_v11 = vpack.c.bf16 %v7611_v40, %v3362_v42  ;;  %v3732_v29 = vmax.f32 %v7611_v40, %v3731_v61  ;;  %v3366_v2 = vadd.f32 %v3365_v27, %v7327_v53  ;;  %v8543_v53 = vld [vmem:[#allocation19_spill] sm:$0xff]  ;;  %v8546_v27 = vld [vmem:[#allocation18_spill] sm:$0xff]  ;;  %v8547_v61 = vld [vmem:[#allocation25_spill] sm:$0xff] }
 0xa51   :  { %v3367_v13 = vpop.f32.mrf.mxu1  ;;  %v8550_v40 = vld [vmem:[#allocation22_spill] sm:$0xff] }
 0xa52   :  { %3671 = vst [vmem:[%s8209_s20 + $0x15c] sm:$0xff] %v4848_v11  ;;  %v7622_v35 = vadd.f32 %v3367_v13, %v7331_v62  ;;  %3733 = vmax.xlane.f32.xlu0 %v3732_v29  ;;  %v8542_v11 = vld [vmem:[#allocation20_spill] sm:$0xff]  ;;  %v8544_v62 = vld [vmem:[#allocation21_spill] sm:$0xff]  ;;  %v8545_v29 = vld [vmem:[#allocation23_spill] sm:$0xff] }
 0xa53   :  { %v8548_v13 = vld [vmem:[#allocation24_spill] sm:$0xff] }
 0xa54   :  { %v4850_v51 = vpack.c.bf16 %v7622_v35, %v3366_v2  ;;  %v3736_v8 = vmax.f32 %v7622_v35, %v3735_v16  ;;  %v8549_v16 = vld [vmem:[#allocation27_spill] sm:$0xff] }
 0xa56   :  { %3673 = vst [vmem:[%s8209_s20 + $0x174] sm:$0xff] %v4850_v51  ;;  %3737 = vmax.xlane.f32.xlu1 %v3736_v8  ;;  %v8551_v8 = vld [vmem:[#allocation29_spill] sm:$0xff]  ;;  %v8552_v51 = vld [vmem:[#allocation28_spill] sm:$0xff]  ;;  %s5485_s20 = smov 64  }
 0xa67   :  { %4260 = vrot.lane.b32.xlu1 %v8542_v11, %s5484_s29  ;;  %v8553_v11 = vld [vmem:[#allocation31_spill] sm:$0xff] }
 0xa68   :  { %4258 = vrot.lane.b32.xlu0 %v8543_v53, %s5484_s29  ;;  %v8554_v53 = vld [vmem:[#allocation26_spill] sm:$0xff] }
 0xa6b   :  { %4262 = vrot.lane.b32.xlu1 %v8544_v62, %s5484_s29  ;;  %v8555_v62 = vld [vmem:[#allocation33_spill] sm:$0xff] }
 0xa6c   :  { %4266 = vrot.lane.b32.xlu0 %v8545_v29, %s5484_s29  ;;  %v3467_v29 = vadd.f32 %v7350_v44, %v7004_v41  ;;  %v3470_v41 = vadd.f32 %v7440_v24, %v7022_v58  ;;  %v3474_v58 = vadd.f32 %v7512_v3, %v7048_v43  ;;  %v3478_v43 = vadd.f32 %v7568_v57, %v7074_v22  ;;  %v7701_v22 = vld [vmem:[%s8210_s17 + $0xf0] sm:$0xff]  ;;  %v7736_v24 = vld [vmem:[%s8210_s17 + $0xc0] sm:$0xff]  ;;  %v7756_v3 = vld [vmem:[%s8210_s17 + $0xa8] sm:$0xff] }
 0xa6d   :  { %v3481_v44 = vadd.f32 %v3362_v42, %v7105_v60  ;;  %v7718_v60 = vld [vmem:[%s8210_s17 + $0xd8] sm:$0xff]  ;;  %v7790_v42 = vld [vmem:[%s8210_s17 + $0x80] sm:$0xff] }
 0xa6e   :  { %v7772_v57 = vld [vmem:[%s8210_s17 + $0x98] sm:$0xff]  ;;  %8562 = vst [vmem:[#allocation55_spill] sm:$0xff] %v7790_v42 }
 0xa6f   :  { %4264 = vrot.lane.b32.xlu1 %v8546_v27, %s5484_s29  ;;  %v8556_v27 = vld [vmem:[#allocation32_spill] sm:$0xff]  ;;  %8559 = vst [vmem:[#allocation44_spill] sm:$0xff] %v7772_v57 }
 0xa70   :  { %4270 = vrot.lane.b32.xlu0 %v8547_v61, %s5484_s29  ;;  %v8557_v61 = vld [vmem:[#allocation30_spill] sm:$0xff] }
 0xa73   :  { %4268 = vrot.lane.b32.xlu1 %v8548_v13, %s5484_s29  ;;  %v3468_v13 = vadd.f32 %v7380_v34, %v6996_v26  ;;  %v3472_v26 = vadd.f32 %v7484_v59, %v7027_v55  ;;  %v3476_v55 = vadd.f32 %v7540_v19, %v7053_v56  ;;  %v3482_v56 = vadd.f32 %v3366_v2, %v7100_v10  ;;  %v7712_v10 = vld [vmem:[%s8210_s17 + $0xe0] sm:$0xff]  ;;  %v7724_v34 = vld [vmem:[%s8210_s17 + $0xd0] sm:$0xff]  ;;  %v7744_v59 = vld [vmem:[%s8210_s17 + $0xb8] sm:$0xff] }
 0xa74   :  { %4274 = vrot.lane.b32.xlu0 %v8549_v16, %s5484_s29  ;;  %v3471_v16 = vadd.f32 %v7467_v47, %v7037_v45  ;;  %v3475_v45 = vadd.f32 %v7526_v14, %v7063_v1  ;;  %v3479_v1 = vadd.f32 %v7582_v39, %v7089_v6  ;;  %v7696_v6 = vld [vmem:[%s8210_s17 + $0xf8] sm:$0xff]  ;;  %v7762_v14 = vld [vmem:[%s8210_s17 + $0xa0] sm:$0xff]  ;;  %v7778_v39 = vld [vmem:[%s8210_s17 + $0x90] sm:$0xff] }
 0xa75   :  { %3976 = vmatprep.subr.mxu1 %v7696_v6  ;;  %8558 = vst [vmem:[#allocation56_spill] sm:$0xff] %v7762_v14  ;;  %8560 = vst [vmem:[#allocation58_spill] sm:$0xff] %v7778_v39 }
 0xa76   :  { %3977 = vmatpush1.msra.mxu1 %v7701_v22 }
 0xa77   :  { %4272 = vrot.lane.b32.xlu1 %v8550_v40, %s5484_s29  ;;  %v3469_v40 = vadd.f32 %v7410_v36, %v7032_v7  ;;  %v3473_v7 = vadd.f32 %v7498_v5, %v7058_v54  ;;  %v3477_v54 = vadd.f32 %v7554_v23, %v7084_v32  ;;  %v3480_v32 = vadd.f32 %v7596_v52, %v7079_v12  ;;  %v7706_v12 = vld [vmem:[%s8210_s17 + $0xe8] sm:$0xff]  ;;  %v7750_v5 = vld [vmem:[%s8210_s17 + $0xb0] sm:$0xff] }
 0xa78   :  { %4278 = vrot.lane.b32.xlu0 %v8551_v8, %s5484_s29  ;;  %3978 = vmatprep.subr.mxu1 %v7706_v12  ;;  %v7730_v36 = vld [vmem:[%s8210_s17 + $0xc8] sm:$0xff] }
 0xa79   :  { %3979 = vmatpush1.msra.mxu1 %v7712_v10  ;;  %v7784_v52 = vld [vmem:[%s8210_s17 + $0x88] sm:$0xff] }
 0xa7a   :  { %3980 = vmatprep.subr.mxu1 %v7718_v60  ;;  %8561 = vst [vmem:[#allocation39_spill] sm:$0xff] %v7784_v52 }
 0xa7b   :  { %4276 = vrot.lane.b32.xlu1 %v8552_v51, %s5484_s29  ;;  %3981 = vmatpush1.msra.mxu1 %v7724_v34  ;;  %v7800_v51 = vld [vmem:[%s8210_s17 + $0x78] sm:$0xff] }
 0xa7c   :  { %4282 = vrot.lane.b32.xlu0 %v8553_v11, %s5484_s29  ;;  %3982 = vmatprep.subr.mxu1 %v7730_v36  ;;  %8563 = vst [vmem:[#allocation41_spill] sm:$0xff] %v7800_v51  ;;  %v7806_v11 = vld [vmem:[%s8210_s17 + $0x70] sm:$0xff] }
 0xa7d   :  { %3983 = vmatpush1.msra.mxu1 %v7736_v24  ;;  %8564 = vst [vmem:[#allocation57_spill] sm:$0xff] %v7806_v11 }
 0xa7e   :  { %3984 = vmatprep.subr.mxu1 %v7744_v59 }
 0xa7f   :  { %4280 = vrot.lane.b32.xlu1 %v8554_v53, %s5484_s29  ;;  %3985 = vmatpush1.msra.mxu1 %v7750_v5  ;;  %v7812_v53 = vld [vmem:[%s8210_s17 + $0x68] sm:$0xff] }
 0xa80   :  { %4286 = vrot.lane.b32.xlu0 %v8555_v62, %s5484_s29  ;;  %3986 = vmatprep.subr.mxu1 %v7756_v3  ;;  %8565 = vst [vmem:[#allocation42_spill] sm:$0xff] %v7812_v53  ;;  %v7818_v62 = vld [vmem:[%s8210_s17 + $0x60] sm:$0xff] }
 0xa81   :  { %3987 = vmatpush1.msra.mxu1 %v7762_v14  ;;  %8566 = vst [vmem:[#allocation60_spill] sm:$0xff] %v7818_v62 }
 0xa82   :  { %3988 = vmatprep.subr.mxu1 %v7772_v57  ;;  %v8588_v57 = vld [vmem:[#allocation7_spill] sm:$0xff] }
 0xa83   :  { %4284 = vrot.lane.b32.xlu1 %v8556_v27, %s5484_s29  ;;  %3989 = vmatpush1.msra.mxu1 %v7778_v39 }
 0xa84   :  { %4322 = vrot.lane.b32.xlu0 %v3467_v29, %s5485_s20  ;;  %3990 = vmatprep.subr.mxu1 %v7784_v52 }
 0xa85   :  { %3991 = vmatpush1.msra.mxu1 %v7790_v42 }
 0xa86   :  { %3992 = vmatprep.subr.mxu1 %v7800_v51 }
 0xa87   :  { %4288 = vrot.lane.b32.xlu1 %v8557_v61, %s5484_s29  ;;  %3993 = vmatpush1.msra.mxu1 %v7806_v11  ;;  %v7830_v61 = vld [vmem:[%s8210_s17 + $0x50] sm:$0xff] }
 0xa88   :  { %4326 = vrot.lane.b32.xlu0 %v3469_v40, %s5485_s20  ;;  %v7824_v40 = vld [vmem:[%s8210_s17 + $0x58] sm:$0xff]  ;;  %3994 = vmatprep.subr.mxu1 %v7812_v53  ;;  %8568 = vst [vmem:[#allocation62_spill] sm:$0xff] %v7830_v61 }
 0xa89   :  { %8567 = vst [vmem:[#allocation48_spill] sm:$0xff] %v7824_v40  ;;  %3995 = vmatpush1.msra.mxu1 %v7818_v62 }
 0xa8a   :  { %3996 = vmatprep.subr.mxu1 %v7824_v40  ;;  %v7929_v40 = vld [vmem:[%s8210_s17 + $0x120] sm:$0xff] }
 0xa8b   :  { %4324 = vrot.lane.b32.xlu1 %v3468_v13, %s5485_s20  ;;  %v7836_v13 = vld [vmem:[%s8210_s17 + $0x48] sm:$0xff]  ;;  %3997 = vmatpush1.msra.mxu1 %v7830_v61  ;;  %8584 = vst [vmem:[#allocation72_spill] sm:$0xff] %v7929_v40 }
 0xa8c   :  { %4330 = vrot.lane.b32.xlu0 %v3471_v16, %s5485_s20  ;;  %8569 = vst [vmem:[#allocation43_spill] sm:$0xff] %v7836_v13  ;;  %v7842_v16 = vld [vmem:[%s8210_s17 + $0x40] sm:$0xff]  ;;  %3998 = vmatprep.subr.mxu1 %v7836_v13 }
 0xa8d   :  { %8570 = vst [vmem:[#allocation59_spill] sm:$0xff] %v7842_v16  ;;  %3999 = vmatpush1.msra.mxu1 %v7842_v16 }
 0xa8f   :  { %4328 = vrot.lane.b32.xlu1 %v3470_v41, %s5485_s20 }
 0xa90   :  { %4334 = vrot.lane.b32.xlu0 %v3473_v7, %s5485_s20 }
 0xa93   :  { %4332 = vrot.lane.b32.xlu1 %v3472_v26, %s5485_s20  ;;  %v7848_v26 = vld [vmem:[%s8210_s17 + $0x38] sm:$0xff] }
 0xa94   :  { %4338 = vrot.lane.b32.xlu0 %v3475_v45, %s5485_s20  ;;  %8571 = vst [vmem:[#allocation45_spill] sm:$0xff] %v7848_v26  ;;  %v7854_v45 = vld [vmem:[%s8210_s17 + $0x30] sm:$0xff]  ;;  %4000 = vmatprep.subr.mxu1 %v7848_v26  ;;  %v7908_v26 = vld [vmem:[%s8210_s17 + $0x138] sm:$0xff] }
 0xa95   :  { %8572 = vst [vmem:[#allocation61_spill] sm:$0xff] %v7854_v45  ;;  %4001 = vmatpush1.msra.mxu1 %v7854_v45  ;;  %8581 = vst [vmem:[#allocation69_spill] sm:$0xff] %v7908_v26 }
 0xa97   :  { %4336 = vrot.lane.b32.xlu1 %v3474_v58, %s5485_s20  ;;  %v7860_v58 = vld [vmem:[%s8210_s17 + $0x28] sm:$0xff] }
 0xa98   :  { %4342 = vrot.lane.b32.xlu0 %v3477_v54, %s5485_s20  ;;  %8573 = vst [vmem:[#allocation46_spill] sm:$0xff] %v7860_v58  ;;  %v7866_v54 = vld [vmem:[%s8210_s17 + $0x20] sm:$0xff]  ;;  %4002 = vmatprep.subr.mxu1 %v7860_v58 }
 0xa99   :  { %8574 = vst [vmem:[#allocation64_spill] sm:$0xff] %v7866_v54  ;;  %4003 = vmatpush1.msra.mxu1 %v7866_v54  ;;  %v7896_v54 = vld [vmem:[%s8210_s17 + $0x148] sm:$0xff] }
 0xa9a   :  { %8579 = vst [vmem:[#allocation67_spill] sm:$0xff] %v7896_v54 }
 0xa9b   :  { %4340 = vrot.lane.b32.xlu1 %v3476_v55, %s5485_s20 }
 0xa9c   :  { %4346 = vrot.lane.b32.xlu0 %v3479_v1, %s5485_s20 }
 0xa9f   :  { %4344 = vrot.lane.b32.xlu1 %v3478_v43, %s5485_s20  ;;  %v7872_v43 = vld [vmem:[%s8210_s17 + $0x18] sm:$0xff] }
 0xaa0   :  { %4350 = vrot.lane.b32.xlu0 %v3481_v44, %s5485_s20  ;;  %8575 = vst [vmem:[#allocation47_spill] sm:$0xff] %v7872_v43  ;;  %v7878_v44 = vld [vmem:[%s8210_s17 + $0x10] sm:$0xff]  ;;  %4004 = vmatprep.subr.mxu1 %v7872_v43  ;;  %v7902_v43 = vld [vmem:[%s8210_s17 + $0x140] sm:$0xff] }
 0xaa1   :  { %8576 = vst [vmem:[#allocation63_spill] sm:$0xff] %v7878_v44  ;;  %4005 = vmatpush1.msra.mxu1 %v7878_v44  ;;  %8580 = vst [vmem:[#allocation68_spill] sm:$0xff] %v7902_v43  ;;  %v7914_v44 = vld [vmem:[%s8210_s17 + $0x130] sm:$0xff] }
 0xaa2   :  { %8582 = vst [vmem:[#allocation70_spill] sm:$0xff] %v7914_v44 }
 0xaa3   :  { %4348 = vrot.lane.b32.xlu1 %v3480_v32, %s5485_s20  ;;  %v7738_v47 = vpop.xlane.xlu0 %3677  ;;  %v7884_v32 = vld [vmem:[%s8210_s17 + $0x8] sm:$0xff] }
 0xaa4   :  { %8577 = vst [vmem:[#allocation65_spill] sm:$0xff] %v7884_v32  ;;  %4006 = vmatprep.subr.mxu1 %v7884_v32 }
 0xaa7   :  { %4352 = vrot.lane.b32.xlu1 %v3482_v56, %s5485_s20  ;;  %v7764_v19 = vpop.xlane.xlu1 %3681  ;;  %v7890_v56 = vld [vmem:[%s8210_s17] sm:$0xff] }
 0xaa8   :  { %8578 = vst [vmem:[#allocation66_spill] sm:$0xff] %v7890_v56  ;;  %4007 = vmatpush1.msra.mxu1 %v7890_v56  ;;  %v7920_v56 = vld [vmem:[%s8210_s17 + $0x128] sm:$0xff] }
 0xaa9   :  { %4030 = vmatprep.subr.mxu1 %v7896_v54  ;;  %8583 = vst [vmem:[#allocation71_spill] sm:$0xff] %v7920_v56 }
 0xaaa   :  { %4031 = vmatpush2.msra.mxu1 %v7902_v43 }
 0xaab   :  { %v7766_v23 = vpop.xlane.xlu0 %3685  ;;  %4032 = vmatprep.subr.mxu1 %v7908_v26 }
 0xaac   :  { %4033 = vmatpush2.msra.mxu1 %v7914_v44 }
 0xaad   :  { %4034 = vmatprep.subr.mxu1 %v7920_v56 }
 0xaae   :  { %4035 = vmatpush2.msra.mxu1 %v7929_v40 }
 0xaaf   :  { %v7792_v2 = vpop.xlane.xlu1 %3689 }
 0xab3   :  { %v7794_v8 = vpop.xlane.xlu0 %3693 }
 0xab4   :  { %v3739_v43 = vmax.f32 %v7738_v47, %v7794_v8 }
 0xab7   :  { %v3698_v29 = vpop.xlane.xlu1 %3697 }
 0xab8   :  { %v3740_v13 = vmax.f32 %v7764_v19, %v3698_v29 }
 0xabb   :  { %v3702_v27 = vpop.xlane.xlu0 %3701 }
 0xabc   :  { %v3741_v61 = vmax.f32 %v7766_v23, %v3702_v27 }
 0xabf   :  { %v3706_v41 = vpop.xlane.xlu1 %3705 }
 0xac0   :  { %v3742_v54 = vmax.f32 %v7792_v2, %v3706_v41 }
 0xac3   :  { %v3710_v7 = vpop.xlane.xlu0 %3709 }
 0xac4   :  { %v3743_v2 = vmax.f32 %v3739_v43, %v3710_v7 }
 0xac7   :  { %v3714_v55 = vpop.xlane.xlu1 %3713 }
 0xac8   :  { %v3744_v62 = vmax.f32 %v3740_v13, %v3714_v55 }
 0xacb   :  { %v3718_v1 = vpop.xlane.xlu0 %3717 }
 0xacc   :  { %v3745_v53 = vmax.f32 %v3741_v61, %v3718_v1 }
 0xacf   :  { %v3722_v58 = vpop.xlane.xlu1 %3721 }
 0xad0   :  { %v3746_v11 = vmax.f32 %v3742_v54, %v3722_v58 }
 0xad3   :  { %v3726_v45 = vpop.xlane.xlu0 %3725 }
 0xad4   :  { %v3747_v26 = vmax.f32 %v3743_v2, %v3726_v45 }
 0xad7   :  { %v3730_v32 = vpop.xlane.xlu1 %3729 }
 0xad8   :  { %v3748_v29 = vmax.f32 %v3744_v62, %v3730_v32 }
 0xada   :  { %v3751_v52 = vmax.f32 %v3747_v26, %v3748_v29  ;;  %v8585_v29 = vld [vmem:[#allocation3_spill] sm:$0xff] }
 0xadb   :  { %v3734_v16 = vpop.xlane.xlu0 %3733 }
 0xadc   :  { %v3749_v27 = vmax.f32 %v3745_v53, %v3734_v16 }
 0xadf   :  { %v3738_v19 = vpop.xlane.xlu1 %3737  ;;  %v4259_v23 = vpop.permute.xlu0 %4258 }
 0xae0   :  { %v3750_v41 = vmax.f32 %v3746_v11, %v3738_v19 }
 0xae2   :  { %v3752_v51 = vmax.f32 %v3749_v27, %v3750_v41  ;;  %v4370_v27 = vsel %vm457_vm2, %v8585_v29, %v4259_v23 }
 0xae3   :  { %v4261_v42 = vpop.permute.xlu1 %4260  ;;  %v4267_v44 = vpop.permute.xlu0 %4266 }
 0xae4   :  { %v3753_v39 = vmax.f32 %v3751_v52, %v3752_v51  ;;  %v4374_v14 = vsel %vm457_vm2, %v8588_v57, %v4267_v44 }
 0xae6   :  { %v3754_v61 = vrot.slane %v3753_v39, 4 }
 0xae7   :  { %v4263_v47 = vpop.permute.xlu1 %4262  ;;  %v4271_v8 = vpop.permute.xlu0 %4270 }
 0xae8   :  { %v3755_v54 = vmax.f32 %v3753_v39, %v3754_v61  ;;  %v8586_v61 = vld [vmem:[#allocation4_spill] sm:$0xff] }
 0xaea   :  { %v3756_v40 = vrot.slane %v3755_v54, 2 }
 0xaeb   :  { %v4265_v13 = vpop.permute.xlu1 %4264  ;;  %v4275_v58 = vpop.permute.xlu0 %4274 }
 0xaec   :  { %v3757_v11 = vmax.f32 %v3755_v54, %v3756_v40  ;;  %v4371_v54 = vsel %vm457_vm2, %v8586_v61, %v4261_v42 }
 0xaee   :  { %v3758_v52 = vrot.slane %v3757_v11, 1 }
 0xaef   :  { %v4269_v55 = vpop.permute.xlu1 %4268  ;;  %v7936_v1 = vpop.permute.xlu0 %4278 }
 0xaf0   :  { %v7948_v45 = vmax.f32 %v3757_v11, %v3758_v52  ;;  %v8587_v11 = vld [vmem:[#allocation5_spill] sm:$0xff] }
 0xaf1   :  { %v4372_v52 = vsel %vm457_vm2, %v8587_v11, %v4263_v47  ;;  %v8589_v47 = vld [vmem:[#allocation9_spill] sm:$0xff] }
 0xaf2   :  { %v3774_v32 = vsub.f32 %v7515_v37, %v7948_v45  ;;  %v3775_v19 = vsub.f32 %v7323_v30, %v7948_v45  ;;  %v3773_v41 = vsub.f32 %v7307_v46, %v7948_v45  ;;  %v3772_v30 = vsub.f32 %v7501_v15, %v7948_v45 }
 0xaf3   :  { %v7938_v7 = vpop.permute.xlu1 %4272  ;;  %v7940_v53 = vpop.permute.xlu0 %4282  ;;  %v3771_v42 = vsub.f32 %v7339_v25, %v7948_v45 }
 0xaf4   :  { %v3820_v56 = vmul.f32 1.442695, %v3774_v32  ;;  %v3822_v23 = vmul.f32 1.442695, %v3775_v19  ;;  %v3770_v32 = vsub.f32 %v7487_v20, %v7948_v45  ;;  %v3818_v19 = vmul.f32 1.442695, %v3773_v41 }
 0xaf5   :  { %v3768_v20 = vsub.f32 %v7470_v9, %v7948_v45  ;;  %v8591_v41 = vld [vmem:[#allocation11_spill] sm:$0xff] }
 0xaf6   :  { %5418 = vpow2.f32 %v3820_v56  ;;  %v4378_v61 = vsel %vm457_vm2, %v8591_v41, %v4275_v58 }
 0xaf7   :  { %v7942_v62 = vpop.permute.xlu1 %4276  ;;  %v7944_v16 = vpop.permute.xlu0 %4286  ;;  %5420 = vpow2.f32 %v3822_v23  ;;  %v3808_v58 = vmul.f32 1.442695, %v3768_v20  ;;  %v3763_v23 = vsub.f32 %v7299_v21, %v7948_v45  ;;  %v3790_v21 = vsub.f32 %v7622_v35, %v7948_v45 }
 0xaf8   :  { %5422 = vpow2.f32 %v3818_v19  ;;  %v8595_v19 = vld [vmem:[#allocation15_spill] sm:$0xff] }
 0xaf9   :  { %v4382_v20 = vsel %vm457_vm2, %v8595_v19, %v7940_v53  ;;  %v8596_v53 = vld [vmem:[#allocation38_spill] sm:$0xff]  ;;  %v8605_v19 = vld [vmem:[#allocation51_spill] sm:$0xff] }
 0xafb   :  { %v7946_v51 = vpop.permute.xlu1 %4280  ;;  %v4323_v26 = vpop.permute.xlu0 %4322 }
 0xafc   :  { %v4386_v37 = vsel %vm304_vm1, %v4370_v27, %v4323_v26  ;;  %v4376_v26 = vsel %vm457_vm2, %v8589_v47, %v4271_v8  ;;  %v3769_v8 = vsub.f32 %v7315_v18, %v7948_v45  ;;  %v3767_v18 = vsub.f32 %v7291_v38, %v7948_v45  ;;  %v8592_v38 = vld [vmem:[#allocation8_spill] sm:$0xff] }
 0xafd   :  { %4402 = vst [vmem:[%s8213_s18] sm:$0xff] %v4386_v37  ;;  %v3814_v27 = vmul.f32 1.442695, %v3771_v42  ;;  %v3812_v37 = vmul.f32 1.442695, %v3770_v32  ;;  %v3760_v32 = vsub.f32 %v7353_v28, %v7948_v45 }
 0xafe   :  { %v3806_v47 = vmul.f32 1.442695, %v3767_v18  ;;  %v3786_v18 = vsub.f32 %v7599_v63, %v7948_v45 }
 0xaff   :  { %v7950_v39 = vpop.permute.xlu1 %4284  ;;  %v4327_v43 = vpop.permute.xlu0 %4326  ;;  %v3792_v63 = vmul.f32 1.442695, %v3760_v32 }
 0xb00   :  { %v4388_v46 = vsel %vm304_vm1, %v4372_v52, %v4327_v43  ;;  %v3766_v52 = vsub.f32 %v7443_v33, %v7948_v45  ;;  %v3764_v33 = vsub.f32 %v7413_v31, %v7948_v45 }
 0xb01   :  { %4404 = vst [vmem:[%s8213_s18 + $0x10] sm:$0xff] %v4388_v46  ;;  %v4375_v46 = vsel %vm457_vm2, %v8592_v38, %v4269_v55  ;;  %v3762_v55 = vsub.f32 %v7383_v48, %v7948_v45 }
 0xb02   :  { %v3800_v28 = vmul.f32 1.442695, %v3764_v33  ;;  %v8599_v33 = vld [vmem:[#allocation40_spill] sm:$0xff] }
 0xb03   :  { %v7956_v40 = vpop.permute.xlu1 %4288  ;;  %v4331_v2 = vpop.permute.xlu0 %4330 }
 0xb04   :  { %v4390_v15 = vsel %vm304_vm1, %v4374_v14, %v4331_v2  ;;  %v3816_v14 = vmul.f32 1.442695, %v3772_v30  ;;  %v8590_v2 = vld [vmem:[#allocation2_spill] sm:$0xff]  ;;  %v3810_v30 = vmul.f32 1.442695, %v3769_v8 }
 0xb05   :  { %4406 = vst [vmem:[%s8213_s18 + $0x20] sm:$0xff] %v4390_v15  ;;  %v4373_v29 = vsel %vm457_vm2, %v8590_v2, %v4265_v13  ;;  %v3765_v13 = vsub.f32 %v7275_v50, %v7948_v45  ;;  %v8593_v50 = vld [vmem:[#allocation10_spill] sm:$0xff] }
 0xb06   :  { %5424 = vpow2.f32 %v3816_v14  ;;  %v4380_v42 = vsel %vm457_vm2, %v8593_v50, %v7936_v1  ;;  %v3761_v1 = vsub.f32 %v7283_v17, %v7948_v45  ;;  %v8594_v17 = vld [vmem:[#allocation6_spill] sm:$0xff] }
 0xb07   :  { %v4325_v57 = vpop.permute.xlu1 %4324  ;;  %v4335_v44 = vpop.permute.xlu0 %4334  ;;  %5426 = vpow2.f32 %v3814_v27  ;;  %v3802_v48 = vmul.f32 1.442695, %v3765_v13  ;;  %v4377_v8 = vsel %vm457_vm2, %v8594_v17, %v7938_v7  ;;  %v3789_v27 = vsub.f32 %v7404_v4, %v7948_v45 }
 0xb08   :  { %v4387_v25 = vsel %vm304_vm1, %v4371_v54, %v4325_v57  ;;  %v4392_v43 = vsel %vm304_vm1, %v4376_v26, %v4335_v44  ;;  %v3804_v57 = vmul.f32 1.442695, %v3766_v52  ;;  %5428 = vpow2.f32 %v3812_v37  ;;  %v8598_v37 = vld [vmem:[#allocation14_spill] sm:$0xff] }
 0xb09   :  { %4403 = vst [vmem:[%s8213_s18 + $0x8] sm:$0xff] %v4387_v25  ;;  %4408 = vst [vmem:[%s8213_s18 + $0x30] sm:$0xff] %v4392_v43  ;;  %5430 = vpow2.f32 %v3810_v30  ;;  %v3791_v25 = vsub.f32 %v7434_v0, %v7948_v45  ;;  %v3798_v43 = vmul.f32 1.442695, %v3763_v23  ;;  %v3794_v41 = vmul.f32 1.442695, %v3761_v1 }
 0xb0a   :  { %5432 = vpow2.f32 %v3808_v58  ;;  %v3787_v7 = vsub.f32 %v7451_v49, %v7948_v45  ;;  %v3852_v49 = vmul.f32 1.442695, %v3790_v21  ;;  %v3785_v58 = vsub.f32 %v8599_v33, %v7948_v45  ;;  %v8603_v1 = vld [vmem:[#allocation37_spill] sm:$0xff] }
 0xb0b   :  { %v4329_v54 = vpop.permute.xlu1 %4328  ;;  %v4339_v11 = vpop.permute.xlu0 %4338  ;;  %5434 = vpow2.f32 %v3806_v47  ;;  %v3854_v4 = vmul.f32 1.442695, %v3791_v25  ;;  %v3850_v50 = vmul.f32 1.442695, %v3789_v27  ;;  %v8601_v47 = vld [vmem:[#allocation35_spill] sm:$0xff] }
 0xb0c   :  { %v4389_v9 = vsel %vm304_vm1, %v4373_v29, %v4329_v54  ;;  %v4394_v56 = vsel %vm304_vm1, %v4378_v61, %v4339_v11  ;;  %v3796_v29 = vmul.f32 1.442695, %v3762_v55  ;;  %5436 = vpow2.f32 %v3804_v57  ;;  %v5419_v54 = vpop.eup %5418  ;;  %v8597_v11 = vld [vmem:[#allocation13_spill] sm:$0xff]  ;;  %v8602_v57 = vld [vmem:[#allocation12_spill] sm:$0xff] }
 0xb0d   :  { %4405 = vst [vmem:[%s8213_s18 + $0x18] sm:$0xff] %v4389_v9  ;;  %4410 = vst [vmem:[%s8213_s18 + $0x40] sm:$0xff] %v4394_v56  ;;  %5438 = vpow2.f32 %v3802_v48  ;;  %v3788_v61 = vsub.f32 %v8596_v53, %v7948_v45  ;;  %v4379_v52 = vsel %vm457_vm2, %v8597_v11, %v7942_v62  ;;  %v4384_v9 = vsel %vm457_vm2, %v8598_v37, %v7944_v16  ;;  %v5421_v30 = vpop.eup %5420  ;;  %v8600_v16 = vld [vmem:[#allocation53_spill] sm:$0xff]  ;;  %v8608_v53 = vld [vmem:[#allocation36_spill] sm:$0xff] }
 0xb0e   :  { %5440 = vpow2.f32 %v3800_v28  ;;  %3876 = vmatprep.subr.mxu0 %v5421_v30  ;;  %v5423_v62 = vpop.eup %5422  ;;  %v3782_v48 = vsub.f32 %v8603_v1, %v7948_v45  ;;  %v3844_v21 = vmul.f32 1.442695, %v3786_v18  ;;  %v8607_v18 = vld [vmem:[#allocation17_spill] sm:$0xff]  ;;  %v8609_v11 = vld [vmem:[#allocation50_spill] sm:$0xff] }
 0xb0f   :  { %v4333_v26 = vpop.permute.xlu1 %4332  ;;  %v4343_v15 = vpop.permute.xlu0 %4342  ;;  %5442 = vpow2.f32 %v3798_v43  ;;  %v3848_v55 = vmul.f32 1.442695, %v3788_v61  ;;  %3877 = vmatpush1.msra.mxu0 %v5419_v54  ;;  %v8604_v43 = vld [vmem:[#allocation34_spill] sm:$0xff]  ;;  %v4383_v27 = vsel %vm457_vm2, %v8607_v18, %v7950_v39  ;;  %v3778_v61 = vsub.f32 %v8608_v53, %v7948_v45  ;;  %v8630_v18 = vld [vmem:[#allocation47_spill] sm:$0xff] }
 0xb10   :  { %v4391_v31 = vsel %vm304_vm1, %v4375_v46, %v4333_v26  ;;  %v4396_v44 = vsel %vm304_vm1, %v4380_v42, %v4343_v15  ;;  %5444 = vpow2.f32 %v3796_v29  ;;  %v3784_v42 = vsub.f32 %v8600_v16, %v7948_v45  ;;  %3878 = vmatprep.subr.mxu0 %v5423_v62  ;;  %v8606_v29 = vld [vmem:[#allocation52_spill] sm:$0xff]  ;;  %v8634_v53 = vld [vmem:[#allocation67_spill] sm:$0xff] }
 0xb11   :  { %4407 = vst [vmem:[%s8213_s18 + $0x28] sm:$0xff] %v4391_v31  ;;  %4412 = vst [vmem:[%s8213_s18 + $0x50] sm:$0xff] %v4396_v44  ;;  %5446 = vpow2.f32 %v3794_v41  ;;  %v3783_v26 = vsub.f32 %v8601_v47, %v7948_v45  ;;  %v3846_v15 = vmul.f32 1.442695, %v3787_v7  ;;  %v4381_v31 = vsel %vm457_vm2, %v8602_v57, %v7946_v51 }
 0xb12   :  { %5448 = vpow2.f32 %v3792_v63  ;;  %v3781_v17 = vsub.f32 %v8604_v43, %v7948_v45  ;;  %v3836_v63 = vmul.f32 1.442695, %v3782_v48  ;;  %v8612_v57 = vmov 0.0  }
 0xb13   :  { %v4337_v14 = vpop.permute.xlu1 %4336  ;;  %v4347_v2 = vpop.permute.xlu0 %4346  ;;  %5450 = vpow2.f32 %v3854_v4 }
 0xb14   :  { %v4393_v35 = vsel %vm304_vm1, %v4377_v8, %v4337_v14  ;;  %v4398_v0 = vsel %vm304_vm1, %v4382_v20, %v4347_v2  ;;  %v5425_v23 = vpop.eup %5424  ;;  %5452 = vpow2.f32 %v3852_v49  ;;  %v3842_v8 = vmul.f32 1.442695, %v3785_v58 }
 0xb15   :  { %4409 = vst [vmem:[%s8213_s18 + $0x38] sm:$0xff] %v4393_v35  ;;  %4414 = vst [vmem:[%s8213_s18 + $0x60] sm:$0xff] %v4398_v0  ;;  %v5427_v32 = vpop.eup %5426  ;;  %3879 = vmatpush1.msra.mxu0 %v5425_v23  ;;  %5454 = vpow2.f32 %v3850_v50  ;;  %v3780_v20 = vsub.f32 %v8605_v19, %v7948_v45  ;;  %v3840_v14 = vmul.f32 1.442695, %v3784_v42  ;;  %v3779_v35 = vsub.f32 %v8606_v29, %v7948_v45  ;;  %v8627_v29 = vld [vmem:[#allocation61_spill] sm:$0xff] }
 0xb16   :  { %v5429_v28 = vpop.eup %5428  ;;  %3880 = vmatprep.subr.mxu0 %v5427_v32  ;;  %5456 = vpow2.f32 %v3848_v55  ;;  %v3838_v0 = vmul.f32 1.442695, %v3783_v26  ;;  %v3834_v37 = vmul.f32 1.442695, %v3781_v17  ;;  %v3828_v50 = vmul.f32 1.442695, %v3778_v61 }
 0xb17   :  { %v4341_v56 = vpop.permute.xlu1 %4340  ;;  %v4351_v13 = vpop.permute.xlu0 %4350  ;;  %3881 = vmatpush1.msra.mxu0 %v5429_v28  ;;  %5458 = vpow2.f32 %v3846_v15  ;;  %v3830_v49 = vmul.f32 1.442695, %v3779_v35  ;;  %v8628_v35 = vld [vmem:[#allocation46_spill] sm:$0xff]  ;;  %v8635_v61 = vld [vmem:[#allocation68_spill] sm:$0xff] }
 0xb18   :  { %v4395_v38 = vsel %vm304_vm1, %v4379_v52, %v4341_v56  ;;  %v4400_v46 = vsel %vm304_vm1, %v4384_v9, %v4351_v13  ;;  %v5431_v51 = vpop.eup %5430  ;;  %5460 = vpow2.f32 %v3844_v21  ;;  %v3777_v52 = vsub.f32 %v8609_v11, %v7948_v45  ;;  %v8610_v9 = vld [vmem:[#allocation54_spill] sm:$0xff]  ;;  %v8639_v11 = vld [vmem:[#allocation72_spill] sm:$0xff] }
 0xb19   :  { %4411 = vst [vmem:[%s8213_s18 + $0x48] sm:$0xff] %v4395_v38  ;;  %4416 = vst [vmem:[%s8213_s18 + $0x70] sm:$0xff] %v4400_v46  ;;  %v5433_v2 = vpop.eup %5432  ;;  %3882 = vmatprep.subr.mxu0 %v5431_v51  ;;  %5462 = vpow2.f32 %v3842_v8  ;;  %v3776_v56 = vsub.f32 %v8610_v9, %v7948_v45  ;;  %v3832_v13 = vmul.f32 1.442695, %v3780_v20  ;;  %v8611_v38 = vld [vmem:[#allocation16_spill] sm:$0xff]  ;;  %v8624_v20 = vld [vmem:[#allocation43_spill] sm:$0xff] }
 0xb1a   :  { %v5435_v7 = vpop.eup %5434  ;;  %3883 = vmatpush1.msra.mxu0 %v5433_v2  ;;  %5464 = vpow2.f32 %v3840_v14  ;;  %v4385_v46 = vsel %vm457_vm2, %v8611_v38, %v7956_v40  ;;  %v3826_v45 = vmul.f32 1.442695, %v3777_v52  ;;  %v3856_v40 = vld [vmem:[%s8211_s16] sm:$0xff]  ;;  %v8625_v14 = vld [vmem:[#allocation59_spill] sm:$0xff]  ;;  %v8626_v2 = vld [vmem:[#allocation45_spill] sm:$0xff] }
 0xb1b   :  { %v4345_v44 = vpop.permute.xlu1 %4344  ;;  %v5437_v4 = vpop.eup %5436  ;;  %3884 = vmatprep.subr.mxu0 %v5435_v7  ;;  %5466 = vpow2.f32 %v3838_v0  ;;  %v3824_v55 = vmul.f32 1.442695, %v3776_v56  ;;  %v8629_v0 = vld [vmem:[#allocation64_spill] sm:$0xff]  ;;  %v8633_v7 = vld [vmem:[#allocation66_spill] sm:$0xff]  ;;  %v3966_v52 = vld [vmem:[%s8210_s17 + $0x118] sm:$0xff] }
 0xb1c   :  { %v4397_v25 = vsel %vm304_vm1, %v4381_v31, %v4345_v44  ;;  %v5439_v39 = vpop.eup %5438  ;;  %3885 = vmatpush1.msra.mxu0 %v5437_v4  ;;  %5468 = vpow2.f32 %v3836_v63  ;;  %v8636_v63 = vld [vmem:[#allocation69_spill] sm:$0xff]  ;;  %v8638_v4 = vld [vmem:[#allocation71_spill] sm:$0xff]  ;;  %4036 = vmatprep.subr.mxu1 %v3966_v52  ;;  %v3963_v9 = vld [vmem:[%s8210_s17 + $0x100] sm:$0xff] }
 0xb1d   :  { %4413 = vst [vmem:[%s8213_s18 + $0x58] sm:$0xff] %v4397_v25  ;;  %v5441_v30 = vpop.eup %5440  ;;  %3886 = vmatprep.subr.mxu0 %v5439_v39  ;;  %5470 = vpow2.f32 %v3834_v37  ;;  %v3965_v37 = vld [vmem:[%s8210_s17 + $0x110] sm:$0xff]  ;;  %v3964_v39 = vld [vmem:[%s8210_s17 + $0x108] sm:$0xff] }
 0xb1e   :  { %v5443_v58 = vpop.eup %5442  ;;  %3887 = vmatpush1.msra.mxu0 %v5441_v30  ;;  %5472 = vpow2.f32 %v3832_v13  ;;  %4037 = vmatpush2.msra.mxu1 %v3965_v37 }
 0xb1f   :  { %v4349_v41 = vpop.permute.xlu1 %4348  ;;  %v5445_v16 = vpop.eup %5444  ;;  %3888 = vmatprep.subr.mxu0 %v5443_v58  ;;  %5474 = vpow2.f32 %v3830_v49  ;;  %4038 = vmatprep.subr.mxu1 %v3964_v39 }
 0xb20   :  { %v4399_v54 = vsel %vm304_vm1, %v4383_v27, %v4349_v41  ;;  %v5447_v42 = vpop.eup %5446  ;;  %3889 = vmatpush1.msra.mxu0 %v5445_v16  ;;  %5476 = vpow2.f32 %v3828_v50  ;;  %v8631_v27 = vld [vmem:[#allocation63_spill] sm:$0xff]  ;;  %v8632_v41 = vld [vmem:[#allocation65_spill] sm:$0xff]  ;;  %4039 = vmatpush2.msra.mxu1 %v3963_v9 }
 0xb21   :  { %4415 = vst [vmem:[%s8213_s18 + $0x68] sm:$0xff] %v4399_v54  ;;  %v5449_v23 = vpop.eup %5448  ;;  %3890 = vmatprep.subr.mxu0 %v5447_v42  ;;  %5478 = vpow2.f32 %v3826_v45  ;;  %v8637_v54 = vld [vmem:[#allocation70_spill] sm:$0xff] }
 0xb22   :  { %v5451_v47 = vpop.eup %5450  ;;  %3891 = vmatpush1.msra.mxu0 %v5449_v23  ;;  %5480 = vpow2.f32 %v3824_v55 }
 0xb23   :  { %v4353_v33 = vpop.permute.xlu1 %4352  ;;  %v5453_v26 = vpop.eup %5452  ;;  %4069 = vmatprep.subr.mxu0 %v5451_v47  ;;  %4750 = vmatmul.mubr.msk.f32.vlgmr.msra.gmra.mxu0 %vm304_vm1, %v3856_v40 }
 0xb24   :  { %v4401_v62 = vsel %vm304_vm1, %v4385_v46, %v4353_v33  ;;  %v5455_v15 = vpop.eup %5454  ;;  %4070 = vmatpush1.msra.mxu0 %v5453_v26  ;;  %4117 = vmatprep.mubr.f32.mxu0 %v8612_v57 }
 0xb25   :  { %4417 = vst [vmem:[%s8213_s18 + $0x78] sm:$0xff] %v4401_v62  ;;  %v5457_v31 = vpop.eup %5456  ;;  %4071 = vmatprep.subr.mxu0 %v5455_v15 }
 0xb26   :  { %v5459_v44 = vpop.eup %5458  ;;  %4072 = vmatpush1.msra.mxu0 %v5457_v31 }
 0xb27   :  { %v5461_v32 = vpop.eup %5460  ;;  %4073 = vmatprep.subr.mxu0 %v5459_v44 }
 0xb28   :  { %v5463_v1 = vpop.eup %5462  ;;  %4074 = vmatpush1.msra.mxu0 %v5461_v32 }
 0xb29   :  { %v5465_v48 = vpop.eup %5464  ;;  %4075 = vmatprep.subr.mxu0 %v5463_v1 }
 0xb2a   :  { %v5467_v21 = vpop.eup %5466  ;;  %4076 = vmatpush1.msra.mxu0 %v5465_v48 }
 0xb2b   :  { %v5469_v25 = vpop.eup %5468  ;;  %4077 = vmatprep.subr.mxu0 %v5467_v21 }
 0xb2c   :  { %v5471_v28 = vpop.eup %5470  ;;  %4078 = vmatpush1.msra.mxu0 %v5469_v25 }
 0xb2d   :  { %v5473_v43 = vpop.eup %5472  ;;  %4079 = vmatprep.subr.mxu0 %v5471_v28 }
 0xb2e   :  { %v5475_v17 = vpop.eup %5474  ;;  %4080 = vmatpush1.msra.mxu0 %v5473_v43 }
 0xb2f   :  { %v5477_v8 = vpop.eup %5476  ;;  %4081 = vmatprep.subr.mxu0 %v5475_v17 }
 0xb30   :  { %v5479_v51 = vpop.eup %5478  ;;  %4082 = vmatpush1.msra.mxu0 %v5477_v8 }
 0xb31   :  { %v5481_v19 = vpop.eup %5480  ;;  %4083 = vmatprep.subr.mxu0 %v5479_v51 }
 0xb32   :  { %4084 = vmatpush1.msra.mxu0 %v5481_v19 }
 0xb33   :  { %4752 = vmatmul.mubr.msk.f32.vlgmr.msra.gmra.mxu0 %vm304_vm1, %v3856_v40  ;;  %4169 = vmatprep.subr.mxu0 %v7696_v6  ;;  %v8613_v6 = vld [vmem:[#allocation56_spill] sm:$0xff] }
 0xb34   :  { %4170 = vmatpush1.msra.mxu0 %v7701_v22  ;;  %v8614_v22 = vld [vmem:[#allocation44_spill] sm:$0xff] }
 0xb35   :  { %4171 = vmatprep.subr.mxu0 %v7706_v12  ;;  %v8615_v12 = vld [vmem:[#allocation58_spill] sm:$0xff] }
 0xb36   :  { %4172 = vmatpush1.msra.mxu0 %v7712_v10  ;;  %v8616_v10 = vld [vmem:[#allocation39_spill] sm:$0xff] }
 0xb37   :  { %4173 = vmatprep.subr.mxu0 %v7718_v60  ;;  %v8617_v60 = vld [vmem:[#allocation55_spill] sm:$0xff] }
 0xb38   :  { %4174 = vmatpush1.msra.mxu0 %v7724_v34  ;;  %v8618_v34 = vld [vmem:[#allocation41_spill] sm:$0xff] }
 0xb39   :  { %4175 = vmatprep.subr.mxu0 %v7730_v36  ;;  %v8619_v36 = vld [vmem:[#allocation57_spill] sm:$0xff] }
 0xb3a   :  { %4176 = vmatpush1.msra.mxu0 %v7736_v24  ;;  %v8620_v24 = vld [vmem:[#allocation42_spill] sm:$0xff] }
 0xb3b   :  { %4177 = vmatprep.subr.mxu0 %v7744_v59  ;;  %v8621_v59 = vld [vmem:[#allocation60_spill] sm:$0xff] }
 0xb3c   :  { %4178 = vmatpush1.msra.mxu0 %v7750_v5  ;;  %v8622_v5 = vld [vmem:[#allocation48_spill] sm:$0xff] }
 0xb3d   :  { %4179 = vmatprep.subr.mxu0 %v7756_v3  ;;  %v8623_v3 = vld [vmem:[#allocation62_spill] sm:$0xff] }
 0xb3e   :  { %4180 = vmatpush1.msra.mxu0 %v8613_v6 }
 0xb3f   :  { %4181 = vmatprep.subr.mxu0 %v8614_v22 }
 0xb40   :  { %4182 = vmatpush1.msra.mxu0 %v8615_v12 }
 0xb41   :  { %4183 = vmatprep.subr.mxu0 %v8616_v10 }
 0xb42   :  { %4184 = vmatpush1.msra.mxu0 %v8617_v60 }
 0xb43   :  { %4185 = vmatprep.subr.mxu0 %v8618_v34 }
 0xb44   :  { %4186 = vmatpush1.msra.mxu0 %v8619_v36 }
 0xb45   :  { %4187 = vmatprep.subr.mxu0 %v8620_v24 }
 0xb46   :  { %4188 = vmatpush1.msra.mxu0 %v8621_v59 }
 0xb47   :  { %4189 = vmatprep.subr.mxu0 %v8622_v5 }
 0xb48   :  { %4190 = vmatpush1.msra.mxu0 %v8623_v3 }
 0xb49   :  { %4191 = vmatprep.subr.mxu0 %v8624_v20 }
 0xb4a   :  { %4192 = vmatpush1.msra.mxu0 %v8625_v14 }
 0xb4b   :  { %4193 = vmatprep.subr.mxu0 %v8626_v2 }
 0xb4c   :  { %4194 = vmatpush1.msra.mxu0 %v8627_v29 }
 0xb4d   :  { %4195 = vmatprep.subr.mxu0 %v8628_v35 }
 0xb4e   :  { %4196 = vmatpush1.msra.mxu0 %v8629_v0 }
 0xb4f   :  { %4197 = vmatprep.subr.mxu0 %v8630_v18 }
 0xb50   :  { %4198 = vmatpush1.msra.mxu0 %v8631_v27 }
 0xb51   :  { %4199 = vmatprep.subr.mxu0 %v8632_v41 }
 0xb52   :  { %4200 = vmatpush1.msra.mxu0 %v8633_v7 }
 0xb53   :  { %4223 = vmatprep.subr.mxu0 %v8634_v53 }
 0xb54   :  { %4224 = vmatpush2.msra.mxu0 %v8635_v61 }
 0xb55   :  { %4225 = vmatprep.subr.mxu0 %v8636_v63 }
 0xb56   :  { %4226 = vmatpush2.msra.mxu0 %v8637_v54 }
 0xb57   :  { %4227 = vmatprep.subr.mxu0 %v8638_v4 }
 0xb58   :  { %4228 = vmatpush2.msra.mxu0 %v8639_v11 }
 0xb59   :  { %4229 = vmatprep.subr.mxu0 %v3966_v52 }
 0xb5a   :  { %4230 = vmatpush2.msra.mxu0 %v3965_v37 }
 0xb5b   :  { %4231 = vmatprep.subr.mxu0 %v3964_v39 }
 0xb5c   :  { %4232 = vmatpush2.msra.mxu0 %v3963_v9 }
 0xbe3   :  { %v3926_v56 = vpop.f32.mrf.mxu0 }
 0xbe5   :  { %v3928_v13 = vpop.f32.mrf.mxu0 }
 0xbe6   :  { %4751 = vmatprep.mubr.msk.f32.mxu1 %vm2371_vm3, %v3928_v13 }
 0xbe7   :  { %4041 = vmatmul.mubr.f32.vlgmr.msra.gmra.mxu1 %v3926_v56 }
 0xbf3   :  { %v4119_v30 = vpop.f32.mrf.mxu0 }
 0xbf5   :  { %v4121_v49 = vpop.f32.mrf.mxu0 }
 0xbf6   :  { %4753 = vmatprep.mubr.msk.f32.mxu0 %vm2371_vm3, %v4121_v49 }
 0xbf7   :  { %4234 = vmatmul.mubr.f32.vlgmr.msra.gmra.mxu0 %v4119_v30 }
 0xca7   :  { %v4042_v38 = vpop.f32.mrf.mxu1 }
 0xca8   :  { %4047 = vst [vmem:[%s8212_s21 + $0x10] sm:$0xff] %v4042_v38 }
 0xca9   :  { %v4044_v46 = vpop.f32.mrf.mxu1 }
 0xcaa   :  { %4048 = vst [vmem:[%s8212_s21 + $0x18] sm:$0xff] %v4044_v46 }
 0xcb7   :  { %v4235_v33 = vpop.f32.mrf.mxu0 }
 0xcb8   :  { %4754 = vst [vmem:[%s8212_s21 + $0x30] sm:$0xff] %v4235_v33 }
 0xcb9   :  { %v4237_v58 = vpop.f32.mrf.mxu0 }
 0xcba   :  { %4755 = vst [vmem:[%s8212_s21 + $0x38] sm:$0xff] %v4237_v58 }

</bundles_post_ra>
